<compile_context>
chip_gen: v7x
topology: tpu7x:2x2x1
jax: 0.10.0
libtpu: 0.0.40
codegen_flags: <defaults>
</compile_context>

<pallas_src>
import jax
import jax.numpy as jnp
from jax.experimental import pallas as pl
from jax.experimental.pallas import tpu as pltpu

SELU_ALPHA = 1.6732632423543772848170429916717
SELU_SCALE = 1.0507009873554804934193349852946

# Matmul-operand dtype. bf16 inputs + f32 accumulation is the fast MXU path.
MXU_DTYPE = jnp.bfloat16

# Large finite negative (instead of -inf) so masked rows can never produce NaN.
NEG_INF = -1e30


def _selu(x):
    return SELU_SCALE * jnp.where(x > 0, x, SELU_ALPHA * (jnp.exp(x) - 1.0))


def _joint_softmax_attn(s_pm, s_sq, pv, v):
    """Joint softmax over [persistent scores ; sequence scores] and P@V."""
    m = jnp.maximum(jnp.max(s_pm, axis=-1, keepdims=True),
                    jnp.max(s_sq, axis=-1, keepdims=True))
    p_pm = jnp.exp(s_pm - m)
    p_sq = jnp.exp(s_sq - m)
    denom = (jnp.sum(p_pm, axis=-1, keepdims=True)
             + jnp.sum(p_sq, axis=-1, keepdims=True))
    attn = (jnp.dot(p_pm.astype(MXU_DTYPE), pv, preferred_element_type=jnp.float32)
            + jnp.dot(p_sq.astype(MXU_DTYPE), v, preferred_element_type=jnp.float32))
    return attn * pl.reciprocal(denom, approx=True)


# ----------------------------------------------------------------------------
# The whole CodeModel forward as one kernel (single grid step).
# ----------------------------------------------------------------------------
def code_model_kernel(tok_ref, embed_ref, bias_ref, sel_ref, bias_last_ref,
                      w1_qkv, w1_o, w1_m1, w1_m2, w1_pkt, w1_pv,
                      w2_qkv, w2_o, w2_m1, w2_m2, w2_pkt, w2_pv,
                      w3_q, w3_kv, w3_m1, w3_m2, w3_pkt, w3_pv, w3_head, w3_b,
                      out_ref):
    V, D = embed_ref.shape
    N = tok_ref.shape[0]                       # N = B * S (batch folded into sublanes)
    inv_sqrt_d = 1.0 / (float(D) ** 0.5)

    # ---- embedding lookup as a one-hot matmul on the MXU (no XLA gather) ----
    tok = tok_ref[...]                                             # (N, 1) int32
    vocab_col = jax.lax.broadcasted_iota(jnp.int32, (N, V), 1)
    onehot = jnp.where(vocab_col == tok, 1.0, 0.0).astype(MXU_DTYPE)
    x = jnp.dot(onehot, embed_ref[...],
                preferred_element_type=jnp.float32)                # (N, D) f32

    attn_bias = bias_ref[...]                                      # (N, N) f32, block-diag causal

    def mac(x_in, wqkv, wo, wm1, wm2, pk_t, pv):
        """Full MAC block for all N rows."""
        xm = x_in.astype(MXU_DTYPE)
        qkv = jnp.dot(xm, wqkv, preferred_element_type=jnp.float32)   # (N, 3D)
        q = qkv[:, :D]
        k = qkv[:, D:2 * D]
        v = qkv[:, 2 * D:]
        qm = q.astype(MXU_DTYPE)
        # neural long-term-memory retrieval: M(q) = SELU(q Wm1) Wm2
        h = _selu(jnp.dot(qm, wm1, preferred_element_type=jnp.float32))
        mem = jnp.dot(h.astype(MXU_DTYPE), wm2, preferred_element_type=jnp.float32)
        # attention over [persistent ; causal sequence], kept split
        s_pm = jnp.dot(qm, pk_t, preferred_element_type=jnp.float32) * inv_sqrt_d
        s_sq = jax.lax.dot_general(qm, k.astype(MXU_DTYPE),
                                   (((1,), (1,)), ((), ())),
                                   preferred_element_type=jnp.float32) * inv_sqrt_d
        s_sq = s_sq + attn_bias
        attn = _joint_softmax_attn(s_pm, s_sq, pv, v.astype(MXU_DTYPE))
        y = attn + mem
        return jnp.dot(y.astype(MXU_DTYPE), wo, preferred_element_type=jnp.float32)

    # layer 1
    x2 = mac(x, w1_qkv[...], w1_o[...], w1_m1[...], w1_m2[...], w1_pkt[...], w1_pv[...])
    x_in2 = _selu(x2 + x)
    # layer 2
    x3 = mac(x_in2, w2_qkv[...], w2_o[...], w2_m1[...], w2_m2[...], w2_pkt[...], w2_pv[...])
    x_in3 = _selu(x3 + x2)

    # ---- layer 3: last-token-only query path (k/v for all rows) ------------
    x3m = x_in3.astype(MXU_DTYPE)
    kv = jnp.dot(x3m, w3_kv[...], preferred_element_type=jnp.float32)  # (N, 2D)
    k3 = kv[:, :D]
    v3 = kv[:, D:]
    # pick the last row of each sequence via a tiny (B, N) selection matmul
    x_last = jnp.dot(sel_ref[...], x3m, preferred_element_type=jnp.float32)      # (B, D)
    q_last = jnp.dot(x_last.astype(MXU_DTYPE), w3_q[...],
                     preferred_element_type=jnp.float32)                         # (B, D)
    qm = q_last.astype(MXU_DTYPE)
    h = _selu(jnp.dot(qm, w3_m1[...], preferred_element_type=jnp.float32))
    mem = jnp.dot(h.astype(MXU_DTYPE), w3_m2[...], preferred_element_type=jnp.float32)
    s_pm = jnp.dot(qm, w3_pkt[...], preferred_element_type=jnp.float32) * inv_sqrt_d
    s_sq = jax.lax.dot_general(qm, k3.astype(MXU_DTYPE),
                               (((1,), (1,)), ((), ())),
                               preferred_element_type=jnp.float32) * inv_sqrt_d   # (B, N)
    s_sq = s_sq + bias_last_ref[...]
    attn = _joint_softmax_attn(s_pm, s_sq, w3_pv[...], v3.astype(MXU_DTYPE))
    y_last = attn + mem                                                           # (B, D)

    # fused Wo @ proj_w head: one (B,D) x (D,V) matmul + bias
    out_ref[...] = (jnp.dot(y_last.astype(MXU_DTYPE), w3_head[...],
                            preferred_element_type=jnp.float32)
                    + w3_b[...])                                                  # (B, V)


# ----------------------------------------------------------------------------
# Parameter init (deterministic, synthetic).  Persistent-memory k/v projections
# hoisted; pk pre-transposed; Wq/Wk/Wv packed; layer-3 Wo folded into proj.
# ----------------------------------------------------------------------------
def init_params(key, *, vocab_size, embed_dim, persistent_dim, padding_value):
    def nrm(k, shape, scale=0.02):
        return (scale * jax.random.normal(k, shape)).astype(jnp.float32)

    keys = jax.random.split(key, 32)
    it = iter(keys)

    embed = nrm(next(it), (vocab_size, embed_dim))
    embed = embed.at[padding_value].set(0.0)          # padding_idx row is zero

    proj_w = nrm(next(it), (embed_dim, vocab_size))
    proj_b = jnp.zeros((1, vocab_size), jnp.float32)

    def mac_raw():
        return dict(
            wq=nrm(next(it), (embed_dim, embed_dim)),
            wk=nrm(next(it), (embed_dim, embed_dim)),
            wv=nrm(next(it), (embed_dim, embed_dim)),
            wo=nrm(next(it), (embed_dim, embed_dim)),
            wm1=nrm(next(it), (embed_dim, embed_dim)),
            wm2=nrm(next(it), (embed_dim, embed_dim)),
            pm=nrm(next(it), (persistent_dim, embed_dim)),
        )

    def pack_full(r):   # layers 1, 2 (all-rows path)
        return dict(
            wqkv=jnp.concatenate([r["wq"], r["wk"], r["wv"]], axis=1).astype(MXU_DTYPE),
            wo=r["wo"].astype(MXU_DTYPE),
            wm1=r["wm1"].astype(MXU_DTYPE),
            wm2=r["wm2"].astype(MXU_DTYPE),
            pk_t=jnp.dot(r["pm"], r["wk"]).T.astype(MXU_DTYPE),   # hoisted, (D, P)
            pv=jnp.dot(r["pm"], r["wv"]).astype(MXU_DTYPE),       # hoisted, (P, D)
        )

    def pack_last(r):   # layer 3 (last-query-only path, Wo folded into vocab head)
        return dict(
            wq=r["wq"].astype(MXU_DTYPE),
            wkv=jnp.concatenate([r["wk"], r["wv"]], axis=1).astype(MXU_DTYPE),
            wm1=r["wm1"].astype(MXU_DTYPE),
            wm2=r["wm2"].astype(MXU_DTYPE),
            pk_t=jnp.dot(r["pm"], r["wk"]).T.astype(MXU_DTYPE),
            pv=jnp.dot(r["pm"], r["wv"]).astype(MXU_DTYPE),
            w_head=jnp.dot(r["wo"], proj_w).astype(MXU_DTYPE),    # (D, V), Wo @ proj_w
            proj_b=proj_b,
        )

    return {
        "embed": embed.astype(MXU_DTYPE),
        "mac1": pack_full(mac_raw()),
        "mac2": pack_full(mac_raw()),
        "mac3": pack_last(mac_raw()),
    }


# ----------------------------------------------------------------------------
# CodeModel forward: ONE fused pallas_call.
# ----------------------------------------------------------------------------
@jax.jit
def code_model_forward(tokens, params):
    B, S = tokens.shape
    V, D = params["embed"].shape
    N = B * S

    tok = tokens.reshape(N, 1).astype(jnp.int32)

    # Shape-only constants (block-diagonal causal bias, last-row selector, layer-3
    # bias) — constant-folded by XLA under jit, then ride along as tiny VMEM inputs.
    r = jnp.arange(N, dtype=jnp.int32)[:, None]
    c = jnp.arange(N, dtype=jnp.int32)[None, :]
    attn_bias = jnp.where(((c // S) == (r // S)) & (c <= r), 0.0, NEG_INF
                          ).astype(jnp.float32)                          # (N, N)
    rb = jnp.arange(B, dtype=jnp.int32)[:, None]
    cn = jnp.arange(N, dtype=jnp.int32)[None, :]
    sel_last = jnp.where(cn == rb * S + (S - 1), 1.0, 0.0).astype(MXU_DTYPE)   # (B, N)
    bias_last = jnp.where((cn // S) == rb, 0.0, NEG_INF).astype(jnp.float32)   # (B, N)

    m1, m2, m3 = params["mac1"], params["mac2"], params["mac3"]
    inputs = [tok, params["embed"], attn_bias, sel_last, bias_last,
              m1["wqkv"], m1["wo"], m1["wm1"], m1["wm2"], m1["pk_t"], m1["pv"],
              m2["wqkv"], m2["wo"], m2["wm1"], m2["wm2"], m2["pk_t"], m2["pv"],
              m3["wq"], m3["wkv"], m3["wm1"], m3["wm2"], m3["pk_t"], m3["pv"],
              m3["w_head"], m3["proj_b"]]

    vmem = pl.BlockSpec(memory_space=pltpu.MemorySpace.VMEM)
    return pl.pallas_call(
        code_model_kernel,
        out_shape=jax.ShapeDtypeStruct((B, V), jnp.float32),
        in_specs=[vmem] * len(inputs),
        out_specs=vmem,
    )(*inputs)


if __name__ == "__main__":
    CTX_LENGTH = 64      # so long_term_update_chunk_size = 64 // 20 = 3 > 0
    EMBED_DIM = 128
    VOCAB_SIZE = 256
    PERSISTENT_DIM = 16
    PADDING_VALUE = 0
    BATCH = 2

    key = jax.random.PRNGKey(0)
    k_params, k_tokens = jax.random.split(key)

    params = init_params(
        k_params,
        vocab_size=VOCAB_SIZE,
        embed_dim=EMBED_DIM,
        persistent_dim=PERSISTENT_DIM,
        padding_value=PADDING_VALUE,
    )
    tokens = jax.random.randint(k_tokens, (BATCH, CTX_LENGTH), 0, VOCAB_SIZE,
                                dtype=jnp.int32)

    logits = code_model_forward(tokens, params)
    logits = jax.block_until_ready(logits)
    assert logits.shape == (BATCH, VOCAB_SIZE)
    assert bool(jnp.all(jnp.isfinite(logits)))
    print("KERNEL_OK")
</pallas_src>

<mosaic_0001>
module attributes {stable_mosaic.version = 11 : i64} {
  func.func @code_model_kernel(%arg0: memref<128x1xi32, #tpu.memory_space<vmem>>, %arg1: memref<256x128xbf16, #tpu.memory_space<vmem>>, %arg2: memref<128x128xf32, #tpu.memory_space<vmem>>, %arg3: memref<2x128xbf16, #tpu.memory_space<vmem>>, %arg4: memref<2x128xf32, #tpu.memory_space<vmem>>, %arg5: memref<128x384xbf16, #tpu.memory_space<vmem>>, %arg6: memref<128x128xbf16, #tpu.memory_space<vmem>>, %arg7: memref<128x128xbf16, #tpu.memory_space<vmem>>, %arg8: memref<128x128xbf16, #tpu.memory_space<vmem>>, %arg9: memref<128x16xbf16, #tpu.memory_space<vmem>>, %arg10: memref<16x128xbf16, #tpu.memory_space<vmem>>, %arg11: memref<128x384xbf16, #tpu.memory_space<vmem>>, %arg12: memref<128x128xbf16, #tpu.memory_space<vmem>>, %arg13: memref<128x128xbf16, #tpu.memory_space<vmem>>, %arg14: memref<128x128xbf16, #tpu.memory_space<vmem>>, %arg15: memref<128x16xbf16, #tpu.memory_space<vmem>>, %arg16: memref<16x128xbf16, #tpu.memory_space<vmem>>, %arg17: memref<128x128xbf16, #tpu.memory_space<vmem>>, %arg18: memref<128x256xbf16, #tpu.memory_space<vmem>>, %arg19: memref<128x128xbf16, #tpu.memory_space<vmem>>, %arg20: memref<128x128xbf16, #tpu.memory_space<vmem>>, %arg21: memref<128x16xbf16, #tpu.memory_space<vmem>>, %arg22: memref<16x128xbf16, #tpu.memory_space<vmem>>, %arg23: memref<128x256xbf16, #tpu.memory_space<vmem>>, %arg24: memref<1x256xf32, #tpu.memory_space<vmem>>, %arg25: memref<2x256xf32, #tpu.memory_space<vmem>>) attributes {dimension_semantics = [], scalar_prefetch = 0 : i64, scratch_operands = 0 : i64, tpu.core_type = #tpu.core_type<tc>} {
    %c0 = arith.constant 0 : index
    %c0_0 = arith.constant 0 : index
    %0 = vector.load %arg0[%c0, %c0_0] : memref<128x1xi32, #tpu.memory_space<vmem>>, vector<128x1xi32>
    %1 = tpu.iota {dimensions = array<i32: 1>} : vector<128x256xi32>
    %2 = vector.broadcast %0 : vector<128x1xi32> to vector<128x256xi32>
    %3 = arith.cmpi eq, %1, %2 : vector<128x256xi32>
    %cst = arith.constant 1.000000e+00 : f32
    %cst_1 = arith.constant 0.000000e+00 : f32
    %4 = vector.broadcast %cst : f32 to vector<128x256xf32>
    %5 = vector.broadcast %cst_1 : f32 to vector<128x256xf32>
    %6 = arith.select %3, %4, %5 : vector<128x256xi1>, vector<128x256xf32>
    %7 = arith.truncf %6 : vector<128x256xf32> to vector<128x256xbf16>
    %c0_2 = arith.constant 0 : index
    %c0_3 = arith.constant 0 : index
    %8 = vector.load %arg1[%c0_2, %c0_3] : memref<256x128xbf16, #tpu.memory_space<vmem>>, vector<256x128xbf16>
    %cst_4 = arith.constant dense<0.000000e+00> : vector<128x128xf32>
    %9 = tpu.matmul %7, %8, %cst_4 {dimension_numbers = #tpu.dot_dimension_numbers<[1], [0], [0], [1], [0, 0, 1, 1], [], []>} : vector<128x256xbf16>, vector<256x128xbf16>, vector<128x128xf32> -> vector<128x128xf32>
    %c0_5 = arith.constant 0 : index
    %c0_6 = arith.constant 0 : index
    %10 = vector.load %arg2[%c0_5, %c0_6] : memref<128x128xf32, #tpu.memory_space<vmem>>, vector<128x128xf32>
    %c0_7 = arith.constant 0 : index
    %c0_8 = arith.constant 0 : index
    %11 = vector.load %arg5[%c0_7, %c0_8] : memref<128x384xbf16, #tpu.memory_space<vmem>>, vector<128x384xbf16>
    %c0_9 = arith.constant 0 : index
    %c0_10 = arith.constant 0 : index
    %12 = vector.load %arg6[%c0_9, %c0_10] : memref<128x128xbf16, #tpu.memory_space<vmem>>, vector<128x128xbf16>
    %c0_11 = arith.constant 0 : index
    %c0_12 = arith.constant 0 : index
    %13 = vector.load %arg7[%c0_11, %c0_12] : memref<128x128xbf16, #tpu.memory_space<vmem>>, vector<128x128xbf16>
    %c0_13 = arith.constant 0 : index
    %c0_14 = arith.constant 0 : index
    %14 = vector.load %arg8[%c0_13, %c0_14] : memref<128x128xbf16, #tpu.memory_space<vmem>>, vector<128x128xbf16>
    %c0_15 = arith.constant 0 : index
    %c0_16 = arith.constant 0 : index
    %15 = vector.load %arg9[%c0_15, %c0_16] : memref<128x16xbf16, #tpu.memory_space<vmem>>, vector<128x16xbf16>
    %c0_17 = arith.constant 0 : index
    %c0_18 = arith.constant 0 : index
    %16 = vector.load %arg10[%c0_17, %c0_18] : memref<16x128xbf16, #tpu.memory_space<vmem>>, vector<16x128xbf16>
    %17 = arith.truncf %9 : vector<128x128xf32> to vector<128x128xbf16>
    %cst_19 = arith.constant dense<0.000000e+00> : vector<128x384xf32>
    %18 = tpu.matmul %17, %11, %cst_19 {dimension_numbers = #tpu.dot_dimension_numbers<[1], [0], [0], [1], [0, 0, 1, 1], [], []>} : vector<128x128xbf16>, vector<128x384xbf16>, vector<128x384xf32> -> vector<128x384xf32>
    %19 = vector.extract_strided_slice %18 {offsets = [0, 0], sizes = [128, 128], strides = [1, 1]} : vector<128x384xf32> to vector<128x128xf32>
    %20 = vector.extract_strided_slice %18 {offsets = [0, 128], sizes = [128, 128], strides = [1, 1]} : vector<128x384xf32> to vector<128x128xf32>
    %21 = vector.extract_strided_slice %18 {offsets = [0, 256], sizes = [128, 128], strides = [1, 1]} : vector<128x384xf32> to vector<128x128xf32>
    %22 = arith.truncf %19 : vector<128x128xf32> to vector<128x128xbf16>
    %cst_20 = arith.constant dense<0.000000e+00> : vector<128x128xf32>
    %23 = tpu.matmul %22, %13, %cst_20 {dimension_numbers = #tpu.dot_dimension_numbers<[1], [0], [0], [1], [0, 0, 1, 1], [], []>} : vector<128x128xbf16>, vector<128x128xbf16>, vector<128x128xf32> -> vector<128x128xf32>
    %cst_21 = arith.constant 0.000000e+00 : f32
    %24 = vector.broadcast %cst_21 : f32 to vector<128x128xf32>
    %25 = arith.cmpf ogt, %23, %24 : vector<128x128xf32>
    %26 = math.exp %23 : vector<128x128xf32>
    %cst_22 = arith.constant 1.000000e+00 : f32
    %27 = vector.broadcast %cst_22 : f32 to vector<128x128xf32>
    %28 = arith.subf %26, %27 : vector<128x128xf32>
    %cst_23 = arith.constant 1.67326319 : f32
    %29 = vector.broadcast %cst_23 : f32 to vector<128x128xf32>
    %30 = arith.mulf %29, %28 : vector<128x128xf32>
    %31 = arith.select %25, %23, %30 : vector<128x128xi1>, vector<128x128xf32>
    %cst_24 = arith.constant 1.05070102 : f32
    %32 = vector.broadcast %cst_24 : f32 to vector<128x128xf32>
    %33 = arith.mulf %32, %31 : vector<128x128xf32>
    %34 = arith.truncf %33 : vector<128x128xf32> to vector<128x128xbf16>
    %cst_25 = arith.constant dense<0.000000e+00> : vector<128x128xf32>
    %35 = tpu.matmul %34, %14, %cst_25 {dimension_numbers = #tpu.dot_dimension_numbers<[1], [0], [0], [1], [0, 0, 1, 1], [], []>} : vector<128x128xbf16>, vector<128x128xbf16>, vector<128x128xf32> -> vector<128x128xf32>
    %cst_26 = arith.constant dense<0.000000e+00> : vector<128x16xf32>
    %36 = tpu.matmul %22, %15, %cst_26 {dimension_numbers = #tpu.dot_dimension_numbers<[1], [0], [0], [1], [0, 0, 1, 1], [], []>} : vector<128x128xbf16>, vector<128x16xbf16>, vector<128x16xf32> -> vector<128x16xf32>
    %cst_27 = arith.constant 0.0883883461 : f32
    %37 = vector.broadcast %cst_27 : f32 to vector<128x16xf32>
    %38 = arith.mulf %36, %37 : vector<128x16xf32>
    %39 = arith.truncf %20 : vector<128x128xf32> to vector<128x128xbf16>
    %cst_28 = arith.constant dense<0.000000e+00> : vector<128x128xf32>
    %40 = tpu.matmul %22, %39, %cst_28 {dimension_numbers = #tpu.dot_dimension_numbers<[1], [1], [0], [0], [0, 0, 1, 0], [], []>} : vector<128x128xbf16>, vector<128x128xbf16>, vector<128x128xf32> -> vector<128x128xf32>
    %cst_29 = arith.constant 0.0883883461 : f32
    %41 = vector.broadcast %cst_29 : f32 to vector<128x128xf32>
    %42 = arith.mulf %40, %41 : vector<128x128xf32>
    %43 = arith.addf %42, %10 : vector<128x128xf32>
    %44 = arith.truncf %21 : vector<128x128xf32> to vector<128x128xbf16>
    %cst_30 = arith.constant dense<0xFF800000> : vector<128xf32>
    %45 = vector.multi_reduction <maximumf>, %38, %cst_30 [1] : vector<128x16xf32> to vector<128xf32>
    %46 = vector.shape_cast %45 : vector<128xf32> to vector<128x1xf32>
    %cst_31 = arith.constant dense<0xFF800000> : vector<128xf32>
    %47 = vector.multi_reduction <maximumf>, %43, %cst_31 [1] : vector<128x128xf32> to vector<128xf32>
    %48 = vector.shape_cast %47 : vector<128xf32> to vector<128x1xf32>
    %49 = arith.maximumf %46, %48 : vector<128x1xf32>
    %50 = vector.broadcast %49 : vector<128x1xf32> to vector<128x16xf32>
    %51 = arith.subf %38, %50 : vector<128x16xf32>
    %52 = math.exp %51 : vector<128x16xf32>
    %53 = vector.broadcast %49 : vector<128x1xf32> to vector<128x128xf32>
    %54 = arith.subf %43, %53 : vector<128x128xf32>
    %55 = math.exp %54 : vector<128x128xf32>
    %cst_32 = arith.constant dense<0.000000e+00> : vector<128xf32>
    %56 = vector.multi_reduction <add>, %52, %cst_32 [1] : vector<128x16xf32> to vector<128xf32>
    %57 = vector.shape_cast %56 : vector<128xf32> to vector<128x1xf32>
    %cst_33 = arith.constant dense<0.000000e+00> : vector<128xf32>
    %58 = vector.multi_reduction <add>, %55, %cst_33 [1] : vector<128x128xf32> to vector<128xf32>
    %59 = vector.shape_cast %58 : vector<128xf32> to vector<128x1xf32>
    %60 = arith.addf %57, %59 : vector<128x1xf32>
    %61 = arith.truncf %52 : vector<128x16xf32> to vector<128x16xbf16>
    %cst_34 = arith.constant dense<0.000000e+00> : vector<128x128xf32>
    %62 = tpu.matmul %61, %16, %cst_34 {dimension_numbers = #tpu.dot_dimension_numbers<[1], [0], [0], [1], [0, 0, 1, 1], [], []>} : vector<128x16xbf16>, vector<16x128xbf16>, vector<128x128xf32> -> vector<128x128xf32>
    %63 = arith.truncf %55 : vector<128x128xf32> to vector<128x128xbf16>
    %cst_35 = arith.constant dense<0.000000e+00> : vector<128x128xf32>
    %64 = tpu.matmul %63, %44, %cst_35 {dimension_numbers = #tpu.dot_dimension_numbers<[1], [0], [0], [1], [0, 0, 1, 1], [], []>} : vector<128x128xbf16>, vector<128x128xbf16>, vector<128x128xf32> -> vector<128x128xf32>
    %65 = arith.addf %62, %64 : vector<128x128xf32>
    %66 = tpu.reciprocal %60 {approx = true} : vector<128x1xf32> -> vector<128x1xf32>
    %67 = vector.broadcast %66 : vector<128x1xf32> to vector<128x128xf32>
    %68 = arith.mulf %65, %67 : vector<128x128xf32>
    %69 = arith.addf %68, %35 : vector<128x128xf32>
    %70 = arith.truncf %69 : vector<128x128xf32> to vector<128x128xbf16>
    %cst_36 = arith.constant dense<0.000000e+00> : vector<128x128xf32>
    %71 = tpu.matmul %70, %12, %cst_36 {dimension_numbers = #tpu.dot_dimension_numbers<[1], [0], [0], [1], [0, 0, 1, 1], [], []>} : vector<128x128xbf16>, vector<128x128xbf16>, vector<128x128xf32> -> vector<128x128xf32>
    %72 = arith.addf %71, %9 : vector<128x128xf32>
    %cst_37 = arith.constant 0.000000e+00 : f32
    %73 = vector.broadcast %cst_37 : f32 to vector<128x128xf32>
    %74 = arith.cmpf ogt, %72, %73 : vector<128x128xf32>
    %75 = math.exp %72 : vector<128x128xf32>
    %cst_38 = arith.constant 1.000000e+00 : f32
    %76 = vector.broadcast %cst_38 : f32 to vector<128x128xf32>
    %77 = arith.subf %75, %76 : vector<128x128xf32>
    %cst_39 = arith.constant 1.67326319 : f32
    %78 = vector.broadcast %cst_39 : f32 to vector<128x128xf32>
    %79 = arith.mulf %78, %77 : vector<128x128xf32>
    %80 = arith.select %74, %72, %79 : vector<128x128xi1>, vector<128x128xf32>
    %cst_40 = arith.constant 1.05070102 : f32
    %81 = vector.broadcast %cst_40 : f32 to vector<128x128xf32>
    %82 = arith.mulf %81, %80 : vector<128x128xf32>
    %c0_41 = arith.constant 0 : index
    %c0_42 = arith.constant 0 : index
    %83 = vector.load %arg11[%c0_41, %c0_42] : memref<128x384xbf16, #tpu.memory_space<vmem>>, vector<128x384xbf16>
    %c0_43 = arith.constant 0 : index
    %c0_44 = arith.constant 0 : index
    %84 = vector.load %arg12[%c0_43, %c0_44] : memref<128x128xbf16, #tpu.memory_space<vmem>>, vector<128x128xbf16>
    %c0_45 = arith.constant 0 : index
    %c0_46 = arith.constant 0 : index
    %85 = vector.load %arg13[%c0_45, %c0_46] : memref<128x128xbf16, #tpu.memory_space<vmem>>, vector<128x128xbf16>
    %c0_47 = arith.constant 0 : index
    %c0_48 = arith.constant 0 : index
    %86 = vector.load %arg14[%c0_47, %c0_48] : memref<128x128xbf16, #tpu.memory_space<vmem>>, vector<128x128xbf16>
    %c0_49 = arith.constant 0 : index
    %c0_50 = arith.constant 0 : index
    %87 = vector.load %arg15[%c0_49, %c0_50] : memref<128x16xbf16, #tpu.memory_space<vmem>>, vector<128x16xbf16>
    %c0_51 = arith.constant 0 : index
    %c0_52 = arith.constant 0 : index
    %88 = vector.load %arg16[%c0_51, %c0_52] : memref<16x128xbf16, #tpu.memory_space<vmem>>, vector<16x128xbf16>
    %89 = arith.truncf %82 : vector<128x128xf32> to vector<128x128xbf16>
    %cst_53 = arith.constant dense<0.000000e+00> : vector<128x384xf32>
    %90 = tpu.matmul %89, %83, %cst_53 {dimension_numbers = #tpu.dot_dimension_numbers<[1], [0], [0], [1], [0, 0, 1, 1], [], []>} : vector<128x128xbf16>, vector<128x384xbf16>, vector<128x384xf32> -> vector<128x384xf32>
    %91 = vector.extract_strided_slice %90 {offsets = [0, 0], sizes = [128, 128], strides = [1, 1]} : vector<128x384xf32> to vector<128x128xf32>
    %92 = vector.extract_strided_slice %90 {offsets = [0, 128], sizes = [128, 128], strides = [1, 1]} : vector<128x384xf32> to vector<128x128xf32>
    %93 = vector.extract_strided_slice %90 {offsets = [0, 256], sizes = [128, 128], strides = [1, 1]} : vector<128x384xf32> to vector<128x128xf32>
    %94 = arith.truncf %91 : vector<128x128xf32> to vector<128x128xbf16>
    %cst_54 = arith.constant dense<0.000000e+00> : vector<128x128xf32>
    %95 = tpu.matmul %94, %85, %cst_54 {dimension_numbers = #tpu.dot_dimension_numbers<[1], [0], [0], [1], [0, 0, 1, 1], [], []>} : vector<128x128xbf16>, vector<128x128xbf16>, vector<128x128xf32> -> vector<128x128xf32>
    %cst_55 = arith.constant 0.000000e+00 : f32
    %96 = vector.broadcast %cst_55 : f32 to vector<128x128xf32>
    %97 = arith.cmpf ogt, %95, %96 : vector<128x128xf32>
    %98 = math.exp %95 : vector<128x128xf32>
    %cst_56 = arith.constant 1.000000e+00 : f32
    %99 = vector.broadcast %cst_56 : f32 to vector<128x128xf32>
    %100 = arith.subf %98, %99 : vector<128x128xf32>
    %cst_57 = arith.constant 1.67326319 : f32
    %101 = vector.broadcast %cst_57 : f32 to vector<128x128xf32>
    %102 = arith.mulf %101, %100 : vector<128x128xf32>
    %103 = arith.select %97, %95, %102 : vector<128x128xi1>, vector<128x128xf32>
    %cst_58 = arith.constant 1.05070102 : f32
    %104 = vector.broadcast %cst_58 : f32 to vector<128x128xf32>
    %105 = arith.mulf %104, %103 : vector<128x128xf32>
    %106 = arith.truncf %105 : vector<128x128xf32> to vector<128x128xbf16>
    %cst_59 = arith.constant dense<0.000000e+00> : vector<128x128xf32>
    %107 = tpu.matmul %106, %86, %cst_59 {dimension_numbers = #tpu.dot_dimension_numbers<[1], [0], [0], [1], [0, 0, 1, 1], [], []>} : vector<128x128xbf16>, vector<128x128xbf16>, vector<128x128xf32> -> vector<128x128xf32>
    %cst_60 = arith.constant dense<0.000000e+00> : vector<128x16xf32>
    %108 = tpu.matmul %94, %87, %cst_60 {dimension_numbers = #tpu.dot_dimension_numbers<[1], [0], [0], [1], [0, 0, 1, 1], [], []>} : vector<128x128xbf16>, vector<128x16xbf16>, vector<128x16xf32> -> vector<128x16xf32>
    %cst_61 = arith.constant 0.0883883461 : f32
    %109 = vector.broadcast %cst_61 : f32 to vector<128x16xf32>
    %110 = arith.mulf %108, %109 : vector<128x16xf32>
    %111 = arith.truncf %92 : vector<128x128xf32> to vector<128x128xbf16>
    %cst_62 = arith.constant dense<0.000000e+00> : vector<128x128xf32>
    %112 = tpu.matmul %94, %111, %cst_62 {dimension_numbers = #tpu.dot_dimension_numbers<[1], [1], [0], [0], [0, 0, 1, 0], [], []>} : vector<128x128xbf16>, vector<128x128xbf16>, vector<128x128xf32> -> vector<128x128xf32>
    %cst_63 = arith.constant 0.0883883461 : f32
    %113 = vector.broadcast %cst_63 : f32 to vector<128x128xf32>
    %114 = arith.mulf %112, %113 : vector<128x128xf32>
    %115 = arith.addf %114, %10 : vector<128x128xf32>
    %116 = arith.truncf %93 : vector<128x128xf32> to vector<128x128xbf16>
    %cst_64 = arith.constant dense<0xFF800000> : vector<128xf32>
    %117 = vector.multi_reduction <maximumf>, %110, %cst_64 [1] : vector<128x16xf32> to vector<128xf32>
    %118 = vector.shape_cast %117 : vector<128xf32> to vector<128x1xf32>
    %cst_65 = arith.constant dense<0xFF800000> : vector<128xf32>
    %119 = vector.multi_reduction <maximumf>, %115, %cst_65 [1] : vector<128x128xf32> to vector<128xf32>
    %120 = vector.shape_cast %119 : vector<128xf32> to vector<128x1xf32>
    %121 = arith.maximumf %118, %120 : vector<128x1xf32>
    %122 = vector.broadcast %121 : vector<128x1xf32> to vector<128x16xf32>
    %123 = arith.subf %110, %122 : vector<128x16xf32>
    %124 = math.exp %123 : vector<128x16xf32>
    %125 = vector.broadcast %121 : vector<128x1xf32> to vector<128x128xf32>
    %126 = arith.subf %115, %125 : vector<128x128xf32>
    %127 = math.exp %126 : vector<128x128xf32>
    %cst_66 = arith.constant dense<0.000000e+00> : vector<128xf32>
    %128 = vector.multi_reduction <add>, %124, %cst_66 [1] : vector<128x16xf32> to vector<128xf32>
    %129 = vector.shape_cast %128 : vector<128xf32> to vector<128x1xf32>
    %cst_67 = arith.constant dense<0.000000e+00> : vector<128xf32>
    %130 = vector.multi_reduction <add>, %127, %cst_67 [1] : vector<128x128xf32> to vector<128xf32>
    %131 = vector.shape_cast %130 : vector<128xf32> to vector<128x1xf32>
    %132 = arith.addf %129, %131 : vector<128x1xf32>
    %133 = arith.truncf %124 : vector<128x16xf32> to vector<128x16xbf16>
    %cst_68 = arith.constant dense<0.000000e+00> : vector<128x128xf32>
    %134 = tpu.matmul %133, %88, %cst_68 {dimension_numbers = #tpu.dot_dimension_numbers<[1], [0], [0], [1], [0, 0, 1, 1], [], []>} : vector<128x16xbf16>, vector<16x128xbf16>, vector<128x128xf32> -> vector<128x128xf32>
    %135 = arith.truncf %127 : vector<128x128xf32> to vector<128x128xbf16>
    %cst_69 = arith.constant dense<0.000000e+00> : vector<128x128xf32>
    %136 = tpu.matmul %135, %116, %cst_69 {dimension_numbers = #tpu.dot_dimension_numbers<[1], [0], [0], [1], [0, 0, 1, 1], [], []>} : vector<128x128xbf16>, vector<128x128xbf16>, vector<128x128xf32> -> vector<128x128xf32>
    %137 = arith.addf %134, %136 : vector<128x128xf32>
    %138 = tpu.reciprocal %132 {approx = true} : vector<128x1xf32> -> vector<128x1xf32>
    %139 = vector.broadcast %138 : vector<128x1xf32> to vector<128x128xf32>
    %140 = arith.mulf %137, %139 : vector<128x128xf32>
    %141 = arith.addf %140, %107 : vector<128x128xf32>
    %142 = arith.truncf %141 : vector<128x128xf32> to vector<128x128xbf16>
    %cst_70 = arith.constant dense<0.000000e+00> : vector<128x128xf32>
    %143 = tpu.matmul %142, %84, %cst_70 {dimension_numbers = #tpu.dot_dimension_numbers<[1], [0], [0], [1], [0, 0, 1, 1], [], []>} : vector<128x128xbf16>, vector<128x128xbf16>, vector<128x128xf32> -> vector<128x128xf32>
    %144 = arith.addf %143, %71 : vector<128x128xf32>
    %cst_71 = arith.constant 0.000000e+00 : f32
    %145 = vector.broadcast %cst_71 : f32 to vector<128x128xf32>
    %146 = arith.cmpf ogt, %144, %145 : vector<128x128xf32>
    %147 = math.exp %144 : vector<128x128xf32>
    %cst_72 = arith.constant 1.000000e+00 : f32
    %148 = vector.broadcast %cst_72 : f32 to vector<128x128xf32>
    %149 = arith.subf %147, %148 : vector<128x128xf32>
    %cst_73 = arith.constant 1.67326319 : f32
    %150 = vector.broadcast %cst_73 : f32 to vector<128x128xf32>
    %151 = arith.mulf %150, %149 : vector<128x128xf32>
    %152 = arith.select %146, %144, %151 : vector<128x128xi1>, vector<128x128xf32>
    %cst_74 = arith.constant 1.05070102 : f32
    %153 = vector.broadcast %cst_74 : f32 to vector<128x128xf32>
    %154 = arith.mulf %153, %152 : vector<128x128xf32>
    %155 = arith.truncf %154 : vector<128x128xf32> to vector<128x128xbf16>
    %c0_75 = arith.constant 0 : index
    %c0_76 = arith.constant 0 : index
    %156 = vector.load %arg18[%c0_75, %c0_76] : memref<128x256xbf16, #tpu.memory_space<vmem>>, vector<128x256xbf16>
    %cst_77 = arith.constant dense<0.000000e+00> : vector<128x256xf32>
    %157 = tpu.matmul %155, %156, %cst_77 {dimension_numbers = #tpu.dot_dimension_numbers<[1], [0], [0], [1], [0, 0, 1, 1], [], []>} : vector<128x128xbf16>, vector<128x256xbf16>, vector<128x256xf32> -> vector<128x256xf32>
    %158 = vector.extract_strided_slice %157 {offsets = [0, 0], sizes = [128, 128], strides = [1, 1]} : vector<128x256xf32> to vector<128x128xf32>
    %159 = vector.extract_strided_slice %157 {offsets = [0, 128], sizes = [128, 128], strides = [1, 1]} : vector<128x256xf32> to vector<128x128xf32>
    %c0_78 = arith.constant 0 : index
    %c0_79 = arith.constant 0 : index
    %160 = vector.load %arg3[%c0_78, %c0_79] : memref<2x128xbf16, #tpu.memory_space<vmem>>, vector<2x128xbf16>
    %cst_80 = arith.constant dense<0.000000e+00> : vector<2x128xf32>
    %161 = tpu.matmul %160, %155, %cst_80 {dimension_numbers = #tpu.dot_dimension_numbers<[1], [0], [0], [1], [0, 0, 1, 1], [], []>} : vector<2x128xbf16>, vector<128x128xbf16>, vector<2x128xf32> -> vector<2x128xf32>
    %162 = arith.truncf %161 : vector<2x128xf32> to vector<2x128xbf16>
    %c0_81 = arith.constant 0 : index
    %c0_82 = arith.constant 0 : index
    %163 = vector.load %arg17[%c0_81, %c0_82] : memref<128x128xbf16, #tpu.memory_space<vmem>>, vector<128x128xbf16>
    %cst_83 = arith.constant dense<0.000000e+00> : vector<2x128xf32>
    %164 = tpu.matmul %162, %163, %cst_83 {dimension_numbers = #tpu.dot_dimension_numbers<[1], [0], [0], [1], [0, 0, 1, 1], [], []>} : vector<2x128xbf16>, vector<128x128xbf16>, vector<2x128xf32> -> vector<2x128xf32>
    %165 = arith.truncf %164 : vector<2x128xf32> to vector<2x128xbf16>
    %c0_84 = arith.constant 0 : index
    %c0_85 = arith.constant 0 : index
    %166 = vector.load %arg19[%c0_84, %c0_85] : memref<128x128xbf16, #tpu.memory_space<vmem>>, vector<128x128xbf16>
    %cst_86 = arith.constant dense<0.000000e+00> : vector<2x128xf32>
    %167 = tpu.matmul %165, %166, %cst_86 {dimension_numbers = #tpu.dot_dimension_numbers<[1], [0], [0], [1], [0, 0, 1, 1], [], []>} : vector<2x128xbf16>, vector<128x128xbf16>, vector<2x128xf32> -> vector<2x128xf32>
    %cst_87 = arith.constant 0.000000e+00 : f32
    %168 = vector.broadcast %cst_87 : f32 to vector<2x128xf32>
    %169 = arith.cmpf ogt, %167, %168 : vector<2x128xf32>
    %170 = math.exp %167 : vector<2x128xf32>
    %cst_88 = arith.constant 1.000000e+00 : f32
    %171 = vector.broadcast %cst_88 : f32 to vector<2x128xf32>
    %172 = arith.subf %170, %171 : vector<2x128xf32>
    %cst_89 = arith.constant 1.67326319 : f32
    %173 = vector.broadcast %cst_89 : f32 to vector<2x128xf32>
    %174 = arith.mulf %173, %172 : vector<2x128xf32>
    %175 = arith.select %169, %167, %174 : vector<2x128xi1>, vector<2x128xf32>
    %cst_90 = arith.constant 1.05070102 : f32
    %176 = vector.broadcast %cst_90 : f32 to vector<2x128xf32>
    %177 = arith.mulf %176, %175 : vector<2x128xf32>
    %178 = arith.truncf %177 : vector<2x128xf32> to vector<2x128xbf16>
    %c0_91 = arith.constant 0 : index
    %c0_92 = arith.constant 0 : index
    %179 = vector.load %arg20[%c0_91, %c0_92] : memref<128x128xbf16, #tpu.memory_space<vmem>>, vector<128x128xbf16>
    %cst_93 = arith.constant dense<0.000000e+00> : vector<2x128xf32>
    %180 = tpu.matmul %178, %179, %cst_93 {dimension_numbers = #tpu.dot_dimension_numbers<[1], [0], [0], [1], [0, 0, 1, 1], [], []>} : vector<2x128xbf16>, vector<128x128xbf16>, vector<2x128xf32> -> vector<2x128xf32>
    %c0_94 = arith.constant 0 : index
    %c0_95 = arith.constant 0 : index
    %181 = vector.load %arg21[%c0_94, %c0_95] : memref<128x16xbf16, #tpu.memory_space<vmem>>, vector<128x16xbf16>
    %cst_96 = arith.constant dense<0.000000e+00> : vector<2x16xf32>
    %182 = tpu.matmul %165, %181, %cst_96 {dimension_numbers = #tpu.dot_dimension_numbers<[1], [0], [0], [1], [0, 0, 1, 1], [], []>} : vector<2x128xbf16>, vector<128x16xbf16>, vector<2x16xf32> -> vector<2x16xf32>
    %cst_97 = arith.constant 0.0883883461 : f32
    %183 = vector.broadcast %cst_97 : f32 to vector<2x16xf32>
    %184 = arith.mulf %182, %183 : vector<2x16xf32>
    %185 = arith.truncf %158 : vector<128x128xf32> to vector<128x128xbf16>
    %cst_98 = arith.constant dense<0.000000e+00> : vector<2x128xf32>
    %186 = tpu.matmul %165, %185, %cst_98 {dimension_numbers = #tpu.dot_dimension_numbers<[1], [1], [0], [0], [0, 0, 1, 0], [], []>} : vector<2x128xbf16>, vector<128x128xbf16>, vector<2x128xf32> -> vector<2x128xf32>
    %cst_99 = arith.constant 0.0883883461 : f32
    %187 = vector.broadcast %cst_99 : f32 to vector<2x128xf32>
    %188 = arith.mulf %186, %187 : vector<2x128xf32>
    %c0_100 = arith.constant 0 : index
    %c0_101 = arith.constant 0 : index
    %189 = vector.load %arg4[%c0_100, %c0_101] : memref<2x128xf32, #tpu.memory_space<vmem>>, vector<2x128xf32>
    %190 = arith.addf %188, %189 : vector<2x128xf32>
    %c0_102 = arith.constant 0 : index
    %c0_103 = arith.constant 0 : index
    %191 = vector.load %arg22[%c0_102, %c0_103] : memref<16x128xbf16, #tpu.memory_space<vmem>>, vector<16x128xbf16>
    %192 = arith.truncf %159 : vector<128x128xf32> to vector<128x128xbf16>
    %cst_104 = arith.constant dense<0xFF800000> : vector<2xf32>
    %193 = vector.multi_reduction <maximumf>, %184, %cst_104 [1] : vector<2x16xf32> to vector<2xf32>
    %194 = vector.shape_cast %193 : vector<2xf32> to vector<2x1xf32>
    %cst_105 = arith.constant dense<0xFF800000> : vector<2xf32>
    %195 = vector.multi_reduction <maximumf>, %190, %cst_105 [1] : vector<2x128xf32> to vector<2xf32>
    %196 = vector.shape_cast %195 : vector<2xf32> to vector<2x1xf32>
    %197 = arith.maximumf %194, %196 : vector<2x1xf32>
    %198 = vector.broadcast %197 : vector<2x1xf32> to vector<2x16xf32>
    %199 = arith.subf %184, %198 : vector<2x16xf32>
    %200 = math.exp %199 : vector<2x16xf32>
    %201 = vector.broadcast %197 : vector<2x1xf32> to vector<2x128xf32>
    %202 = arith.subf %190, %201 : vector<2x128xf32>
    %203 = math.exp %202 : vector<2x128xf32>
    %cst_106 = arith.constant dense<0.000000e+00> : vector<2xf32>
    %204 = vector.multi_reduction <add>, %200, %cst_106 [1] : vector<2x16xf32> to vector<2xf32>
    %205 = vector.shape_cast %204 : vector<2xf32> to vector<2x1xf32>
    %cst_107 = arith.constant dense<0.000000e+00> : vector<2xf32>
    %206 = vector.multi_reduction <add>, %203, %cst_107 [1] : vector<2x128xf32> to vector<2xf32>
    %207 = vector.shape_cast %206 : vector<2xf32> to vector<2x1xf32>
    %208 = arith.addf %205, %207 : vector<2x1xf32>
    %209 = arith.truncf %200 : vector<2x16xf32> to vector<2x16xbf16>
    %cst_108 = arith.constant dense<0.000000e+00> : vector<2x128xf32>
    %210 = tpu.matmul %209, %191, %cst_108 {dimension_numbers = #tpu.dot_dimension_numbers<[1], [0], [0], [1], [0, 0, 1, 1], [], []>} : vector<2x16xbf16>, vector<16x128xbf16>, vector<2x128xf32> -> vector<2x128xf32>
    %211 = arith.truncf %203 : vector<2x128xf32> to vector<2x128xbf16>
    %cst_109 = arith.constant dense<0.000000e+00> : vector<2x128xf32>
    %212 = tpu.matmul %211, %192, %cst_109 {dimension_numbers = #tpu.dot_dimension_numbers<[1], [0], [0], [1], [0, 0, 1, 1], [], []>} : vector<2x128xbf16>, vector<128x128xbf16>, vector<2x128xf32> -> vector<2x128xf32>
    %213 = arith.addf %210, %212 : vector<2x128xf32>
    %214 = tpu.reciprocal %208 {approx = true} : vector<2x1xf32> -> vector<2x1xf32>
    %215 = vector.broadcast %214 : vector<2x1xf32> to vector<2x128xf32>
    %216 = arith.mulf %213, %215 : vector<2x128xf32>
    %217 = arith.addf %216, %180 : vector<2x128xf32>
    %218 = arith.truncf %217 : vector<2x128xf32> to vector<2x128xbf16>
    %c0_110 = arith.constant 0 : index
    %c0_111 = arith.constant 0 : index
    %219 = vector.load %arg23[%c0_110, %c0_111] : memref<128x256xbf16, #tpu.memory_space<vmem>>, vector<128x256xbf16>
    %cst_112 = arith.constant dense<0.000000e+00> : vector<2x256xf32>
    %220 = tpu.matmul %218, %219, %cst_112 {dimension_numbers = #tpu.dot_dimension_numbers<[1], [0], [0], [1], [0, 0, 1, 1], [], []>} : vector<2x128xbf16>, vector<128x256xbf16>, vector<2x256xf32> -> vector<2x256xf32>
    %c0_113 = arith.constant 0 : index
    %c0_114 = arith.constant 0 : index
    %221 = vector.load %arg24[%c0_113, %c0_114] : memref<1x256xf32, #tpu.memory_space<vmem>>, vector<1x256xf32>
    %222 = vector.broadcast %221 : vector<1x256xf32> to vector<2x256xf32>
    %223 = arith.addf %220, %222 : vector<2x256xf32>
    %c0_115 = arith.constant 0 : index
    %c0_116 = arith.constant 0 : index
    %224 = vector.load %arg25[%c0_115, %c0_116] : memref<2x256xf32, #tpu.memory_space<vmem>>, vector<2x256xf32>
    tpu.vector_store %arg25[%c0_115, %c0_116], %223 {strides = array<i32>} : memref<2x256xf32, #tpu.memory_space<vmem>>, vector<2x256xf32>,
    return
  }
}

</mosaic_0001>

<bundles_post_ra>
// kernel: code_model_forward.1
= control target key start
LH: loop header
LB: loop body
LE: loop exit
PB: predicated region body
PF: predicated region fallthrough
CT: control target
= control target key end

     0   :  { %s10185_s0 = inlined_call_operand.vmem [shape: s32[128,1], index: 0, kind: input, shape index: {}]   ;;  %s10186_s1 = inlined_call_operand.hbm [shape: bf16[256,128], index: 1, kind: input, shape index: {}]   ;;  %s10187_s2 = inlined_call_operand.vmem [shape: f32[128,128], index: 2, kind: input, shape index: {}]   ;;  %s10188_s3 = inlined_call_operand.vmem [shape: bf16[2,128], index: 3, kind: input, shape index: {}]   ;;  %s10189_s4 = inlined_call_operand.vmem [shape: f32[2,128], index: 4, kind: input, shape index: {}]   ;;  %s10190_s5 = inlined_call_operand.vmem [shape: bf16[128,384], index: 5, kind: input, shape index: {}]   ;;  %s10191_s6 = inlined_call_operand.hbm [shape: bf16[128,128], index: 6, kind: input, shape index: {}]   ;;  %s10192_s7 = inlined_call_operand.hbm [shape: bf16[128,128], index: 7, kind: input, shape index: {}]   ;;  %s10193_s8 = inlined_call_operand.hbm [shape: bf16[128,128], index: 8, kind: input, shape index: {}]   ;;  %s10194_s9 = inlined_call_operand.vmem [shape: bf16[128,16], index: 9, kind: input, shape index: {}]   ;;  %s10195_s10 = inlined_call_operand.hbm [shape: bf16[16,128], index: 10, kind: input, shape index: {}]   ;;  %s10196_s11 = inlined_call_operand.vmem [shape: bf16[128,384], index: 11, kind: input, shape index: {}]   ;;  %s10197_s12 = inlined_call_operand.hbm [shape: bf16[128,128], index: 12, kind: input, shape index: {}]   ;;  %s10198_s13 = inlined_call_operand.hbm [shape: bf16[128,128], index: 13, kind: input, shape index: {}]   ;;  %s10199_s14 = inlined_call_operand.hbm [shape: bf16[128,128], index: 14, kind: input, shape index: {}]   ;;  %s10200_s15 = inlined_call_operand.vmem [shape: bf16[128,16], index: 15, kind: input, shape index: {}]   ;;  %s10201_s16 = inlined_call_operand.vmem [shape: bf16[16,128], index: 16, kind: input, shape index: {}]   ;;  %s10202_s17 = inlined_call_operand.hbm [shape: bf16[128,128], index: 17, kind: input, shape index: {}]   ;;  %s10203_s18 = inlined_call_operand.vmem [shape: bf16[128,256], index: 18, kind: input, shape index: {}]   ;;  %s10204_s19 = inlined_call_operand.hbm [shape: bf16[128,128], index: 19, kind: input, shape index: {}]   ;;  %s10205_s20 = inlined_call_operand.hbm [shape: bf16[128,128], index: 20, kind: input, shape index: {}]   ;;  %s10206_s21 = inlined_call_operand.vmem [shape: bf16[128,16], index: 21, kind: input, shape index: {}]   ;;  %s10207_s22 = inlined_call_operand.vmem [shape: bf16[16,128], index: 22, kind: input, shape index: {}]   ;;  %s10208_s23 = inlined_call_operand.hbm [shape: bf16[128,256], index: 23, kind: input, shape index: {}]   ;;  %s10209_s24 = inlined_call_operand.vmem [shape: f32[1,256], index: 24, kind: input, shape index: {}]   ;;  %s10210_s25 = inlined_call_operand.hbm [shape: f32[2,256], index: 25, kind: output, shape index: {}]  }
   0x1   :  { %10255 = sst [smem:[#allocation62_spill]] %s10185_s0 }
   0x2   :  { %10256 = sst [smem:[#allocation63_spill]] %s10186_s1 }
   0x3   :  { %10257 = sst [smem:[#allocation64_spill]] %s10187_s2 }
   0x4   :  { %10258 = sst [smem:[#allocation65_spill]] %s10188_s3 }
   0x5   :  { %10259 = sst [smem:[#allocation66_spill]] %s10189_s4 }
   0x6   :  { %10260 = sst [smem:[#allocation67_spill]] %s10190_s5 }
   0x7   :  { %10261 = sst [smem:[#allocation68_spill]] %s10191_s6 }
   0x8   :  { %10262 = sst [smem:[#allocation69_spill]] %s10192_s7 }
   0x9   :  { %10263 = sst [smem:[#allocation70_spill]] %s10193_s8 }
   0xa   :  { %10264 = sst [smem:[#allocation71_spill]] %s10194_s9 }
   0xb   :  { %10265 = sst [smem:[#allocation72_spill]] %s10209_s24 }
   0xc   :  { %10266 = sst [smem:[#allocation73_spill]] %s10210_s25 }
   0xd   :  { %30 = vsyncpa [#allocation3], 0 }
   0xe   :  { %31 = vsyncpa [#allocation6], 0 }
   0xf   :  { %32 = vsyncpa [#allocation9], 0 }
  0x10   :  { %33 = vsyncpa [#allocation12], 0 }
  0x11   :  { %34 = vsyncpa [#allocation15], 0 }
  0x12   :  { %35 = vsyncpa [#allocation18], 0 }
  0x13   :  { %36 = vsyncpa [#allocation21], 0 }
  0x14   :  { %37 = vsyncpa [#allocation4], 0  ;;  %s7956_s29 = smov [#allocation5]   ;;  %s7957_s6 = smov [#allocation8]  }
  0x15   :  { %s65_s2 = sshll.u32 %s7956_s29, 4  ;;  %s89_s30 = sshll.u32 %s7957_s6, 4  ;;  %s66_s2 = int_to_ptr.vmem [resolvable:$true] %s65_s2  ;;  %s8107_s30 = int_to_ptr.vmem [resolvable:$true] %s89_s30 }
  0x16   :  { %s10267_s26 = sld [smem:[#allocation68_spill]] }
  0x1c   :  { %s7654_s1 = scalar_lea.hbm %s10267_s26, 1024 }
  0x1d   :  { %p7655_p0 = scmp.ne.s32.totalorder %s10267_s26, %s7654_s1  ;;  %p7658_p1 = scmp.lt.u32.totalorder %s7654_s1, %s10267_s26 }
  0x1f   :  { %p7660_p2 = pnand %p7658_p1, %p7655_p0 }
  0x21   :  { %7663 = shalt.err (!%p7660_p2)
}
  0x22   :  { %s7664_s9 = scalar_lea.vmem %s66_s2, 1024  ;;  %p7669_p4 = scmp.lt.s32.totalorder %s66_s2, %s66_s2 }
  0x23   :  { %p7665_p3 = scmp.ne.s32.totalorder %s66_s2, %s7664_s9  ;;  %p7670_p5 = scmp.lt.s32.totalorder %s7664_s9, %s7664_s9 }
  0x25   :  { %p7671_p6 = por %p7670_p5, %p7669_p4 }
  0x27   :  { %p7672_p7 = pnand %p7671_p6, %p7665_p3 }
  0x29   :  { %7675 = shalt.err (!%p7672_p7)
}
  0x2a   :  { %s7958_s5 = smov 64   ;;  %s7959_s0 = smov 4  }
  0x2b   :  { %71 = dma.hbm_to_vmem [thread:$0]  %s10267_s26, 1024, %s66_s2, [#allocation6], %s7958_s5, %s7958_s5, %s7959_s0  }
  0x2c   :  { %s10268_s1 = sld [smem:[#allocation70_spill]] }
  0x32   :  { %s7676_s8 = scalar_lea.hbm %s10268_s1, 1024 }
  0x33   :  { %p7677_p8 = scmp.ne.s32.totalorder %s10268_s1, %s7676_s8  ;;  %p7680_p9 = scmp.lt.u32.totalorder %s7676_s8, %s10268_s1 }
  0x35   :  { %p7682_p10 = pnand %p7680_p9, %p7677_p8 }
  0x37   :  { %7685 = shalt.err (!%p7682_p10)
}
  0x38   :  { %s7686_s25 = scalar_lea.vmem %s8107_s30, 1024  ;;  %p7691_p12 = scmp.lt.s32.totalorder %s8107_s30, %s8107_s30 }
  0x39   :  { %p7687_p11 = scmp.ne.s32.totalorder %s8107_s30, %s7686_s25  ;;  %p7692_p13 = scmp.lt.s32.totalorder %s7686_s25, %s7686_s25 }
  0x3b   :  { %p7693_p0 = por %p7692_p13, %p7691_p12 }
  0x3d   :  { %p7694_p1 = pnand %p7693_p0, %p7687_p11 }
  0x3f   :  { %7697 = shalt.err (!%p7694_p1)
}
  0x40   :  { %95 = dma.hbm_to_vmem [thread:$0]  %s10268_s1, 1024, %s8107_s30, [#allocation9], %s7958_s5, %s7958_s5, %s7959_s0  }
  0x41   :  { %s7960_s29 = smov [#allocation11]   ;;  %s7961_s7 = smov [#allocation14]  }
  0x42   :  { %s117_s6 = sshll.u32 %s7960_s29, 4  ;;  %s141_s3 = sshll.u32 %s7961_s7, 4  ;;  %s118_s6 = int_to_ptr.vmem [resolvable:$true] %s117_s6  ;;  %s8144_s3 = int_to_ptr.vmem [resolvable:$true] %s141_s3 }
  0x43   :  { %s7698_s27 = scalar_lea.hbm %s10197_s12, 1024 }
  0x44   :  { %p7699_p2 = scmp.ne.s32.totalorder %s10197_s12, %s7698_s27  ;;  %p7702_p3 = scmp.lt.u32.totalorder %s7698_s27, %s10197_s12 }
  0x46   :  { %p7704_p4 = pnand %p7702_p3, %p7699_p2 }
  0x48   :  { %7707 = shalt.err (!%p7704_p4)
}
  0x49   :  { %s7708_s30 = scalar_lea.vmem %s118_s6, 1024  ;;  %p7713_p6 = scmp.lt.s32.totalorder %s118_s6, %s118_s6 }
  0x4a   :  { %p7709_p5 = scmp.ne.s32.totalorder %s118_s6, %s7708_s30  ;;  %p7714_p7 = scmp.lt.s32.totalorder %s7708_s30, %s7708_s30 }
  0x4c   :  { %p7715_p8 = por %p7714_p7, %p7713_p6 }
  0x4e   :  { %p7716_p9 = pnand %p7715_p8, %p7709_p5 }
  0x50   :  { %7719 = shalt.err (!%p7716_p9)
}
  0x51   :  { %123 = dma.hbm_to_vmem [thread:$0]  %s10197_s12, 1024, %s118_s6, [#allocation12], %s7958_s5, %s7958_s5, %s7959_s0  }
  0x52   :  { %s7720_s24 = scalar_lea.hbm %s10199_s14, 1024 }
  0x53   :  { %p7721_p10 = scmp.ne.s32.totalorder %s10199_s14, %s7720_s24  ;;  %p7724_p11 = scmp.lt.u32.totalorder %s7720_s24, %s10199_s14 }
  0x55   :  { %p7726_p12 = pnand %p7724_p11, %p7721_p10 }
  0x57   :  { %7729 = shalt.err (!%p7726_p12)
}
  0x58   :  { %s7730_s4 = scalar_lea.vmem %s8144_s3, 1024  ;;  %p7735_p0 = scmp.lt.s32.totalorder %s8144_s3, %s8144_s3 }
  0x59   :  { %p7731_p13 = scmp.ne.s32.totalorder %s8144_s3, %s7730_s4  ;;  %p7736_p1 = scmp.lt.s32.totalorder %s7730_s4, %s7730_s4 }
  0x5b   :  { %p7737_p2 = por %p7736_p1, %p7735_p0 }
  0x5d   :  { %p7738_p3 = pnand %p7737_p2, %p7731_p13 }
  0x5f   :  { %7741 = shalt.err (!%p7738_p3)
}
  0x60   :  { %147 = dma.hbm_to_vmem [thread:$0]  %s10199_s14, 1024, %s8144_s3, [#allocation15], %s7958_s5, %s7958_s5, %s7959_s0  }
  0x61   :  { %s7962_s28 = smov [#allocation17]   ;;  %s7963_s30 = smov [#allocation2]  }
  0x62   :  { %s171_s9 = sshll.u32 %s7962_s28, 4  ;;  %s45_s1 = sshll.u32 %s7963_s30, 4  ;;  %s172_s9 = int_to_ptr.vmem [resolvable:$true] %s171_s9  ;;  %s8181_s1 = int_to_ptr.vmem [resolvable:$true] %s45_s1 }
  0x63   :  { %s7742_s29 = scalar_lea.hbm %s10204_s19, 1024 }
  0x64   :  { %p7743_p4 = scmp.ne.s32.totalorder %s10204_s19, %s7742_s29  ;;  %p7746_p5 = scmp.lt.u32.totalorder %s7742_s29, %s10204_s19 }
  0x66   :  { %p7748_p6 = pnand %p7746_p5, %p7743_p4 }
  0x68   :  { %7751 = shalt.err (!%p7748_p6)
}
  0x69   :  { %s7752_s14 = scalar_lea.vmem %s172_s9, 1024  ;;  %p7757_p8 = scmp.lt.s32.totalorder %s172_s9, %s172_s9 }
  0x6a   :  { %p7753_p7 = scmp.ne.s32.totalorder %s172_s9, %s7752_s14  ;;  %p7758_p9 = scmp.lt.s32.totalorder %s7752_s14, %s7752_s14 }
  0x6c   :  { %p7759_p10 = por %p7758_p9, %p7757_p8 }
  0x6e   :  { %p7760_p11 = pnand %p7759_p10, %p7753_p7 }
  0x70   :  { %7763 = shalt.err (!%p7760_p11)
}
  0x71   :  { %177 = dma.hbm_to_vmem [thread:$0]  %s10204_s19, 1024, %s172_s9, [#allocation18], %s7958_s5, %s7958_s5, %s7959_s0  }
  0x72   :  { %s10269_s6 = sld [smem:[#allocation63_spill]] }
  0x78   :  { %s7764_s28 = scalar_lea.hbm %s10269_s6, 2048 }
  0x79   :  { %p7765_p12 = scmp.ne.s32.totalorder %s10269_s6, %s7764_s28  ;;  %p7768_p13 = scmp.lt.u32.totalorder %s7764_s28, %s10269_s6 }
  0x7b   :  { %p7770_p0 = pnand %p7768_p13, %p7765_p12 }
  0x7d   :  { %7773 = shalt.err (!%p7770_p0)
}
  0x7e   :  { %s7774_s24 = scalar_lea.vmem %s8181_s1, 2048  ;;  %p7779_p2 = scmp.lt.s32.totalorder %s8181_s1, %s8181_s1 }
  0x7f   :  { %p7775_p1 = scmp.ne.s32.totalorder %s8181_s1, %s7774_s24  ;;  %p7780_p3 = scmp.lt.s32.totalorder %s7774_s24, %s7774_s24 }
  0x81   :  { %p7781_p4 = por %p7780_p3, %p7779_p2 }
  0x83   :  { %p7782_p5 = pnand %p7781_p4, %p7775_p1 }
  0x85   :  { %7785 = shalt.err (!%p7782_p5)
}
  0x86   :  { %51 = dma.hbm_to_vmem [thread:$0]  %s10269_s6, 2048, %s8181_s1, [#allocation3], %s7958_s5, %s7958_s5, %s7959_s0  }
  0x87   :  { %s7964_s7 = smov [#allocation7]   ;;  %s7965_s25 = smov [#allocation10]  }
  0x88   :  { %s77_s8 = sshll.u32 %s7964_s7, 4  ;;  %s103_s14 = sshll.u32 %s7965_s25, 4  ;;  %s78_s8 = int_to_ptr.vmem [resolvable:$true] %s77_s8  ;;  %s8218_s14 = int_to_ptr.vmem [resolvable:$true] %s103_s14 }
  0x89   :  { %s10270_s4 = sld [smem:[#allocation69_spill]] }
  0x8f   :  { %s7786_s12 = scalar_lea.hbm %s10270_s4, 1024 }
  0x90   :  { %p7787_p6 = scmp.ne.s32.totalorder %s10270_s4, %s7786_s12  ;;  %p7790_p7 = scmp.lt.u32.totalorder %s7786_s12, %s10270_s4 }
  0x92   :  { %p7792_p8 = pnand %p7790_p7, %p7787_p6 }
  0x94   :  { %7795 = shalt.err (!%p7792_p8)
}
  0x95   :  { %s7796_s1 = scalar_lea.vmem %s78_s8, 1024  ;;  %p7801_p10 = scmp.lt.s32.totalorder %s78_s8, %s78_s8 }
  0x96   :  { %p7797_p9 = scmp.ne.s32.totalorder %s78_s8, %s7796_s1  ;;  %p7802_p11 = scmp.lt.s32.totalorder %s7796_s1, %s7796_s1 }
  0x98   :  { %p7803_p12 = por %p7802_p11, %p7801_p10 }
  0x9a   :  { %p7804_p13 = pnand %p7803_p12, %p7797_p9 }
  0x9c   :  { %7807 = shalt.err (!%p7804_p13)
}
  0x9d   :  { %83 = dma.hbm_to_vmem [thread:$0]  %s10270_s4, 1024, %s78_s8, [#allocation6], %s7958_s5, %s7958_s5, %s7959_s0  }
  0x9e   :  { %s7808_s9 = scalar_lea.hbm %s10195_s10, 128 }
  0x9f   :  { %p7809_p0 = scmp.ne.s32.totalorder %s10195_s10, %s7808_s9  ;;  %p7812_p1 = scmp.lt.u32.totalorder %s7808_s9, %s10195_s10 }
  0xa1   :  { %p7814_p2 = pnand %p7812_p1, %p7809_p0 }
  0xa3   :  { %7817 = shalt.err (!%p7814_p2)
}
  0xa4   :  { %s7818_s12 = scalar_lea.vmem %s8218_s14, 128  ;;  %p7823_p4 = scmp.lt.s32.totalorder %s8218_s14, %s8218_s14 }
  0xa5   :  { %p7819_p3 = scmp.ne.s32.totalorder %s8218_s14, %s7818_s12  ;;  %p7824_p5 = scmp.lt.s32.totalorder %s7818_s12, %s7818_s12 }
  0xa7   :  { %p7825_p6 = por %p7824_p5, %p7823_p4 }
  0xa9   :  { %p7826_p7 = pnand %p7825_p6, %p7819_p3 }
  0xab   :  { %7829 = shalt.err (!%p7826_p7)
}
  0xac   :  { %109 = dma.hbm_to_vmem [thread:$0]  %s10195_s10, 128, %s8218_s14, [#allocation9], %s7958_s5, %s7958_s5, %s7959_s0  }
  0xad   :  { %s7966_s28 = smov [#allocation13]   ;;  %s7967_s2 = smov [#allocation16]  }
  0xae   :  { %s129_s30 = sshll.u32 %s7966_s28, 4  ;;  %s157_s26 = sshll.u32 %s7967_s2, 4  ;;  %s130_s30 = int_to_ptr.vmem [resolvable:$true] %s129_s30  ;;  %s8255_s26 = int_to_ptr.vmem [resolvable:$true] %s157_s26 }
  0xaf   :  { %s7830_s29 = scalar_lea.hbm %s10198_s13, 1024 }
  0xb0   :  { %p7831_p8 = scmp.ne.s32.totalorder %s10198_s13, %s7830_s29  ;;  %p7834_p9 = scmp.lt.u32.totalorder %s7830_s29, %s10198_s13 }
  0xb2   :  { %p7836_p10 = pnand %p7834_p9, %p7831_p8 }
  0xb4   :  { %7839 = shalt.err (!%p7836_p10)
}
  0xb5   :  { %s7840_s10 = scalar_lea.vmem %s130_s30, 1024  ;;  %p7845_p12 = scmp.lt.s32.totalorder %s130_s30, %s130_s30 }
  0xb6   :  { %p7841_p11 = scmp.ne.s32.totalorder %s130_s30, %s7840_s10  ;;  %p7846_p13 = scmp.lt.s32.totalorder %s7840_s10, %s7840_s10 }
  0xb8   :  { %p7847_p0 = por %p7846_p13, %p7845_p12 }
  0xba   :  { %p7848_p1 = pnand %p7847_p0, %p7841_p11 }
  0xbc   :  { %7851 = shalt.err (!%p7848_p1)
}
  0xbd   :  { %135 = dma.hbm_to_vmem [thread:$0]  %s10198_s13, 1024, %s130_s30, [#allocation12], %s7958_s5, %s7958_s5, %s7959_s0  }
  0xbe   :  { %s7852_s12 = scalar_lea.hbm %s10202_s17, 1024 }
  0xbf   :  { %p7853_p2 = scmp.ne.s32.totalorder %s10202_s17, %s7852_s12  ;;  %p7856_p3 = scmp.lt.u32.totalorder %s7852_s12, %s10202_s17 }
  0xc1   :  { %p7858_p4 = pnand %p7856_p3, %p7853_p2 }
  0xc3   :  { %7861 = shalt.err (!%p7858_p4)
}
  0xc4   :  { %s7862_s1 = scalar_lea.vmem %s8255_s26, 1024  ;;  %p7867_p6 = scmp.lt.s32.totalorder %s8255_s26, %s8255_s26 }
  0xc5   :  { %p7863_p5 = scmp.ne.s32.totalorder %s8255_s26, %s7862_s1  ;;  %p7868_p7 = scmp.lt.s32.totalorder %s7862_s1, %s7862_s1 }
  0xc7   :  { %p7869_p8 = por %p7868_p7, %p7867_p6 }
  0xc9   :  { %p7870_p9 = pnand %p7869_p8, %p7863_p5 }
  0xcb   :  { %7873 = shalt.err (!%p7870_p9)
}
  0xcc   :  { %163 = dma.hbm_to_vmem [thread:$0]  %s10202_s17, 1024, %s8255_s26, [#allocation15], %s7958_s5, %s7958_s5, %s7959_s0  }
  0xcd   :  { %s7968_s6 = smov [#allocation19]   ;;  %s7969_s24 = smov [#allocation20]  }
  0xce   :  { %s183_s29 = sshll.u32 %s7968_s6, 4  ;;  %s199_s19 = sshll.u32 %s7969_s24, 4  ;;  %s184_s29 = int_to_ptr.vmem [resolvable:$true] %s183_s29  ;;  %s8292_s19 = int_to_ptr.vmem [resolvable:$true] %s199_s19 }
  0xcf   :  { %s7874_s10 = scalar_lea.hbm %s10205_s20, 1024 }
  0xd0   :  { %p7875_p10 = scmp.ne.s32.totalorder %s10205_s20, %s7874_s10  ;;  %p7878_p11 = scmp.lt.u32.totalorder %s7874_s10, %s10205_s20 }
  0xd2   :  { %p7880_p12 = pnand %p7878_p11, %p7875_p10 }
  0xd4   :  { %7883 = shalt.err (!%p7880_p12)
}
  0xd5   :  { %s7884_s17 = scalar_lea.vmem %s184_s29, 1024  ;;  %p7889_p0 = scmp.lt.s32.totalorder %s184_s29, %s184_s29 }
  0xd6   :  { %p7885_p13 = scmp.ne.s32.totalorder %s184_s29, %s7884_s17  ;;  %p7890_p1 = scmp.lt.s32.totalorder %s7884_s17, %s7884_s17 }
  0xd8   :  { %p7891_p2 = por %p7890_p1, %p7889_p0 }
  0xda   :  { %p7892_p3 = pnand %p7891_p2, %p7885_p13 }
  0xdc   :  { %7895 = shalt.err (!%p7892_p3)
}
  0xdd   :  { %189 = dma.hbm_to_vmem [thread:$0]  %s10205_s20, 1024, %s184_s29, [#allocation18], %s7958_s5, %s7958_s5, %s7959_s0  }
  0xde   :  { %s7896_s28 = scalar_lea.hbm %s10208_s23, 2048 }
  0xdf   :  { %p7897_p4 = scmp.ne.s32.totalorder %s10208_s23, %s7896_s28  ;;  %p7900_p5 = scmp.lt.u32.totalorder %s7896_s28, %s10208_s23 }
  0xe1   :  { %p7902_p6 = pnand %p7900_p5, %p7897_p4 }
  0xe3   :  { %7905 = shalt.err (!%p7902_p6)
}
  0xe4   :  { %s7906_s6 = scalar_lea.vmem %s8292_s19, 2048  ;;  %p7911_p8 = scmp.lt.s32.totalorder %s8292_s19, %s8292_s19 }
  0xe5   :  { %p7907_p7 = scmp.ne.s32.totalorder %s8292_s19, %s7906_s6  ;;  %p7912_p9 = scmp.lt.s32.totalorder %s7906_s6, %s7906_s6 }
  0xe7   :  { %p7913_p10 = por %p7912_p9, %p7911_p8 }
  0xe9   :  { %p7914_p11 = pnand %p7913_p10, %p7907_p7 }
  0xeb   :  { %7917 = shalt.err (!%p7914_p11)
}
  0xec   :  { %s7970_s20 = smov 128   ;;  %s7971_s5 = smov 8  }
  0xed   :  { %205 = dma.hbm_to_vmem [thread:$0]  %s10208_s23, 2048, %s8292_s19, [#allocation21], %s7970_s20, %s7970_s20, %s7971_s5  }
  0xee   :  { %7940 = dma.done.wait [#allocation3], 2048  }
  0xef   :  { %7941 = vsyncadd [#allocation3], 4294965248 }
  0xf0   :  { %7942 = dma.done.wait [#allocation6], 2048  }
  0xf1   :  { %7943 = vsyncadd [#allocation6], 4294965248 }
  0xf2   :  { %7944 = dma.done.wait [#allocation9], 1152  }
  0xf3   :  { %7945 = vsyncadd [#allocation9], 4294966144 }
  0xf4   :  { %7946 = dma.done.wait [#allocation12], 2048  }
  0xf5   :  { %7947 = vsyncadd [#allocation12], 4294965248 }
  0xf6   :  { %7948 = dma.done.wait [#allocation15], 2048  }
  0xf7   :  { %7949 = vsyncadd [#allocation15], 4294965248 }
  0xf8   :  { %7950 = dma.done.wait [#allocation18], 2048  }
  0xf9   :  { %7951 = vsyncadd [#allocation18], 4294965248 }
  0xfa   :  { %7952 = dma.done.wait [#allocation21], 2048  }
  0xfb   :  { %7953 = vsyncadd [#allocation21], 4294965248  ;;  %v10221_v0 = vmov 0   ;;  %s10271_s19 = sld [smem:[#allocation62_spill]]  ;;  %v7083_v7 = vld [vmem:[#allocation2 + $0x40] sm:$0xff]   ;;  %v7085_v10 = vld [vmem:[#allocation2 + $0x48] sm:$0xff]   ;;  %v10220_v46 = vlaneseq }
  0xfc   :  { %7082 = vset.pattern.permute.xlu1 %v10221_v0  ;;  %7081 = vset.pattern.permute.xlu0 %v10221_v0  ;;  %v7084_v8 = vld [vmem:[#allocation2] sm:$0xff]   ;;  %v7086_v12 = vld [vmem:[#allocation2 + $0x8] sm:$0xff]   ;;  %v7087_v13 = vld [vmem:[#allocation2 + $0x50] sm:$0xff]   ;;  %s10272_s26 = sld [smem:[#allocation67_spill]]  ;;  %v7973_v53 = vmov 1.0|1.0  }
  0xfd   :  { %899 = vmatprep.mubr.bf16.mxu1 %v10221_v0  ;;  %6023 = vmatprep.subr.bf16.mxu0 %v7083_v7  ;;  %v7088_v16 = vld [vmem:[#allocation2 + $0x10] sm:$0xff]   ;;  %v7089_v17 = vld [vmem:[#allocation2 + $0x58] sm:$0xff]   ;;  %v7091_v21 = vld [vmem:[#allocation2 + $0x60] sm:$0xff]   ;;  %v8417_v47 = vand.u32 127, %v10220_v46  ;;  %s10289_s17 = sld [smem:[#allocation71_spill]]  ;;  %s10304_s9 = sld [smem:[#allocation64_spill]] }
  0xfe   :  { %6024 = vmatpush3.bf16.msra.mxu0 %v7084_v8  ;;  %v7090_v20 = vld [vmem:[#allocation2 + $0x18] sm:$0xff]   ;;  %v7092_v24 = vld [vmem:[#allocation2 + $0x20] sm:$0xff]   ;;  %v7093_v25 = vld [vmem:[#allocation2 + $0x68] sm:$0xff]   ;;  %s10398_s27 = sld [smem:[#allocation65_spill]]  ;;  %s10399_s24 = sld [smem:[#allocation66_spill]] }
  0xff   :  { %6025 = vmatprep.subr.bf16.mxu0 %v7085_v10  ;;  %v7094_v28 = vld [vmem:[#allocation2 + $0x28] sm:$0xff]   ;;  %v7095_v29 = vld [vmem:[#allocation2 + $0x70] sm:$0xff]   ;;  %v7097_v31 = vld [vmem:[#allocation2 + $0x78] sm:$0xff]   ;;  %v8420_v50 = vadd.s32 128, %v8417_v47  ;;  %s10401_s25 = sld [smem:[#allocation72_spill]] }
 0x100   :  { %v7096_v30 = vld [vmem:[#allocation2 + $0x30] sm:$0xff]   ;;  %v7098_v32 = vld [vmem:[#allocation2 + $0x38] sm:$0xff]  }
 0x101   :  { %v247_v1 = vld [vmem:[%s10271_s19 + $0x10] sm:$0xff]  ;;  %v245_v2 = vld [vmem:[%s10271_s19] sm:$0xff]  ;;  %v248_v3 = vld [vmem:[%s10271_s19 + $0x18] sm:$0xff] }
 0x102   :  { %271 = vperm.xlu1 %7082, %v247_v1   ;;  %265 = vperm.xlu0 %7081, %v245_v2   ;;  %v246_v4 = vld [vmem:[%s10271_s19 + $0x8] sm:$0xff]  ;;  %v249_v6 = vld [vmem:[%s10271_s19 + $0x20] sm:$0xff]  ;;  %v252_v9 = vld [vmem:[%s10271_s19 + $0x38] sm:$0xff] }
 0x103   :  { %v250_v5 = vld [vmem:[%s10271_s19 + $0x28] sm:$0xff]  ;;  %v251_v11 = vld [vmem:[%s10271_s19 + $0x30] sm:$0xff]  ;;  %v253_v15 = vld [vmem:[%s10271_s19 + $0x40] sm:$0xff]  ;;  %6026 = vmatpush3.bf16.msra.mxu0 %v7086_v12 }
 0x104   :  { %v254_v14 = vld [vmem:[%s10271_s19 + $0x48] sm:$0xff]  ;;  %6027 = vmatprep.subr.bf16.mxu0 %v7087_v13  ;;  %v256_v18 = vld [vmem:[%s10271_s19 + $0x58] sm:$0xff]  ;;  %v255_v19 = vld [vmem:[%s10271_s19 + $0x50] sm:$0xff] }
 0x105   :  { %v258_v22 = vld [vmem:[%s10271_s19 + $0x68] sm:$0xff]  ;;  %v257_v23 = vld [vmem:[%s10271_s19 + $0x60] sm:$0xff]  ;;  %v260_v26 = vld [vmem:[%s10271_s19 + $0x78] sm:$0xff] }
 0x106   :  { %274 = vperm.xlu1 %7082, %v248_v3   ;;  %268 = vperm.xlu0 %7081, %v246_v4   ;;  %v259_v27 = vld [vmem:[%s10271_s19 + $0x70] sm:$0xff]  ;;  %v7101_v34 = vld [vmem:[%s10272_s26] ss:$12 sps:$4 sm:$0xff]   ;;  %v7102_v35 = vld [vmem:[%s10272_s26 + $0x1c] ss:$12 sps:$4 sm:$0xff]  }
 0x107   :  { %6028 = vmatpush3.bf16.msra.mxu0 %v7088_v16  ;;  %v7099_v33 = vld [vmem:[%s10272_s26 + $0x4] ss:$12 sps:$4 sm:$0xff]   ;;  %v7107_v36 = vld [vmem:[%s10272_s26 + $0x8] ss:$12 sps:$4 sm:$0xff]   ;;  %v7109_v40 = vld [vmem:[%s10272_s26 + $0x4c] ss:$12 sps:$4 sm:$0xff]  }
 0x108   :  { %6029 = vmatprep.subr.bf16.mxu0 %v7089_v17  ;;  %867 = vmatprep.subr.bf16.mxu1 %v7099_v33  ;;  %v7104_v37 = vld [vmem:[%s10272_s26 + $0x18] ss:$12 sps:$4 sm:$0xff]   ;;  %v7105_v38 = vld [vmem:[%s10272_s26 + $0x34] ss:$12 sps:$4 sm:$0xff]   ;;  %v7108_v39 = vld [vmem:[%s10272_s26 + $0x30] ss:$12 sps:$4 sm:$0xff]  }
 0x109   :  { %868 = vmatpush1.bf16.msra.mxu1 %v7101_v34  ;;  %v7112_v41 = vld [vmem:[%s10272_s26 + $0x48] ss:$12 sps:$4 sm:$0xff]   ;;  %v7113_v42 = vld [vmem:[%s10272_s26 + $0x64] ss:$12 sps:$4 sm:$0xff]   ;;  %v7116_v43 = vld [vmem:[%s10272_s26 + $0x60] ss:$12 sps:$4 sm:$0xff]  }
 0x10a   :  { %280 = vperm.xlu1 %7082, %v250_v5   ;;  %277 = vperm.xlu0 %7081, %v249_v6   ;;  %v7117_v44 = vld [vmem:[%s10272_s26 + $0x7c] ss:$12 sps:$4 sm:$0xff]   ;;  %v7120_v45 = vld [vmem:[%s10272_s26 + $0x78] ss:$12 sps:$4 sm:$0xff]   ;;  %v7111_v54 = vld [vmem:[%s10272_s26 + $0x20] ss:$12 sps:$4 sm:$0xff]  }
 0x10b   :  { %6030 = vmatpush3.bf16.msra.mxu0 %v7090_v20  ;;  %869 = vmatprep.subr.bf16.mxu1 %v7102_v35  ;;  %v7115_v57 = vld [vmem:[%s10272_s26 + $0x38] ss:$12 sps:$4 sm:$0xff]   ;;  %v7119_v58 = vld [vmem:[%s10272_s26 + $0x50] ss:$12 sps:$4 sm:$0xff]   ;;  %v7121_v6 = vld [vmem:[%s10272_s26 + $0x94] ss:$12 sps:$4 sm:$0xff]  }
 0x10c   :  { %6031 = vmatprep.subr.bf16.mxu0 %v7091_v21  ;;  %v7123_v7 = vld [vmem:[%s10272_s26 + $0x68] ss:$12 sps:$4 sm:$0xff]   ;;  %v7124_v8 = vld [vmem:[%s10272_s26 + $0x90] ss:$12 sps:$4 sm:$0xff]   ;;  %v7127_v10 = vld [vmem:[%s10272_s26 + $0x80] ss:$12 sps:$4 sm:$0xff]  }
 0x10d   :  { %870 = vmatpush1.bf16.msra.mxu1 %v7104_v37  ;;  %v7129_v12 = vld [vmem:[%s10272_s26 + $0x98] ss:$12 sps:$4 sm:$0xff]   ;;  %v7130_v13 = vld [vmem:[%s10272_s26 + $0xb0] ss:$12 sps:$4 sm:$0xff]   ;;  %v7136_v33 = vld [vmem:[#allocation8 + $0x8] sm:$0xff]  }
 0x10e   :  { %286 = vperm.xlu1 %7082, %v252_v9   ;;  %283 = vperm.xlu0 %7081, %v251_v11   ;;  %v7125_v9 = vld [vmem:[%s10272_s26 + $0xac] ss:$12 sps:$4 sm:$0xff]   ;;  %v7128_v11 = vld [vmem:[%s10272_s26 + $0xa8] ss:$12 sps:$4 sm:$0xff]  }
 0x10f   :  { %6032 = vmatpush3.bf16.msra.mxu0 %v7092_v24  ;;  %871 = vmatprep.subr.bf16.mxu1 %v7105_v38  ;;  %v7137_v38 = vld [vmem:[#allocation7 + $0x20] sm:$0xff]  }
 0x110   :  { %6033 = vmatprep.subr.bf16.mxu0 %v7093_v25 }
 0x111   :  { %872 = vmatpush1.bf16.msra.mxu1 %v7108_v39 }
 0x112   :  { %292 = vperm.xlu1 %7082, %v254_v14   ;;  %289 = vperm.xlu0 %7081, %v253_v15   ;;  %v7131_v14 = vld [vmem:[#allocation7] sm:$0xff]  }
 0x113   :  { %6034 = vmatpush3.bf16.msra.mxu0 %v7094_v28  ;;  %873 = vmatprep.subr.bf16.mxu1 %v7109_v40  ;;  %v7135_v15 = vld [vmem:[#allocation8] sm:$0xff]   ;;  %v7133_v28 = vld [vmem:[#allocation7 + $0x10] sm:$0xff]  }
 0x114   :  { %6035 = vmatprep.subr.bf16.mxu0 %v7095_v29  ;;  %v7138_v40 = vld [vmem:[#allocation8 + $0x10] sm:$0xff]  }
 0x115   :  { %874 = vmatpush1.bf16.msra.mxu1 %v7112_v41 }
 0x116   :  { %298 = vperm.xlu1 %7082, %v256_v18   ;;  %295 = vperm.xlu0 %7081, %v255_v19  }
 0x117   :  { %6036 = vmatpush3.bf16.msra.mxu0 %v7096_v30  ;;  %875 = vmatprep.subr.bf16.mxu1 %v7113_v42 }
 0x118   :  { %6037 = vmatprep.subr.bf16.mxu0 %v7097_v31 }
 0x119   :  { %876 = vmatpush1.bf16.msra.mxu1 %v7116_v43  ;;  %v7140_v43 = vld [vmem:[#allocation7 + $0x28] sm:$0xff]  }
 0x11a   :  { %304 = vperm.xlu1 %7082, %v258_v22   ;;  %301 = vperm.xlu0 %7081, %v257_v23   ;;  %v7132_v23 = vld [vmem:[#allocation7 + $0x8] sm:$0xff]  }
 0x11b   :  { %6038 = vmatpush3.bf16.msra.mxu0 %v7098_v32  ;;  %877 = vmatprep.subr.bf16.mxu1 %v7117_v44  ;;  %v7134_v32 = vld [vmem:[#allocation7 + $0x18] sm:$0xff]  }
 0x11c   :  { %6394 = vmatprep.subr.bf16.mxu0 %v7107_v36  ;;  %v7139_v44 = vld [vmem:[#allocation8 + $0x18] sm:$0xff]  }
 0x11d   :  { %878 = vmatpush1.bf16.msra.mxu1 %v7120_v45 }
 0x11e   :  { %310 = vperm.xlu1 %7082, %v260_v26   ;;  %307 = vperm.xlu0 %7081, %v259_v27  }
 0x11f   :  { %879 = vmatprep.subr.bf16.mxu1 %v7121_v6 }
 0x121   :  { %880 = vmatpush1.bf16.msra.mxu1 %v7124_v8 }
 0x122   :  { %881 = vmatprep.subr.bf16.mxu1 %v7125_v9 }
 0x125   :  { %882 = vmatpush1.bf16.msra.mxu1 %v7128_v11 }
 0x126   :  { %6426 = vmatprep.subr.bf16.mxu1 %v7131_v14 }
 0x181   :  { %v272_v48 = vpop.permute.xlu1 %271  ;;  %v266_v49 = vpop.permute.xlu0 %265 }
 0x182   :  { %vm317_vm0 = vcmp.eq.s32.totalorder %v8420_v50, %v272_v48  ;;  %vm313_vm3 = vcmp.eq.s32.totalorder %v8420_v50, %v266_v49  ;;  %vm312_vm5 = vcmp.eq.s32.totalorder %v8417_v47, %v266_v49  ;;  %vm316_vm9 = vcmp.eq.s32.totalorder %v8417_v47, %v272_v48 }
 0x185   :  { %v275_v51 = vpop.permute.xlu1 %274  ;;  %v269_v52 = vpop.permute.xlu0 %268 }
 0x186   :  { %vm319_vm1 = vcmp.eq.s32.totalorder %v8420_v50, %v275_v51  ;;  %vm314_vm2 = vcmp.eq.s32.totalorder %v8417_v47, %v269_v52  ;;  %vm315_vm4 = vcmp.eq.s32.totalorder %v8420_v50, %v269_v52  ;;  %vm318_vm10 = vcmp.eq.s32.totalorder %v8417_v47, %v275_v51  ;;  %v7141_v52 = vld [vmem:[#allocation8 + $0x20] sm:$0xff]  }
 0x187   :  { %vm5729_vm6 = vmpackc.low %vm315_vm4, %vm313_vm3 }
 0x188   :  { %5730 = vmatprep.mubr.msk.bf16.mxu0 %vm5729_vm6, %v7973_v53  ;;  %vm5731_vm7 = vmpackc.low %vm314_vm2, %vm312_vm5 }
 0x189   :  { %5732 = vmatmul.mubr.msk.bf16.vlgmr.msra.gmra.mrb[0].mxu0 %vm5731_vm7, %v7973_v53  ;;  %vm5733_vm8 = vmpackc.low %vm319_vm1, %vm317_vm0  ;;  %v281_v55 = vpop.permute.xlu1 %280  ;;  %v278_v56 = vpop.permute.xlu0 %277 }
 0x18a   :  { %5734 = vmatprep.mubr.msk.bf16.mxu0 %vm5733_vm8, %v7973_v53  ;;  %6395 = vmatpush3.bf16.msra.mxu0 %v7107_v36  ;;  %vm323_vm11 = vcmp.eq.s32.totalorder %v8420_v50, %v281_v55  ;;  %vm321_vm12 = vcmp.eq.s32.totalorder %v8420_v50, %v278_v56  ;;  %vm5735_vm13 = vmpackc.low %vm318_vm10, %vm316_vm9  ;;  %vm322_vm15 = vcmp.eq.s32.totalorder %v8417_v47, %v281_v55  ;;  %v7142_v55 = vld [vmem:[#allocation8 + $0x28] sm:$0xff]  }
 0x18b   :  { %6396 = vmatprep.subr.bf16.mxu0 %v7111_v54  ;;  %vm5737_vm14 = vmpackc.low %vm323_vm11, %vm321_vm12  ;;  %vm320_vm0 = vcmp.eq.s32.totalorder %v8417_v47, %v278_v56 }
 0x18c   :  { %vm5739_vm3 = vmpackc.low %vm322_vm15, %vm320_vm0 }
 0x18d   :  { %v287_v59 = vpop.permute.xlu1 %286  ;;  %v284_v60 = vpop.permute.xlu0 %283 }
 0x18e   :  { %6397 = vmatpush3.bf16.msra.mxu0 %v7111_v54  ;;  %vm327_vm1 = vcmp.eq.s32.totalorder %v8420_v50, %v287_v59  ;;  %vm325_vm2 = vcmp.eq.s32.totalorder %v8420_v50, %v284_v60  ;;  %vm326_vm5 = vcmp.eq.s32.totalorder %v8417_v47, %v287_v59  ;;  %vm324_vm6 = vcmp.eq.s32.totalorder %v8417_v47, %v284_v60 }
 0x18f   :  { %6398 = vmatprep.subr.bf16.mxu0 %v7115_v57  ;;  %vm5741_vm4 = vmpackc.low %vm327_vm1, %vm325_vm2 }
 0x190   :  { %vm5743_vm9 = vmpackc.low %vm326_vm5, %vm324_vm6 }
 0x191   :  { %5736 = vmatmul.mubr.msk.bf16.gmra.mrb[4].mxu0 %vm5735_vm13, %v7973_v53  ;;  %v293_v61 = vpop.permute.xlu1 %292  ;;  %v290_v62 = vpop.permute.xlu0 %289 }
 0x192   :  { %5738 = vmatprep.mubr.msk.bf16.mxu0 %vm5737_vm14, %v7973_v53  ;;  %6399 = vmatpush3.bf16.msra.mxu0 %v7115_v57  ;;  %vm331_vm7 = vcmp.eq.s32.totalorder %v8420_v50, %v293_v61  ;;  %vm329_vm8 = vcmp.eq.s32.totalorder %v8420_v50, %v290_v62  ;;  %vm330_vm11 = vcmp.eq.s32.totalorder %v8417_v47, %v293_v61 }
 0x193   :  { %6400 = vmatprep.subr.bf16.mxu0 %v7119_v58  ;;  %vm5745_vm10 = vmpackc.low %vm331_vm7, %vm329_vm8  ;;  %vm328_vm12 = vcmp.eq.s32.totalorder %v8417_v47, %v290_v62 }
 0x194   :  { %vm5747_vm15 = vmpackc.low %vm330_vm11, %vm328_vm12 }
 0x195   :  { %v299_v63 = vpop.permute.xlu1 %298  ;;  %v296_v1 = vpop.permute.xlu0 %295 }
 0x196   :  { %6401 = vmatpush3.bf16.msra.mxu0 %v7119_v58  ;;  %vm335_vm13 = vcmp.eq.s32.totalorder %v8420_v50, %v299_v63  ;;  %vm333_vm14 = vcmp.eq.s32.totalorder %v8420_v50, %v296_v1  ;;  %vm334_vm1 = vcmp.eq.s32.totalorder %v8417_v47, %v299_v63  ;;  %vm332_vm2 = vcmp.eq.s32.totalorder %v8417_v47, %v296_v1 }
 0x197   :  { %vm5749_vm0 = vmpackc.low %vm335_vm13, %vm333_vm14  ;;  %6402 = vmatprep.subr.bf16.mxu0 %v7123_v7 }
 0x198   :  { %vm5751_vm5 = vmpackc.low %vm334_vm1, %vm332_vm2 }
 0x199   :  { %5740 = vmatmul.mubr.msk.bf16.gmra.mrb[8].mxu0 %vm5739_vm3, %v7973_v53  ;;  %v305_v2 = vpop.permute.xlu1 %304  ;;  %v302_v3 = vpop.permute.xlu0 %301 }
 0x19a   :  { %5742 = vmatprep.mubr.msk.bf16.mxu0 %vm5741_vm4, %v7973_v53  ;;  %vm339_vm3 = vcmp.eq.s32.totalorder %v8420_v50, %v305_v2  ;;  %vm337_vm4 = vcmp.eq.s32.totalorder %v8420_v50, %v302_v3  ;;  %vm338_vm7 = vcmp.eq.s32.totalorder %v8417_v47, %v305_v2  ;;  %vm336_vm8 = vcmp.eq.s32.totalorder %v8417_v47, %v302_v3 }
 0x19b   :  { %vm5753_vm6 = vmpackc.low %vm339_vm3, %vm337_vm4  ;;  %6403 = vmatpush3.bf16.msra.mxu0 %v7123_v7 }
 0x19c   :  { %vm5755_vm11 = vmpackc.low %vm338_vm7, %vm336_vm8  ;;  %6404 = vmatprep.subr.bf16.mxu0 %v7127_v10 }
 0x19d   :  { %v311_v4 = vpop.permute.xlu1 %310  ;;  %v308_v5 = vpop.permute.xlu0 %307 }
 0x19e   :  { %vm342_vm13 = vcmp.eq.s32.totalorder %v8417_v47, %v311_v4  ;;  %vm340_vm14 = vcmp.eq.s32.totalorder %v8417_v47, %v308_v5 }
 0x19f   :  { %6405 = vmatpush3.bf16.msra.mxu0 %v7127_v10 }
 0x1a0   :  { %6406 = vmatprep.subr.bf16.mxu0 %v7129_v12 }
 0x1a1   :  { %5744 = vmatmul.mubr.msk.bf16.gmra.mrb[12].mxu0 %vm5743_vm9, %v7973_v53  ;;  %vm343_vm9 = vcmp.eq.s32.totalorder %v8420_v50, %v311_v4 }
 0x1a2   :  { %5746 = vmatprep.mubr.msk.bf16.mxu0 %vm5745_vm10, %v7973_v53  ;;  %vm341_vm10 = vcmp.eq.s32.totalorder %v8420_v50, %v308_v5  ;;  %v7143_v50 = vld [vmem:[#allocation7 + $0x30] sm:$0xff]  }
 0x1a3   :  { %vm5757_vm12 = vmpackc.low %vm343_vm9, %vm341_vm10  ;;  %6407 = vmatpush3.bf16.msra.mxu0 %v7129_v12 }
 0x1a4   :  { %6408 = vmatprep.subr.bf16.mxu0 %v7130_v13 }
 0x1a7   :  { %6409 = vmatpush3.bf16.msra.mxu0 %v7130_v13 }
 0x1a8   :  { %6458 = vmatprep.subr.bf16.mxu0 %v7135_v15 }
 0x1a9   :  { %5748 = vmatmul.mubr.msk.bf16.gmra.mrb[16].mxu0 %vm5747_vm15, %v7973_v53  ;;  %vm5759_vm15 = vmpackc.low %vm342_vm13, %vm340_vm14 }
 0x1aa   :  { %5750 = vmatprep.mubr.msk.bf16.mxu0 %vm5749_vm0, %v7973_v53 }
 0x1b1   :  { %5752 = vmatmul.mubr.msk.bf16.gmra.mrb[20].mxu0 %vm5751_vm5, %v7973_v53 }
 0x1b2   :  { %5754 = vmatprep.mubr.msk.bf16.mxu0 %vm5753_vm6, %v7973_v53 }
 0x1b9   :  { %5756 = vmatmul.mubr.msk.bf16.gmra.mrb[24].mxu0 %vm5755_vm11, %v7973_v53 }
 0x1ba   :  { %5758 = vmatprep.mubr.msk.bf16.mxu0 %vm5757_vm12, %v7973_v53  ;;  %vm1801_vm12 = vcmask 130048  }
 0x1c1   :  { %5760 = vmatmul.mubr.msk.bf16.gmra.mrb[28].mxu0 %vm5759_vm15, %v7973_v53 }
 0x25c   :  { %v6039_v16 = vpop.f32.mrb[0].mxu0 }
 0x25d   :  { %v6040_v17 = vpop.f32.mrb[1].mxu0 }
 0x25e   :  { %v8503_v18 = vadd.f32 %v6040_v17, %v6039_v16  ;;  %v6042_v19 = vpop.f32.mrb[2].mxu0 }
 0x25f   :  { %v6043_v20 = vpop.f32.mrb[3].mxu0 }
 0x260   :  { %10273 = vst [vmem:[#allocation31_spill] sm:$0xff] %v8503_v18  ;;  %v8505_v21 = vadd.f32 %v6043_v20, %v6042_v19 }
 0x262   :  { %10274 = vst [vmem:[#allocation32_spill] sm:$0xff] %v8505_v21  ;;  %v731_v22 = vpack.c.bf16 %v8505_v21, %v8503_v18 }
 0x264   :  { %v6045_v24 = vpop.f32.mrb[4].mxu0  ;;  %900 = vmatmul.mubr.bf16.vlgmr.msra.gmra.mrb[0].mxu1 %v731_v22  ;;  %6410 = vmatprep.mubr.bf16.mxu0 %v731_v22 }
 0x265   :  { %v6046_v25 = vpop.f32.mrb[5].mxu0  ;;  %909 = vmatprep.mubr.bf16.mxu1 %v10221_v0  ;;  %6427 = vmatpush3.bf16.msra.mxu1 %v7131_v14 }
 0x266   :  { %v8510_v26 = vadd.f32 %v6046_v25, %v6045_v24  ;;  %v6048_v27 = vpop.f32.mrb[6].mxu0  ;;  %6428 = vmatprep.subr.bf16.mxu1 %v7132_v23  ;;  %v7145_v24 = vld [vmem:[#allocation8 + $0x38] sm:$0xff]  }
 0x267   :  { %v6049_v29 = vpop.f32.mrb[7].mxu0  ;;  %v7146_v25 = vld [vmem:[#allocation7 + $0x38] sm:$0xff]  }
 0x268   :  { %10275 = vst [vmem:[#allocation33_spill] sm:$0xff] %v8510_v26  ;;  %v8512_v30 = vadd.f32 %v6049_v29, %v6048_v27  ;;  %v7147_v27 = vld [vmem:[%s10289_s17] sm:$0xff]  }
 0x269   :  { %6429 = vmatpush3.bf16.msra.mxu1 %v7132_v23  ;;  %v7144_v23 = vld [vmem:[#allocation8 + $0x30] sm:$0xff]  }
 0x26a   :  { %10276 = vst [vmem:[#allocation34_spill] sm:$0xff] %v8512_v30  ;;  %v732_v31 = vpack.c.bf16 %v8512_v30, %v8510_v26  ;;  %6430 = vmatprep.subr.bf16.mxu1 %v7133_v28 }
 0x26c   :  { %v6051_v34 = vpop.f32.mrb[8].mxu0  ;;  %910 = vmatmul.mubr.bf16.gmra.mrb[4].mxu1 %v732_v31  ;;  %6411 = vmatmul.mubr.bf16.vlgmr.msra.gmra.mrb[32].mxu0 %v732_v31 }
 0x26d   :  { %v6052_v35 = vpop.f32.mrb[9].mxu0  ;;  %919 = vmatprep.mubr.bf16.mxu1 %v10221_v0  ;;  %6431 = vmatpush3.bf16.msra.mxu1 %v7133_v28 }
 0x26e   :  { %v8517_v36 = vadd.f32 %v6052_v35, %v6051_v34  ;;  %v6054_v37 = vpop.f32.mrb[10].mxu0  ;;  %6432 = vmatprep.subr.bf16.mxu1 %v7134_v32  ;;  %6459 = vmatpush3.bf16.msra.mxu0 %v7135_v15 }
 0x26f   :  { %v6055_v39 = vpop.f32.mrb[11].mxu0  ;;  %6460 = vmatprep.subr.bf16.mxu0 %v7136_v33 }
 0x270   :  { %10277 = vst [vmem:[#allocation35_spill] sm:$0xff] %v8517_v36  ;;  %v8519_v41 = vadd.f32 %v6055_v39, %v6054_v37 }
 0x271   :  { %6433 = vmatpush3.bf16.msra.mxu1 %v7134_v32 }
 0x272   :  { %10278 = vst [vmem:[#allocation36_spill] sm:$0xff] %v8519_v41  ;;  %v733_v42 = vpack.c.bf16 %v8519_v41, %v8517_v36  ;;  %6434 = vmatprep.subr.bf16.mxu1 %v7137_v38  ;;  %6461 = vmatpush3.bf16.msra.mxu0 %v7136_v33  ;;  %v631_v41 = vld [vmem:[%s10304_s9 + $0x70] sm:$0xff] }
 0x273   :  { %6462 = vmatprep.subr.bf16.mxu0 %v7138_v40 }
 0x274   :  { %v6057_v45 = vpop.f32.mrb[12].mxu0  ;;  %920 = vmatmul.mubr.bf16.gmra.mrb[8].mxu1 %v733_v42  ;;  %6414 = vmatprep.mubr.bf16.mxu0 %v733_v42 }
 0x275   :  { %v6058_v47 = vpop.f32.mrb[13].mxu0  ;;  %929 = vmatprep.mubr.bf16.mxu1 %v10221_v0  ;;  %6435 = vmatpush3.bf16.msra.mxu1 %v7137_v38 }
 0x276   :  { %v8524_v48 = vadd.f32 %v6058_v47, %v6057_v45  ;;  %v6060_v49 = vpop.f32.mrb[14].mxu0  ;;  %6463 = vmatpush3.bf16.msra.mxu0 %v7138_v40  ;;  %6436 = vmatprep.subr.bf16.mxu1 %v7140_v43 }
 0x277   :  { %v6061_v51 = vpop.f32.mrb[15].mxu0  ;;  %6464 = vmatprep.subr.bf16.mxu0 %v7139_v44 }
 0x278   :  { %10279 = vst [vmem:[#allocation37_spill] sm:$0xff] %v8524_v48  ;;  %v8526_v53 = vadd.f32 %v6061_v51, %v6060_v49  ;;  %v7148_v49 = vld [vmem:[%s10289_s17 + $0x8] sm:$0xff]  }
 0x279   :  { %6437 = vmatpush3.bf16.msra.mxu1 %v7140_v43 }
 0x27a   :  { %10280 = vst [vmem:[#allocation38_spill] sm:$0xff] %v8526_v53  ;;  %v734_v54 = vpack.c.bf16 %v8526_v53, %v8524_v48  ;;  %6465 = vmatpush3.bf16.msra.mxu0 %v7139_v44  ;;  %6438 = vmatprep.subr.bf16.mxu1 %v7143_v50 }
 0x27b   :  { %6466 = vmatprep.subr.bf16.mxu0 %v7141_v52 }
 0x27c   :  { %v6063_v56 = vpop.f32.mrb[16].mxu0  ;;  %930 = vmatmul.mubr.bf16.gmra.mrb[12].mxu1 %v734_v54  ;;  %6415 = vmatmul.mubr.bf16.gmra.mrb[36].mxu0 %v734_v54 }
 0x27d   :  { %v6064_v57 = vpop.f32.mrb[17].mxu0  ;;  %939 = vmatprep.mubr.bf16.mxu1 %v10221_v0  ;;  %6439 = vmatpush3.bf16.msra.mxu1 %v7143_v50 }
 0x27e   :  { %v8531_v58 = vadd.f32 %v6064_v57, %v6063_v56  ;;  %v6066_v59 = vpop.f32.mrb[18].mxu0  ;;  %6467 = vmatpush3.bf16.msra.mxu0 %v7141_v52  ;;  %6440 = vmatprep.subr.bf16.mxu1 %v7146_v25  ;;  %v7149_v52 = vld [vmem:[%s10289_s17 + $0x10] sm:$0xff]  }
 0x27f   :  { %v6067_v60 = vpop.f32.mrb[19].mxu0  ;;  %6468 = vmatprep.subr.bf16.mxu0 %v7142_v55 }
 0x280   :  { %10281 = vst [vmem:[#allocation39_spill] sm:$0xff] %v8531_v58  ;;  %v8533_v61 = vadd.f32 %v6067_v60, %v6066_v59  ;;  %v7150_v60 = vld [vmem:[%s10289_s17 + $0x18] sm:$0xff]  }
 0x281   :  { %6441 = vmatpush3.bf16.msra.mxu1 %v7146_v25 }
 0x282   :  { %10282 = vst [vmem:[#allocation40_spill] sm:$0xff] %v8533_v61  ;;  %v735_v62 = vpack.c.bf16 %v8533_v61, %v8531_v58  ;;  %6469 = vmatpush3.bf16.msra.mxu0 %v7142_v55  ;;  %6490 = vmatprep.subr.bf16.mxu1 %v7147_v27 }
 0x283   :  { %6470 = vmatprep.subr.bf16.mxu0 %v7144_v23 }
 0x284   :  { %v6069_v63 = vpop.f32.mrb[20].mxu0  ;;  %940 = vmatmul.mubr.bf16.gmra.mrb[16].mxu1 %v735_v62  ;;  %6418 = vmatprep.mubr.bf16.mxu0 %v735_v62 }
 0x285   :  { %v6070_v1 = vpop.f32.mrb[21].mxu0  ;;  %949 = vmatprep.mubr.bf16.mxu1 %v10221_v0 }
 0x286   :  { %v8538_v2 = vadd.f32 %v6070_v1, %v6069_v63  ;;  %v6072_v3 = vpop.f32.mrb[22].mxu0  ;;  %6471 = vmatpush3.bf16.msra.mxu0 %v7144_v23  ;;  %v7151_v63 = vld [vmem:[%s10289_s17 + $0x20] sm:$0xff]  }
 0x287   :  { %v6073_v4 = vpop.f32.mrb[23].mxu0  ;;  %6472 = vmatprep.subr.bf16.mxu0 %v7145_v24 }
 0x288   :  { %10283 = vst [vmem:[#allocation41_spill] sm:$0xff] %v8538_v2  ;;  %v8540_v5 = vadd.f32 %v6073_v4, %v6072_v3 }
 0x28a   :  { %10284 = vst [vmem:[#allocation42_spill] sm:$0xff] %v8540_v5  ;;  %v736_v6 = vpack.c.bf16 %v8540_v5, %v8538_v2  ;;  %6473 = vmatpush3.bf16.msra.mxu0 %v7145_v24 }
 0x28c   :  { %v6075_v7 = vpop.f32.mrb[24].mxu0  ;;  %950 = vmatmul.mubr.bf16.gmra.mrb[20].mxu1 %v736_v6  ;;  %6419 = vmatmul.mubr.bf16.gmra.mrb[40].mxu0 %v736_v6 }
 0x28d   :  { %v6076_v8 = vpop.f32.mrb[25].mxu0  ;;  %959 = vmatprep.mubr.bf16.mxu1 %v10221_v0 }
 0x28e   :  { %v8545_v9 = vadd.f32 %v6076_v8, %v6075_v7  ;;  %v6078_v10 = vpop.f32.mrb[26].mxu0 }
 0x28f   :  { %v6079_v11 = vpop.f32.mrb[27].mxu0 }
 0x290   :  { %10285 = vst [vmem:[#allocation43_spill] sm:$0xff] %v8545_v9  ;;  %v8547_v12 = vadd.f32 %v6079_v11, %v6078_v10 }
 0x292   :  { %10286 = vst [vmem:[#allocation44_spill] sm:$0xff] %v8547_v12  ;;  %v737_v13 = vpack.c.bf16 %v8547_v12, %v8545_v9 }
 0x294   :  { %v6081_v14 = vpop.f32.mrb[28].mxu0  ;;  %960 = vmatmul.mubr.bf16.gmra.mrb[24].mxu1 %v737_v13  ;;  %6422 = vmatprep.mubr.bf16.mxu0 %v737_v13 }
 0x295   :  { %v6082_v15 = vpop.f32.mrb[29].mxu0  ;;  %969 = vmatprep.mubr.bf16.mxu1 %v10221_v0 }
 0x296   :  { %v8552_v16 = vadd.f32 %v6082_v15, %v6081_v14  ;;  %v6084_v17 = vpop.f32.mrb[30].mxu0  ;;  %v7152_v15 = vld [vmem:[%s10289_s17 + $0x28] sm:$0xff]  }
 0x297   :  { %v6085_v19 = vpop.f32.mrb[31].mxu0 }
 0x298   :  { %10287 = vst [vmem:[#allocation45_spill] sm:$0xff] %v8552_v16  ;;  %v8554_v20 = vadd.f32 %v6085_v19, %v6084_v17 }
 0x29a   :  { %10288 = vst [vmem:[#allocation46_spill] sm:$0xff] %v8554_v20  ;;  %v738_v22 = vpack.c.bf16 %v8554_v20, %v8552_v16  ;;  %v622_v20 = vld [vmem:[%s10304_s9 + $0x28] sm:$0xff]  ;;  %v628_v16 = vld [vmem:[%s10304_s9 + $0x58] sm:$0xff] }
 0x29c   :  { %970 = vmatmul.mubr.bf16.gmra.mrb[28].mxu1 %v738_v22  ;;  %6423 = vmatmul.mubr.bf16.gmra.mrb[44].mxu0 %v738_v22  ;;  %v7153_v22 = vld [vmem:[%s10289_s17 + $0x30] sm:$0xff]  }
 0x337   :  { %v901_v28 = vpop.f32.mrb[0].mxu1 }
 0x338   :  { %v903_v29 = vpop.f32.mrb[1].mxu1 }
 0x339   :  { %v905_v31 = vpop.f32.mrb[2].mxu1 }
 0x33a   :  { %v8561_v32 = vpack.c.bf16 %v905_v31, %v901_v28  ;;  %v907_v33 = vpop.f32.mrb[3].mxu1 }
 0x33b   :  { %v8563_v34 = vpack.c.bf16 %v907_v33, %v903_v29  ;;  %v7154_v29 = vld [vmem:[%s10289_s17 + $0x38] sm:$0xff]  }
 0x33c   :  { %6442 = vmatprep.mubr.bf16.mxu1 %v8561_v32 }
 0x33d   :  { %6522 = vmatprep.subr.bf16.mxu0 %v8563_v34 }
 0x33f   :  { %v911_v35 = vpop.f32.mrb[4].mxu1  ;;  %v6412_v37 = vpop.f32.mrb[32].mxu0 }
 0x340   :  { %v913_v38 = vpop.f32.mrb[5].mxu1  ;;  %v1014_v39 = vpop.f32.mrb[33].mxu0 }
 0x341   :  { %v915_v40 = vpop.f32.mrb[6].mxu1  ;;  %v6413_v42 = vpop.f32.mrb[34].mxu0 }
 0x342   :  { %v8567_v43 = vpack.c.bf16 %v915_v40, %v911_v35  ;;  %v8569_v44 = vpack.c.bf16 %v6413_v42, %v6412_v37  ;;  %v917_v45 = vpop.f32.mrb[7].mxu1  ;;  %v1017_v47 = vpop.f32.mrb[35].mxu0 }
 0x343   :  { %v8574_v50 = vpack.c.bf16 %v917_v45, %v913_v38  ;;  %v8576_v51 = vpack.c.bf16 %v1017_v47, %v1014_v39 }
 0x344   :  { %6443 = vmatmul.mubr.bf16.vlgmr.msra.gmra.mrb[32].mxu1 %v8567_v43 }
 0x345   :  { %6491 = vmatpush3.bf16.msra.mxu1 %v7147_v27 }
 0x346   :  { %6492 = vmatprep.subr.bf16.mxu1 %v7148_v49 }
 0x347   :  { %v921_v54 = vpop.f32.mrb[8].mxu1 }
 0x348   :  { %v923_v55 = vpop.f32.mrb[9].mxu1 }
 0x349   :  { %6493 = vmatpush3.bf16.msra.mxu1 %v7148_v49  ;;  %v925_v56 = vpop.f32.mrb[10].mxu1 }
 0x34a   :  { %v8582_v57 = vpack.c.bf16 %v925_v56, %v921_v54  ;;  %v927_v59 = vpop.f32.mrb[11].mxu1  ;;  %6494 = vmatprep.subr.bf16.mxu1 %v7149_v52 }
 0x34b   :  { %v8587_v62 = vpack.c.bf16 %v927_v59, %v923_v55 }
 0x34c   :  { %6446 = vmatprep.mubr.bf16.mxu1 %v8582_v57 }
 0x34d   :  { %6495 = vmatpush3.bf16.msra.mxu1 %v7149_v52 }
 0x34e   :  { %6496 = vmatprep.subr.bf16.mxu1 %v7150_v60 }
 0x34f   :  { %v931_v1 = vpop.f32.mrb[12].mxu1  ;;  %v6416_v3 = vpop.f32.mrb[36].mxu0 }
 0x350   :  { %v933_v4 = vpop.f32.mrb[13].mxu1  ;;  %v1030_v6 = vpop.f32.mrb[37].mxu0 }
 0x351   :  { %6497 = vmatpush3.bf16.msra.mxu1 %v7150_v60  ;;  %v935_v7 = vpop.f32.mrb[14].mxu1  ;;  %v6417_v8 = vpop.f32.mrb[38].mxu0 }
 0x352   :  { %v8593_v10 = vpack.c.bf16 %v935_v7, %v931_v1  ;;  %v8595_v11 = vpack.c.bf16 %v6417_v8, %v6416_v3  ;;  %v937_v13 = vpop.f32.mrb[15].mxu1  ;;  %v1033_v14 = vpop.f32.mrb[39].mxu0  ;;  %6498 = vmatprep.subr.bf16.mxu1 %v7151_v63 }
 0x353   :  { %v8600_v17 = vpack.c.bf16 %v937_v13, %v933_v4  ;;  %v1795_v19 = vpack.c.bf16 %v1033_v14, %v1030_v6 }
 0x354   :  { %6447 = vmatmul.mubr.bf16.gmra.mrb[36].mxu1 %v8593_v10 }
 0x355   :  { %6499 = vmatpush3.bf16.msra.mxu1 %v7151_v63 }
 0x356   :  { %6500 = vmatprep.subr.bf16.mxu1 %v7152_v15 }
 0x357   :  { %v941_v23 = vpop.f32.mrb[16].mxu1 }
 0x358   :  { %v943_v24 = vpop.f32.mrb[17].mxu1 }
 0x359   :  { %6501 = vmatpush3.bf16.msra.mxu1 %v7152_v15  ;;  %v945_v25 = vpop.f32.mrb[18].mxu1 }
 0x35a   :  { %v8606_v27 = vpack.c.bf16 %v945_v25, %v941_v23  ;;  %v947_v28 = vpop.f32.mrb[19].mxu1  ;;  %6502 = vmatprep.subr.bf16.mxu1 %v7153_v22 }
 0x35b   :  { %v8611_v31 = vpack.c.bf16 %v947_v28, %v943_v24 }
 0x35c   :  { %6450 = vmatprep.mubr.bf16.mxu1 %v8606_v27 }
 0x35d   :  { %6503 = vmatpush3.bf16.msra.mxu1 %v7153_v22 }
 0x35e   :  { %6504 = vmatprep.subr.bf16.mxu1 %v7154_v29 }
 0x35f   :  { %v951_v33 = vpop.f32.mrb[20].mxu1  ;;  %v6420_v35 = vpop.f32.mrb[40].mxu0 }
 0x360   :  { %v953_v37 = vpop.f32.mrb[21].mxu1  ;;  %v1046_v38 = vpop.f32.mrb[41].mxu0 }
 0x361   :  { %6505 = vmatpush3.bf16.msra.mxu1 %v7154_v29  ;;  %v955_v39 = vpop.f32.mrb[22].mxu1  ;;  %v6421_v40 = vpop.f32.mrb[42].mxu0 }
 0x362   :  { %v8614_v42 = vpack.c.bf16 %v955_v39, %v951_v33  ;;  %v1798_v45 = vpack.c.bf16 %v6421_v40, %v6420_v35  ;;  %6554 = vmatprep.subr.bf16.mxu1 %v8576_v51  ;;  %v957_v47 = vpop.f32.mrb[23].mxu1  ;;  %v1049_v49 = vpop.f32.mrb[43].mxu0 }
 0x363   :  { %v8617_v52 = vpack.c.bf16 %v957_v47, %v953_v37  ;;  %v1797_v54 = vpack.c.bf16 %v1049_v49, %v1046_v38 }
 0x364   :  { %6451 = vmatmul.mubr.bf16.gmra.mrb[40].mxu1 %v8614_v42 }
 0x367   :  { %v961_v55 = vpop.f32.mrb[24].mxu1 }
 0x368   :  { %v963_v56 = vpop.f32.mrb[25].mxu1 }
 0x369   :  { %v965_v59 = vpop.f32.mrb[26].mxu1 }
 0x36a   :  { %v8620_v60 = vpack.c.bf16 %v965_v59, %v961_v55  ;;  %v967_v63 = vpop.f32.mrb[27].mxu1 }
 0x36b   :  { %v8622_v1 = vpack.c.bf16 %v967_v63, %v963_v56 }
 0x36c   :  { %6454 = vmatprep.mubr.bf16.mxu1 %v8620_v60 }
 0x36f   :  { %v971_v3 = vpop.f32.mrb[28].mxu1  ;;  %v6424_v4 = vpop.f32.mrb[44].mxu0 }
 0x370   :  { %v973_v6 = vpop.f32.mrb[29].mxu1  ;;  %v1062_v7 = vpop.f32.mrb[45].mxu0 }
 0x371   :  { %v975_v8 = vpop.f32.mrb[30].mxu1  ;;  %v6425_v13 = vpop.f32.mrb[46].mxu0 }
 0x372   :  { %v8625_v14 = vpack.c.bf16 %v975_v8, %v971_v3  ;;  %v1800_v15 = vpack.c.bf16 %v6425_v13, %v6424_v4  ;;  %v977_v22 = vpop.f32.mrb[31].mxu1  ;;  %v1065_v23 = vpop.f32.mrb[47].mxu0 }
 0x373   :  { %v8627_v24 = vpack.c.bf16 %v977_v22, %v973_v6  ;;  %v1799_v25 = vpack.c.bf16 %v1065_v23, %v1062_v7 }
 0x374   :  { %6455 = vmatmul.mubr.bf16.gmra.mrb[44].mxu1 %v8625_v14 }
 0x375   :  { %6506 = vmatprep.mubr.bf16.mxu1 %v8561_v32 }
 0x37c   :  { %6507 = vmatmul.mubr.bf16.vlgmr.msra.gmra.mrb[48].mxu1 %v8567_v43 }
 0x37d   :  { %6555 = vmatpush3.bf16.msra.mxu1 %v8576_v51  ;;  %6510 = vmatprep.mubr.bf16.mxu1 %v8582_v57 }
 0x37e   :  { %6556 = vmatprep.subr.bf16.mxu1 %v8569_v44 }
 0x381   :  { %6557 = vmatpush3.bf16.msra.mxu1 %v8569_v44 }
 0x382   :  { %6558 = vmatprep.subr.bf16.mxu1 %v1795_v19 }
 0x384   :  { %6511 = vmatmul.mubr.bf16.gmra.mrb[52].mxu1 %v8593_v10 }
 0x385   :  { %6559 = vmatpush3.bf16.msra.mxu1 %v1795_v19  ;;  %6514 = vmatprep.mubr.bf16.mxu1 %v8606_v27 }
 0x386   :  { %6560 = vmatprep.subr.bf16.mxu1 %v8595_v11 }
 0x389   :  { %6561 = vmatpush3.bf16.msra.mxu1 %v8595_v11 }
 0x38a   :  { %6562 = vmatprep.subr.bf16.mxu1 %v1797_v54 }
 0x38c   :  { %6515 = vmatmul.mubr.bf16.gmra.mrb[56].mxu1 %v8614_v42 }
 0x38d   :  { %6563 = vmatpush3.bf16.msra.mxu1 %v1797_v54  ;;  %6518 = vmatprep.mubr.bf16.mxu1 %v8620_v60 }
 0x38e   :  { %6564 = vmatprep.subr.bf16.mxu1 %v1798_v45 }
 0x391   :  { %6565 = vmatpush3.bf16.msra.mxu1 %v1798_v45 }
 0x392   :  { %6566 = vmatprep.subr.bf16.mxu1 %v1799_v25 }
 0x394   :  { %6519 = vmatmul.mubr.bf16.gmra.mrb[60].mxu1 %v8625_v14 }
 0x395   :  { %6567 = vmatpush3.bf16.msra.mxu1 %v1799_v25 }
 0x396   :  { %6568 = vmatprep.subr.bf16.mxu1 %v1800_v15 }
 0x399   :  { %6569 = vmatpush3.bf16.msra.mxu1 %v1800_v15 }
 0x417   :  { %v6444_v44 = vpop.f32.mrb[32].mxu1 }
 0x418   :  { %v1250_v51 = vmul.f32 1.442695, %v6444_v44  ;;  %v1167_v19 = vpop.f32.mrb[33].mxu1  ;;  %vm1232_vm0 = vcmp.gt.f32.partialorder %v6444_v44, 0.0 }
 0x419   :  { %v1246_v28 = vmul.f32 1.442695, %v1167_v19  ;;  %v6445_v29 = vpop.f32.mrb[34].mxu1  ;;  %vm1230_vm1 = vcmp.gt.f32.partialorder %v1167_v19, 0.0 }
 0x41a   :  { %7310 = vpow2.f32 %v1250_v51  ;;  %v1252_v11 = vmul.f32 1.442695, %v6445_v29  ;;  %v1170_v33 = vpop.f32.mrb[35].mxu1  ;;  %vm1233_vm2 = vcmp.gt.f32.partialorder %v6445_v29, 0.0 }
 0x41b   :  { %7312 = vpow2.f32 %v1246_v28  ;;  %v1248_v35 = vmul.f32 1.442695, %v1170_v33  ;;  %vm1231_vm3 = vcmp.gt.f32.partialorder %v1170_v33, 0.0 }
 0x41c   :  { %7314 = vpow2.f32 %v1252_v11 }
 0x41d   :  { %7316 = vpow2.f32 %v1248_v35 }
 0x424   :  { %v7311_v37 = vpop.eup %7310 }
 0x425   :  { %v7313_v38 = vpop.eup %7312  ;;  %v5795_v39 = vadd.f32 -1.0, %v7311_v37 }
 0x426   :  { %v7315_v40 = vpop.eup %7314  ;;  %v5793_v45 = vadd.f32 -1.0, %v7313_v38 }
 0x427   :  { %v7317_v47 = vpop.eup %7316  ;;  %v1296_v49 = vmul.f32 1.6732632, %v5795_v39  ;;  %v5796_v54 = vadd.f32 -1.0, %v7315_v40  ;;  %v6448_v55 = vpop.f32.mrb[36].mxu1 }
 0x428   :  { %v1294_v56 = vmul.f32 1.6732632, %v5793_v45  ;;  %v5794_v59 = vadd.f32 -1.0, %v7317_v47  ;;  %v1258_v63 = vmul.f32 1.442695, %v6448_v55  ;;  %v1183_v6 = vpop.f32.mrb[37].mxu1 }
 0x429   :  { %v1312_v3 = vsel %vm1232_vm0, %v6444_v44, %v1296_v49  ;;  %v1297_v4 = vmul.f32 1.6732632, %v5796_v54  ;;  %v6449_v13 = vpop.f32.mrb[38].mxu1  ;;  %v1254_v22 = vmul.f32 1.442695, %v1183_v6  ;;  %vm1236_vm4 = vcmp.gt.f32.partialorder %v6448_v55, 0.0 }
 0x42a   :  { %v1310_v7 = vsel %vm1230_vm1, %v1167_v19, %v1294_v56  ;;  %v1295_v8 = vmul.f32 1.6732632, %v5794_v59  ;;  %7318 = vpow2.f32 %v1258_v63  ;;  %v1186_v23 = vpop.f32.mrb[39].mxu1  ;;  %v1328_v25 = vmul.f32 1.050701, %v1312_v3 }
 0x42b   :  { %v1313_v15 = vsel %vm1233_vm2, %v6445_v29, %v1297_v4  ;;  %v1260_v11 = vmul.f32 1.442695, %v6449_v13  ;;  %v1326_v35 = vmul.f32 1.050701, %v1310_v7  ;;  %7320 = vpow2.f32 %v1254_v22 }
 0x42c   :  { %v1329_v51 = vmul.f32 1.050701, %v1313_v15  ;;  %v1311_v28 = vsel %vm1231_vm3, %v1170_v33, %v1295_v8  ;;  %v1256_v44 = vmul.f32 1.442695, %v1186_v23  ;;  %vm1234_vm5 = vcmp.gt.f32.partialorder %v1183_v6, 0.0 }
 0x42d   :  { %v1327_v37 = vmul.f32 1.050701, %v1311_v28  ;;  %7322 = vpow2.f32 %v1260_v11  ;;  %vm1237_vm6 = vcmp.gt.f32.partialorder %v6449_v13, 0.0  ;;  %vm1235_vm7 = vcmp.gt.f32.partialorder %v1186_v23, 0.0 }
 0x42e   :  { %v1343_v38 = vpack.c.bf16 %v1329_v51, %v1328_v25  ;;  %7324 = vpow2.f32 %v1256_v44 }
 0x42f   :  { %v1342_v19 = vpack.c.bf16 %v1327_v37, %v1326_v35 }
 0x431   :  { %6474 = vmatprep.mubr.bf16.mxu0 %v1342_v19 }
 0x432   :  { %6475 = vmatmul.mubr.bf16.vlgmr.msra.gmra.mrb[48].mxu0 %v1343_v38 }
 0x433   :  { %6523 = vmatpush3.bf16.xpose.msra.mxu0 %v8563_v34 }
 0x434   :  { %v7319_v29 = vpop.eup %7318  ;;  %6524 = vmatprep.subr.bf16.mxu0 %v8574_v50 }
 0x435   :  { %v5799_v39 = vadd.f32 -1.0, %v7319_v29  ;;  %v7321_v40 = vpop.eup %7320 }
 0x436   :  { %v5797_v49 = vadd.f32 -1.0, %v7321_v40 }
 0x437   :  { %v1300_v45 = vmul.f32 1.6732632, %v5799_v39  ;;  %v6452_v33 = vpop.f32.mrb[40].mxu1  ;;  %v7323_v47 = vpop.eup %7322 }
 0x438   :  { %v1266_v54 = vmul.f32 1.442695, %v6452_v33  ;;  %v1199_v56 = vpop.f32.mrb[41].mxu1  ;;  %v7325_v59 = vpop.eup %7324  ;;  %v5800_v63 = vadd.f32 -1.0, %v7323_v47  ;;  %v1298_v7 = vmul.f32 1.6732632, %v5797_v49 }
 0x439   :  { %v1262_v3 = vmul.f32 1.442695, %v1199_v56  ;;  %v6453_v4 = vpop.f32.mrb[42].mxu1  ;;  %v5798_v8 = vadd.f32 -1.0, %v7325_v59  ;;  %v1316_v15 = vsel %vm1236_vm4, %v6448_v55, %v1300_v45  ;;  %vm1240_vm8 = vcmp.gt.f32.partialorder %v6452_v33, 0.0 }
 0x43a   :  { %7326 = vpow2.f32 %v1266_v54  ;;  %v1202_v34 = vpop.f32.mrb[43].mxu1  ;;  %v1301_v22 = vmul.f32 1.6732632, %v5800_v63  ;;  %v1268_v25 = vmul.f32 1.442695, %v6453_v4  ;;  %v1314_v51 = vsel %vm1234_vm5, %v1183_v6, %v1298_v7 }
 0x43b   :  { %7328 = vpow2.f32 %v1262_v3  ;;  %6525 = vmatpush3.bf16.xpose.msra.mxu0 %v8574_v50  ;;  %v1299_v28 = vmul.f32 1.6732632, %v5798_v8  ;;  %v1264_v11 = vmul.f32 1.442695, %v1202_v34  ;;  %v1332_v37 = vmul.f32 1.050701, %v1316_v15 }
 0x43c   :  { %6526 = vmatprep.subr.bf16.mxu0 %v8587_v62  ;;  %v1317_v35 = vsel %vm1237_vm6, %v6449_v13, %v1301_v22  ;;  %7330 = vpow2.f32 %v1268_v25  ;;  %v1330_v19 = vmul.f32 1.050701, %v1314_v51  ;;  %vm1238_vm9 = vcmp.gt.f32.partialorder %v1199_v56, 0.0 }
 0x43d   :  { %v1333_v44 = vmul.f32 1.050701, %v1317_v35  ;;  %v1315_v38 = vsel %vm1235_vm7, %v1186_v23, %v1299_v28  ;;  %7332 = vpow2.f32 %v1264_v11  ;;  %vm1241_vm10 = vcmp.gt.f32.partialorder %v6453_v4, 0.0 }
 0x43e   :  { %v1331_v55 = vmul.f32 1.050701, %v1315_v38  ;;  %vm1239_vm11 = vcmp.gt.f32.partialorder %v1202_v34, 0.0 }
 0x43f   :  { %v1345_v29 = vpack.c.bf16 %v1333_v44, %v1332_v37 }
 0x440   :  { %v1344_v39 = vpack.c.bf16 %v1331_v55, %v1330_v19 }
 0x442   :  { %6478 = vmatprep.mubr.bf16.mxu0 %v1344_v39 }
 0x443   :  { %6527 = vmatpush3.bf16.xpose.msra.mxu0 %v8587_v62 }
 0x444   :  { %v7327_v50 = vpop.eup %7326  ;;  %6479 = vmatmul.mubr.bf16.gmra.mrb[52].mxu0 %v1345_v29  ;;  %6528 = vmatprep.subr.bf16.mxu0 %v8600_v17 }
 0x445   :  { %v7329_v6 = vpop.eup %7328  ;;  %v5803_v40 = vadd.f32 -1.0, %v7327_v50 }
 0x446   :  { %v5801_v13 = vadd.f32 -1.0, %v7329_v6  ;;  %v7331_v45 = vpop.eup %7330 }
 0x447   :  { %v1304_v47 = vmul.f32 1.6732632, %v5803_v40  ;;  %v8649_v49 = vpop.f32.mrb[44].mxu1  ;;  %v7333_v23 = vpop.eup %7332  ;;  %v5804_v59 = vadd.f32 -1.0, %v7331_v45 }
 0x448   :  { %v1302_v54 = vmul.f32 1.6732632, %v5801_v13  ;;  %v1274_v63 = vmul.f32 1.442695, %v8649_v49  ;;  %v5802_v3 = vadd.f32 -1.0, %v7333_v23  ;;  %v8652_v7 = vpop.f32.mrb[45].mxu1 }
 0x449   :  { %v1320_v62 = vsel %vm1240_vm8, %v6452_v33, %v1304_v47  ;;  %v1305_v8 = vmul.f32 1.6732632, %v5804_v59  ;;  %v8654_v15 = vpop.f32.mrb[46].mxu1  ;;  %v1270_v28 = vmul.f32 1.442695, %v8652_v7  ;;  %vm1244_vm13 = vcmp.gt.f32.partialorder %v8649_v49, 0.0 }
 0x44a   :  { %7334 = vpow2.f32 %v1274_v63  ;;  %v1318_v22 = vsel %vm1238_vm9, %v1199_v56, %v1302_v54  ;;  %v1303_v25 = vmul.f32 1.6732632, %v5802_v3  ;;  %v1276_v11 = vmul.f32 1.442695, %v8654_v15  ;;  %v8659_v35 = vpop.f32.mrb[47].mxu1 }
 0x44b   :  { %6529 = vmatpush3.bf16.xpose.msra.mxu0 %v8600_v17  ;;  %v1321_v51 = vsel %vm1241_vm10, %v6453_v4, %v1305_v8  ;;  %v1336_v33 = vmul.f32 1.050701, %v1320_v62  ;;  %v1272_v38 = vmul.f32 1.442695, %v8659_v35  ;;  %v1334_v56 = vmul.f32 1.050701, %v1318_v22 }
 0x44c   :  { %6530 = vmatprep.subr.bf16.mxu0 %v8611_v31  ;;  %v1337_v37 = vmul.f32 1.050701, %v1321_v51  ;;  %v1319_v44 = vsel %vm1239_vm11, %v1202_v34, %v1303_v25  ;;  %7336 = vpow2.f32 %v1270_v28  ;;  %vm1242_vm14 = vcmp.gt.f32.partialorder %v8652_v7, 0.0 }
 0x44d   :  { %v1335_v19 = vmul.f32 1.050701, %v1319_v44  ;;  %7338 = vpow2.f32 %v1276_v11  ;;  %vm1245_vm15 = vcmp.gt.f32.partialorder %v8654_v15, 0.0  ;;  %vm1243_vm0 = vcmp.gt.f32.partialorder %v8659_v35, 0.0 }
 0x44e   :  { %v1347_v4 = vpack.c.bf16 %v1337_v37, %v1336_v33  ;;  %7340 = vpow2.f32 %v1272_v38 }
 0x44f   :  { %v6508_v17 = vpop.f32.mrb[48].mxu1  ;;  %v1346_v39 = vpack.c.bf16 %v1335_v19, %v1334_v56 }
 0x450   :  { %v8663_v55 = vmul.f32 0.088388346, %v6508_v17  ;;  %v1577_v29 = vpop.f32.mrb[49].mxu1 }
 0x451   :  { %v8665_v50 = vmul.f32 0.088388346, %v1577_v29  ;;  %v6509_v6 = vpop.f32.mrb[50].mxu1  ;;  %6482 = vmatprep.mubr.bf16.mxu0 %v1346_v39 }
 0x452   :  { %v1580_v40 = vpop.f32.mrb[51].mxu1  ;;  %v1808_v34 = vsel %vm1801_vm12, %v8663_v55, -inf  ;;  %v8669_v13 = vmul.f32 0.088388346, %v6509_v6  ;;  %6483 = vmatmul.mubr.bf16.gmra.mrb[56].mxu0 %v1347_v4 }
 0x453   :  { %v8671_v45 = vmul.f32 0.088388346, %v1580_v40  ;;  %1809 = vmax.xlane.f32.xlu1 %v1808_v34  ;;  %v1802_v47 = vsel %vm1801_vm12, %v8665_v50, -inf  ;;  %6531 = vmatpush3.bf16.xpose.msra.mxu0 %v8611_v31 }
 0x454   :  { %v7335_v23 = vpop.eup %7334  ;;  %1803 = vmax.xlane.f32.xlu0 %v1802_v47  ;;  %6532 = vmatprep.subr.bf16.mxu0 %v8617_v52  ;;  %v1811_v62 = vsel %vm1801_vm12, %v8669_v13, -inf }
 0x455   :  { %v5807_v54 = vadd.f32 -1.0, %v7335_v23  ;;  %v1805_v59 = vsel %vm1801_vm12, %v8671_v45, -inf }
 0x456   :  { %v7337_v8 = vpop.eup %7336 }
 0x457   :  { %v1308_v63 = vmul.f32 1.6732632, %v5807_v54  ;;  %1806 = vmax.xlane.f32.xlu1 %v1805_v59  ;;  %v6512_v3 = vpop.f32.mrb[52].mxu1  ;;  %v7339_v51 = vpop.eup %7338  ;;  %v5805_v31 = vadd.f32 -1.0, %v7337_v8 }
 0x458   :  { %v8681_v22 = vmul.f32 0.088388346, %v6512_v3  ;;  %1812 = vmax.xlane.f32.xlu0 %v1811_v62  ;;  %v1593_v25 = vpop.f32.mrb[53].mxu1  ;;  %v7341_v11 = vpop.eup %7340  ;;  %v5808_v37 = vadd.f32 -1.0, %v7339_v51 }
 0x459   :  { %v6513_v28 = vpop.f32.mrb[54].mxu1  ;;  %v1324_v33 = vsel %vm1244_vm13, %v8649_v49, %v1308_v63  ;;  %v1306_v56 = vmul.f32 1.6732632, %v5805_v31  ;;  %v5806_v19 = vadd.f32 -1.0, %v7341_v11  ;;  %v8687_v17 = vmul.f32 0.088388346, %v1593_v25 }
 0x45a   :  { %v8685_v44 = vmul.f32 0.088388346, %v6513_v28  ;;  %v1596_v38 = vpop.f32.mrb[55].mxu1  ;;  %v1820_v4 = vsel %vm1801_vm12, %v8681_v22, -inf  ;;  %v1309_v29 = vmul.f32 1.6732632, %v5808_v37 }
 0x45b   :  { %v8692_v39 = vmul.f32 0.088388346, %v1596_v38  ;;  %6533 = vmatpush3.bf16.xpose.msra.mxu0 %v8617_v52  ;;  %1821 = vmax.xlane.f32.xlu1 %v1820_v4  ;;  %v1322_v6 = vsel %vm1242_vm14, %v8652_v7, %v1306_v56  ;;  %v1307_v40 = vmul.f32 1.6732632, %v5806_v19  ;;  %v1340_v34 = vmul.f32 1.050701, %v1324_v33 }
 0x45c   :  { %v1823_v49 = vsel %vm1801_vm12, %v8685_v44, -inf  ;;  %6534 = vmatprep.subr.bf16.mxu0 %v8622_v1  ;;  %v1325_v47 = vsel %vm1245_vm15, %v8654_v15, %v1309_v29  ;;  %v1338_v23 = vmul.f32 1.050701, %v1322_v6  ;;  %v1814_v59 = vsel %vm1801_vm12, %v8687_v17, -inf }
 0x45d   :  { %1824 = vmax.xlane.f32.xlu0 %v1823_v49  ;;  %v1341_v54 = vmul.f32 1.050701, %v1325_v47  ;;  %v1323_v52 = vsel %vm1243_vm0, %v8659_v35, %v1307_v40  ;;  %v1817_v8 = vsel %vm1801_vm12, %v8692_v39, -inf }
 0x45e   :  { %v1339_v7 = vmul.f32 1.050701, %v1323_v52 }
 0x45f   :  { %v6516_v63 = vpop.f32.mrb[56].mxu1  ;;  %1815 = vmax.xlane.f32.xlu1 %v1814_v59  ;;  %v1349_v25 = vpack.c.bf16 %v1341_v54, %v1340_v34 }
 0x460   :  { %v8705_v3 = vmul.f32 0.088388346, %v6516_v63  ;;  %v1609_v62 = vpop.f32.mrb[57].mxu1  ;;  %v1348_v51 = vpack.c.bf16 %v1339_v7, %v1338_v23 }
 0x461   :  { %1818 = vmax.xlane.f32.xlu0 %v1817_v8  ;;  %v6517_v15 = vpop.f32.mrb[58].mxu1  ;;  %v8716_v33 = vmul.f32 0.088388346, %v1609_v62  ;;  %v619_v8 = vld [vmem:[%s10304_s9 + $0x10] sm:$0xff] }
 0x462   :  { %v8709_v31 = vmul.f32 0.088388346, %v6517_v15  ;;  %v1612_v28 = vpop.f32.mrb[59].mxu1  ;;  %v1832_v35 = vsel %vm1801_vm12, %v8705_v3, -inf  ;;  %6486 = vmatprep.mubr.bf16.mxu0 %v1348_v51  ;;  %v617_v51 = vld [vmem:[%s10304_s9] sm:$0xff] }
 0x463   :  { %6535 = vmatpush3.bf16.xpose.msra.mxu0 %v8622_v1  ;;  %v8719_v37 = vmul.f32 0.088388346, %v1612_v28  ;;  %1833 = vmax.xlane.f32.xlu1 %v1832_v35  ;;  %v1826_v1 = vsel %vm1801_vm12, %v8716_v33, -inf }
 0x464   :  { %v1835_v11 = vsel %vm1801_vm12, %v8709_v31, -inf  ;;  %6487 = vmatmul.mubr.bf16.gmra.mrb[60].mxu0 %v1349_v25  ;;  %6536 = vmatprep.subr.bf16.mxu0 %v8627_v24 }
 0x465   :  { %6538 = vmatprep.mubr.bf16.mxu0 %v8561_v32  ;;  %1836 = vmax.xlane.f32.xlu0 %v1835_v11  ;;  %v1829_v29 = vsel %vm1801_vm12, %v8719_v37, -inf }
 0x467   :  { %v8722_v38 = vpop.f32.mrb[60].mxu1  ;;  %1827 = vmax.xlane.f32.xlu1 %v1826_v1 }
 0x468   :  { %v1625_v56 = vpop.f32.mrb[61].mxu1 }
 0x469   :  { %v8726_v19 = vmul.f32 0.088388346, %v1625_v56  ;;  %v8728_v4 = vpop.f32.mrb[62].mxu1  ;;  %1830 = vmax.xlane.f32.xlu0 %v1829_v29 }
 0x46a   :  { %v1628_v49 = vpop.f32.mrb[63].mxu1 }
 0x46b   :  { %v8732_v6 = vmul.f32 0.088388346, %v1628_v49  ;;  %v1838_v32 = vsel %vm1801_vm12, %v8726_v19, -inf  ;;  %6537 = vmatpush3.bf16.xpose.msra.mxu0 %v8627_v24  ;;  %v620_v49 = vld [vmem:[%s10304_s9 + $0x18] sm:$0xff] }
 0x46c   :  { %1839 = vmax.xlane.f32.xlu1 %v1838_v32 }
 0x46d   :  { %v1841_v40 = vsel %vm1801_vm12, %v8732_v6, -inf }
 0x46e   :  { %1842 = vmax.xlane.f32.xlu0 %v1841_v40 }
 0x472   :  { %6539 = vmatmul.mubr.bf16.vlgmr.msra.gmra.mrb[64].mxu0 %v8567_v43 }
 0x473   :  { %6542 = vmatprep.mubr.bf16.mxu0 %v8582_v57 }
 0x47a   :  { %6543 = vmatmul.mubr.bf16.gmra.mrb[68].mxu0 %v8593_v10 }
 0x47b   :  { %6546 = vmatprep.mubr.bf16.mxu0 %v8606_v27 }
 0x482   :  { %6547 = vmatmul.mubr.bf16.gmra.mrb[72].mxu0 %v8614_v42 }
 0x483   :  { %6550 = vmatprep.mubr.bf16.mxu0 %v8620_v60 }
 0x48a   :  { %6551 = vmatmul.mubr.bf16.gmra.mrb[76].mxu0 %v8625_v14 }
 0x505   :  { %v8746_v24 = vpop.f32.mrb[48].mxu0 }
 0x506   :  { %v8748_v34 = vpop.f32.mrb[49].mxu0 }
 0x507   :  { %v8750_v47 = vpop.f32.mrb[50].mxu0 }
 0x508   :  { %10290 = vst [vmem:[#allocation47_spill] sm:$0xff] %v8750_v47  ;;  %v8752_v23 = vpop.f32.mrb[51].mxu0 }
 0x509   :  { %10291 = vst [vmem:[#allocation48_spill] sm:$0xff] %v8752_v23 }
 0x517   :  { %v8754_v43 = vpop.f32.mrb[52].mxu0 }
 0x518   :  { %10292 = vst [vmem:[#allocation49_spill] sm:$0xff] %v8754_v43  ;;  %v8756_v57 = vpop.f32.mrb[53].mxu0 }
 0x519   :  { %10293 = vst [vmem:[#allocation50_spill] sm:$0xff] %v8756_v57  ;;  %v8758_v10 = vpop.f32.mrb[54].mxu0 }
 0x51a   :  { %10294 = vst [vmem:[#allocation51_spill] sm:$0xff] %v8758_v10  ;;  %v8760_v27 = vpop.f32.mrb[55].mxu0 }
 0x51b   :  { %10295 = vst [vmem:[#allocation52_spill] sm:$0xff] %v8760_v27 }
 0x525   :  { %v8762_v42 = vpop.f32.mrb[56].mxu0 }
 0x526   :  { %10296 = vst [vmem:[#allocation53_spill] sm:$0xff] %v8762_v42  ;;  %v8764_v60 = vpop.f32.mrb[57].mxu0 }
 0x527   :  { %10297 = vst [vmem:[#allocation54_spill] sm:$0xff] %v8764_v60  ;;  %v8766_v14 = vpop.f32.mrb[58].mxu0 }
 0x528   :  { %10298 = vst [vmem:[#allocation55_spill] sm:$0xff] %v8766_v14  ;;  %v8768_v54 = vpop.f32.mrb[59].mxu0 }
 0x529   :  { %10299 = vst [vmem:[#allocation56_spill] sm:$0xff] %v8768_v54 }
 0x537   :  { %v8770_v52 = vpop.f32.mrb[60].mxu0 }
 0x538   :  { %10300 = vst [vmem:[#allocation57_spill] sm:$0xff] %v8770_v52  ;;  %v8772_v59 = vpop.f32.mrb[61].mxu0 }
 0x539   :  { %10301 = vst [vmem:[#allocation58_spill] sm:$0xff] %v8772_v59  ;;  %v8774_v63 = vpop.f32.mrb[62].mxu0 }
 0x53a   :  { %10302 = vst [vmem:[#allocation59_spill] sm:$0xff] %v8774_v63  ;;  %v8776_v7 = vpop.f32.mrb[63].mxu0 }
 0x53b   :  { %10303 = vst [vmem:[#allocation60_spill] sm:$0xff] %v8776_v7 }
 0x545   :  { %v6540_v62 = vpop.f32.mrb[64].mxu0 }
 0x546   :  { %v1763_v15 = vmul.f32 0.088388346, %v6540_v62  ;;  %v1698_v25 = vpop.f32.mrb[65].mxu0 }
 0x547   :  { %v1761_v28 = vmul.f32 0.088388346, %v1698_v25  ;;  %v6541_v35 = vpop.f32.mrb[66].mxu0 }
 0x548   :  { %v1701_v11 = vpop.f32.mrb[67].mxu0  ;;  %v8784_v56 = vadd.f32 %v1763_v15, %v619_v8  ;;  %v1764_v1 = vmul.f32 0.088388346, %v6541_v35  ;;  %v623_v8 = vld [vmem:[%s10304_s9 + $0x30] sm:$0xff] }
 0x549   :  { %v8786_v29 = vadd.f32 %v1761_v28, %v617_v51  ;;  %v1762_v32 = vmul.f32 0.088388346, %v1701_v11  ;;  %v618_v51 = vld [vmem:[%s10304_s9 + $0x8] sm:$0xff] }
 0x54a   :  { %1854 = vmax.xlane.f32.xlu1 %v8784_v56  ;;  %v8793_v62 = vadd.f32 %v1764_v1, %v620_v49  ;;  %v621_v49 = vld [vmem:[%s10304_s9 + $0x20] sm:$0xff] }
 0x54b   :  { %1850 = vmax.xlane.f32.xlu0 %v8786_v29  ;;  %v8804_v1 = vadd.f32 %v1762_v32, %v618_v51  ;;  %v627_v32 = vld [vmem:[%s10304_s9 + $0x50] sm:$0xff] }
 0x54d   :  { %v6544_v40 = vpop.f32.mrb[68].mxu0 }
 0x54e   :  { %v1767_v15 = vmul.f32 0.088388346, %v6544_v40  ;;  %v1714_v25 = vpop.f32.mrb[69].mxu0  ;;  %v624_v40 = vld [vmem:[%s10304_s9 + $0x38] sm:$0xff] }
 0x54f   :  { %1856 = vmax.xlane.f32.xlu0 %v8793_v62  ;;  %v6545_v28 = vpop.f32.mrb[70].mxu0  ;;  %v1765_v35 = vmul.f32 0.088388346, %v1714_v25 }
 0x550   :  { %v1717_v46 = vpop.f32.mrb[71].mxu0  ;;  %v8802_v0 = vadd.f32 %v1767_v15, %v623_v8  ;;  %v1768_v11 = vmul.f32 0.088388346, %v6545_v28 }
 0x551   :  { %v8814_v12 = vadd.f32 %v1765_v35, %v621_v49  ;;  %v1766_v25 = vmul.f32 0.088388346, %v1717_v46 }
 0x552   :  { %1862 = vmax.xlane.f32.xlu1 %v8802_v0  ;;  %v8816_v15 = vadd.f32 %v1768_v11, %v624_v40 }
 0x553   :  { %1852 = vmax.xlane.f32.xlu0 %v8804_v1  ;;  %v8828_v40 = vadd.f32 %v1766_v25, %v622_v20 }
 0x555   :  { %v6548_v8 = vpop.f32.mrb[72].mxu0 }
 0x556   :  { %v1771_v51 = vmul.f32 0.088388346, %v6548_v8  ;;  %1858 = vmax.xlane.f32.xlu1 %v8814_v12  ;;  %v1730_v28 = vpop.f32.mrb[73].mxu0  ;;  %v625_v8 = vld [vmem:[%s10304_s9 + $0x40] sm:$0xff] }
 0x557   :  { %1864 = vmax.xlane.f32.xlu0 %v8816_v15  ;;  %v6549_v35 = vpop.f32.mrb[74].mxu0  ;;  %v1769_v49 = vmul.f32 0.088388346, %v1730_v28 }
 0x558   :  { %v1733_v46 = vpop.f32.mrb[75].mxu0  ;;  %v8826_v9 = vadd.f32 %v1771_v51, %v627_v32  ;;  %v1772_v11 = vmul.f32 0.088388346, %v6549_v35  ;;  %v8841_v32 = vmul.f32 0.088388346, %v8722_v38  ;;  %v626_v35 = vld [vmem:[%s10304_s9 + $0x48] sm:$0xff] }
 0x559   :  { %v8838_v61 = vadd.f32 %v1769_v49, %v625_v8  ;;  %v1770_v51 = vmul.f32 0.088388346, %v1733_v46  ;;  %v8858_v46 = vmul.f32 0.088388346, %v8728_v4  ;;  %v630_v4 = vld [vmem:[%s10304_s9 + $0x68] sm:$0xff] }
 0x55a   :  { %1870 = vmax.xlane.f32.xlu1 %v8826_v9  ;;  %v8843_v25 = vadd.f32 %v1772_v11, %v628_v16  ;;  %v1844_v38 = vsel %vm1801_vm12, %v8841_v32, -inf  ;;  %v629_v16 = vld [vmem:[%s10304_s9 + $0x60] sm:$0xff] }
 0x55b   :  { %1860 = vmax.xlane.f32.xlu0 %v8828_v40  ;;  %v8852_v8 = vadd.f32 %v1770_v51, %v626_v35  ;;  %v1847_v51 = vsel %vm1801_vm12, %v8858_v46, -inf }
 0x55d   :  { %v6552_v20 = vpop.f32.mrb[76].mxu0 }
 0x55e   :  { %1866 = vmax.xlane.f32.xlu1 %v8838_v61  ;;  %v1746_v28 = vpop.f32.mrb[77].mxu0  ;;  %v1775_v11 = vmul.f32 0.088388346, %v6552_v20 }
 0x55f   :  { %1872 = vmax.xlane.f32.xlu0 %v8843_v25  ;;  %v6553_v5 = vpop.f32.mrb[78].mxu0  ;;  %v1773_v58 = vmul.f32 0.088388346, %v1746_v28 }
 0x560   :  { %v1749_v49 = vpop.f32.mrb[79].mxu0  ;;  %v8872_v35 = vadd.f32 %v1775_v11, %v631_v41  ;;  %v1776_v20 = vmul.f32 0.088388346, %v6553_v5  ;;  %v1810_v41 = vpop.xlane.xlu1 %1809 }
 0x561   :  { %v8861_v2 = vadd.f32 %v1773_v58, %v629_v16  ;;  %v1774_v28 = vmul.f32 0.088388346, %v1749_v49  ;;  %v632_v49 = vld [vmem:[%s10304_s9 + $0x78] sm:$0xff]  ;;  %v8884_v16 = vld [vmem:[#allocation10] sm:$0xff]   ;;  %v1804_v5 = vpop.xlane.xlu0 %1803 }
 0x562   :  { %1845 = vmax.xlane.f32.xlu1 %v1844_v38  ;;  %v8881_v38 = vadd.f32 %v1776_v20, %v632_v49  ;;  %6586 = vmatprep.subr.bf16.mxu1 %v8884_v16 }
 0x563   :  { %1868 = vmax.xlane.f32.xlu0 %v8852_v8  ;;  %v8874_v58 = vadd.f32 %v1774_v28, %v630_v4 }
 0x564   :  { %v1807_v11 = vpop.xlane.xlu1 %1806 }
 0x565   :  { %v1813_v28 = vpop.xlane.xlu0 %1812 }
 0x566   :  { %1874 = vmax.xlane.f32.xlu1 %v8861_v2 }
 0x567   :  { %1848 = vmax.xlane.f32.xlu0 %v1847_v51 }
 0x568   :  { %v1822_v51 = vpop.xlane.xlu1 %1821 }
 0x569   :  { %v1825_v4 = vpop.xlane.xlu0 %1824 }
 0x56a   :  { %1878 = vmax.xlane.f32.xlu1 %v8872_v35 }
 0x56b   :  { %1876 = vmax.xlane.f32.xlu0 %v8874_v58 }
 0x56c   :  { %v1816_v53 = vpop.xlane.xlu1 %1815 }
 0x56d   :  { %v1819_v36 = vpop.xlane.xlu0 %1818 }
 0x56f   :  { %1880 = vmax.xlane.f32.xlu0 %v8881_v38 }
 0x570   :  { %v8887_v48 = vpop.xlane.xlu1 %1833 }
 0x571   :  { %v1837_v21 = vpop.xlane.xlu0 %1836 }
 0x574   :  { %v1828_v30 = vpop.xlane.xlu1 %1827 }
 0x575   :  { %v8889_v20 = vpop.xlane.xlu0 %1830 }
 0x578   :  { %v8891_v49 = vpop.xlane.xlu1 %1839 }
 0x579   :  { %v8893_v18 = vpop.xlane.xlu0 %1842 }
 0x5d7   :  { %v1855_v26 = vpop.xlane.xlu1 %1854 }
 0x5d8   :  { %v1884_v7 = vmax.f32 %v1810_v41, %v1855_v26  ;;  %v1851_v63 = vpop.xlane.xlu0 %1850 }
 0x5d9   :  { %v1882_v59 = vmax.f32 %v1804_v5, %v1851_v63 }
 0x5da   :  { %v1900_v52 = vsub.f32 %v8663_v55, %v1884_v7  ;;  %v1948_v57 = vsub.f32 %v8784_v56, %v1884_v7 }
 0x5db   :  { %v1946_v54 = vsub.f32 %v8786_v29, %v1882_v59  ;;  %v1898_v10 = vsub.f32 %v8665_v50, %v1882_v59 }
 0x5dc   :  { %v1857_v14 = vpop.xlane.xlu0 %1856  ;;  %v1918_v27 = vmul.f32 1.442695, %v1900_v52  ;;  %v1966_v29 = vmul.f32 1.442695, %v1948_v57 }
 0x5dd   :  { %v1962_v60 = vmul.f32 1.442695, %v1946_v54  ;;  %v1885_v42 = vmax.f32 %v1813_v28, %v1857_v14  ;;  %v1914_v63 = vmul.f32 1.442695, %v1898_v10 }
 0x5df   :  { %v1863_v43 = vpop.xlane.xlu1 %1862  ;;  %v1949_v23 = vsub.f32 %v8793_v62, %v1885_v42  ;;  %7342 = vpow2.f32 %v1962_v60  ;;  %v1901_v55 = vsub.f32 %v8669_v13, %v1885_v42 }
 0x5e0   :  { %v1853_v47 = vpop.xlane.xlu0 %1852  ;;  %v1888_v26 = vmax.f32 %v1822_v51, %v1863_v43  ;;  %7344 = vpow2.f32 %v1918_v27 }
 0x5e1   :  { %v1883_v41 = vmax.f32 %v1807_v11, %v1853_v47  ;;  %v1968_v52 = vmul.f32 1.442695, %v1949_v23  ;;  %7346 = vpow2.f32 %v1914_v63  ;;  %v1920_v62 = vmul.f32 1.442695, %v1901_v55 }
 0x5e2   :  { %v1904_v59 = vsub.f32 %v8681_v22, %v1888_v26  ;;  %7348 = vpow2.f32 %v1966_v29  ;;  %v1952_v22 = vsub.f32 %v8802_v0, %v1888_v26 }
 0x5e3   :  { %v1947_v54 = vsub.f32 %v8804_v1, %v1883_v41  ;;  %v1859_v14 = vpop.xlane.xlu1 %1858  ;;  %v1899_v43 = vsub.f32 %v8671_v45, %v1883_v41  ;;  %7350 = vpow2.f32 %v1968_v52 }
 0x5e4   :  { %v1886_v5 = vmax.f32 %v1816_v53, %v1859_v14  ;;  %v1865_v50 = vpop.xlane.xlu0 %1864  ;;  %v1926_v27 = vmul.f32 1.442695, %v1904_v59  ;;  %v1974_v0 = vmul.f32 1.442695, %v1952_v22 }
 0x5e5   :  { %v1964_v7 = vmul.f32 1.442695, %v1947_v54  ;;  %v1889_v56 = vmax.f32 %v1825_v4, %v1865_v50  ;;  %v1916_v23 = vmul.f32 1.442695, %v1899_v43 }
 0x5e6   :  { %v1950_v47 = vsub.f32 %v8814_v12, %v1886_v5 }
 0x5e7   :  { %v1871_v10 = vpop.xlane.xlu1 %1870  ;;  %v1953_v13 = vsub.f32 %v8816_v15, %v1889_v56  ;;  %7352 = vpow2.f32 %v1964_v7 }
 0x5e8   :  { %v1861_v57 = vpop.xlane.xlu0 %1860  ;;  %7354 = vpow2.f32 %v1920_v62  ;;  %v1970_v60 = vmul.f32 1.442695, %v1950_v47  ;;  %v8919_v26 = vmax.f32 %v8887_v48, %v1871_v10  ;;  %v1905_v48 = vsub.f32 %v8685_v44, %v1889_v56 }
 0x5e9   :  { %v8906_v53 = vmax.f32 %v1819_v36, %v1861_v57  ;;  %v7343_v42 = vpop.eup %7342  ;;  %v1976_v11 = vmul.f32 1.442695, %v1953_v13  ;;  %7356 = vpow2.f32 %v1926_v27  ;;  %v1902_v36 = vsub.f32 %v8687_v17, %v1886_v5 }
 0x5ea   :  { %v8911_v12 = vpop.eup %7344  ;;  %2042 = vadd.xlane.f32.xlu1 %v7343_v42  ;;  %7358 = vpow2.f32 %v1916_v23 }
 0x5eb   :  { %v1951_v45 = vsub.f32 %v8828_v40, %v8906_v53  ;;  %v1867_v1 = vpop.xlane.xlu1 %1866  ;;  %7360 = vpow2.f32 %v1970_v60  ;;  %v2000_v41 = vsel %vm1801_vm12, %v8911_v12, 0.0  ;;  %v8927_v17 = vpop.eup %7346  ;;  %v1922_v29 = vmul.f32 1.442695, %v1902_v36 }
 0x5ec   :  { %v8913_v15 = vmax.f32 %v1828_v30, %v1867_v1  ;;  %v1873_v28 = vpop.xlane.xlu0 %1872  ;;  %7362 = vpow2.f32 %v1976_v11  ;;  %v7349_v55 = vpop.eup %7348  ;;  %v1994_v59 = vsel %vm1801_vm12, %v8927_v17, 0.0 }
 0x5ed   :  { %v1972_v51 = vmul.f32 1.442695, %v1951_v45  ;;  %v8916_v4 = vmax.f32 %v1837_v21, %v1873_v28  ;;  %v8933_v54 = vpop.eup %7350  ;;  %v1908_v45 = vsub.f32 %v8705_v3, %v8919_v26 }
 0x5ee   :  { %v1954_v40 = vsub.f32 %v8838_v61, %v8913_v15  ;;  %2001 = vadd.xlane.f32.xlu1 %v2000_v41  ;;  %v2099_v47 = vpack.c.bf16 %v8933_v54, %v7349_v55 }
 0x5ef   :  { %v1957_v30 = vsub.f32 %v8843_v25, %v8916_v4  ;;  %v1846_v63 = vpop.xlane.xlu1 %1845  ;;  %7364 = vpow2.f32 %v1972_v51  ;;  %v1956_v25 = vsub.f32 %v8826_v9, %v8919_v26  ;;  %v1928_v9 = vmul.f32 1.442695, %v1905_v48 }
 0x5f0   :  { %v1869_v21 = vpop.xlane.xlu0 %1868  ;;  %7366 = vpow2.f32 %v1974_v0  ;;  %v1978_v14 = vmul.f32 1.442695, %v1954_v40 }
 0x5f1   :  { %v8931_v61 = vmax.f32 %v8889_v20, %v1869_v21  ;;  %v7353_v52 = vpop.eup %7352  ;;  %v1984_v5 = vmul.f32 1.442695, %v1957_v30  ;;  %7368 = vpow2.f32 %v1922_v29  ;;  %v1982_v10 = vmul.f32 1.442695, %v1956_v25 }
 0x5f2   :  { %v8941_v7 = vpop.eup %7354  ;;  %1995 = vadd.xlane.f32.xlu1 %v1994_v59  ;;  %2044 = vadd.xlane.f32.xlu0 %v7353_v52  ;;  %v2098_v56 = vpack.c.bf16 %v7353_v52, %v7343_v42  ;;  %7370 = vpow2.f32 %v1978_v14  ;;  %v1934_v30 = vmul.f32 1.442695, %v1908_v45  ;;  %v1909_v25 = vsub.f32 %v8709_v31, %v8916_v4 }
 0x5f3   :  { %v1955_v50 = vsub.f32 %v8852_v8, %v8931_v61  ;;  %v1875_v44 = vpop.xlane.xlu1 %1874  ;;  %v1903_v8 = vsub.f32 %v8692_v39, %v8906_v53  ;;  %v8949_v13 = vpop.eup %7356  ;;  %7372 = vpow2.f32 %v1984_v5  ;;  %v1907_v59 = vsub.f32 %v8719_v37, %v8931_v61 }
 0x5f4   :  { %v8944_v20 = vmax.f32 %v8891_v49, %v1875_v44  ;;  %v1849_v62 = vpop.xlane.xlu0 %1848  ;;  %6570 = vmatprep.mubr.bf16.mxu1 %v2098_v56  ;;  %v2003_v49 = vsel %vm1801_vm12, %v8941_v7, 0.0  ;;  %v8953_v27 = vpop.eup %7358  ;;  %v2012_v21 = vsel %vm1801_vm12, %v8949_v13, 0.0 }
 0x5f5   :  { %v1980_v43 = vmul.f32 1.442695, %v1955_v50  ;;  %6571 = vmatmul.mubr.bf16.vlgmr.msra.gmra.mrb[64].mxu1 %v2099_v47  ;;  %v7361_v53 = vpop.eup %7360  ;;  %v1924_v1 = vmul.f32 1.442695, %v1903_v8  ;;  %v1936_v50 = vmul.f32 1.442695, %v1909_v25 }
 0x5f6   :  { %v1958_v22 = vsub.f32 %v8861_v2, %v8944_v20  ;;  %2046 = vadd.xlane.f32.xlu1 %v7349_v55  ;;  %2004 = vadd.xlane.f32.xlu0 %v2003_v49  ;;  %v8963_v60 = vpop.eup %7362  ;;  %v1932_v56 = vmul.f32 1.442695, %v1907_v59  ;;  %v1910_v8 = vsub.f32 %v8726_v19, %v8944_v20 }
 0x5f7   :  { %v1879_v57 = vpop.xlane.xlu1 %1878  ;;  %7374 = vpow2.f32 %v1980_v43  ;;  %6587 = vmatpush3.bf16.msra.mxu1 %v8884_v16 }
 0x5f8   :  { %v8957_v23 = vmax.f32 %v1846_v63, %v1879_v57  ;;  %v1877_v39 = vpop.xlane.xlu0 %1876  ;;  %7376 = vpow2.f32 %v1928_v9  ;;  %v1986_v51 = vmul.f32 1.442695, %v1958_v22 }
 0x5f9   :  { %v8960_v42 = vmax.f32 %v8893_v18, %v1877_v39  ;;  %7378 = vpow2.f32 %v1982_v10  ;;  %v7365_v2 = vpop.eup %7364  ;;  %v1997_v18 = vsel %vm1801_vm12, %v8953_v27, 0.0 }
 0x5fa   :  { %v1960_v11 = vsub.f32 %v8872_v35, %v8957_v23  ;;  %v7367_v36 = vpop.eup %7366  ;;  %2050 = vadd.xlane.f32.xlu1 %v7361_v53  ;;  %1998 = vadd.xlane.f32.xlu0 %v1997_v18  ;;  %v2100_v16 = vpack.c.bf16 %v7365_v2, %v7361_v53  ;;  %7380 = vpow2.f32 %v1924_v1  ;;  %v1906_v35 = vsub.f32 %v8716_v33, %v8913_v15 }
 0x5fb   :  { %v1959_v28 = vsub.f32 %v8874_v58, %v8960_v42  ;;  %v2101_v26 = vpack.c.bf16 %v8963_v60, %v7367_v36  ;;  %v8978_v58 = vpop.eup %7368  ;;  %7382 = vpow2.f32 %v1986_v51  ;;  %v1911_v19 = vsub.f32 %v8732_v6, %v8960_v42 }
 0x5fc   :  { %v1881_v0 = vpop.xlane.xlu0 %1880  ;;  %6574 = vmatprep.mubr.bf16.mxu1 %v2100_v16  ;;  %v1990_v41 = vmul.f32 1.442695, %v1960_v11  ;;  %v7371_v55 = vpop.eup %7370  ;;  %v1930_v48 = vmul.f32 1.442695, %v1906_v35  ;;  %v2006_v14 = vsel %vm1801_vm12, %v8978_v58, 0.0  ;;  %v7157_v35 = vld [vmem:[#allocation5 + $0x8] sm:$0xff]  }
 0x5fd   :  { %v1988_v40 = vmul.f32 1.442695, %v1959_v28  ;;  %v8973_v3 = vmax.f32 %v1849_v62, %v1881_v0  ;;  %6575 = vmatmul.mubr.bf16.gmra.mrb[68].mxu1 %v2101_v26  ;;  %v8985_v29 = vpop.eup %7372  ;;  %v1912_v62 = vsub.f32 %v8841_v32, %v8957_v23  ;;  %v2090_v32 = vpack.c.bf16 %v8953_v27, %v8927_v17 }
 0x5fe   :  { %2013 = vadd.xlane.f32.xlu1 %v2012_v21  ;;  %2048 = vadd.xlane.f32.xlu0 %v8933_v54  ;;  %v1938_v23 = vmul.f32 1.442695, %v1910_v8  ;;  %v2091_v17 = vpack.c.bf16 %v8941_v7, %v8911_v12  ;;  %v1940_v27 = vmul.f32 1.442695, %v1911_v19  ;;  %v10305_v26 = vmov 0   ;;  %v7161_v21 = vld [vmem:[#allocation5 + $0x28] sm:$0xff]  }
 0x5ff   :  { %v1961_v63 = vsub.f32 %v8881_v38, %v8973_v3  ;;  %7384 = vpow2.f32 %v1988_v40  ;;  %v1942_v49 = vmul.f32 1.442695, %v1912_v62  ;;  %v1913_v53 = vsub.f32 %v8858_v46, %v8973_v3 }
 0x600   :  { %7386 = vpow2.f32 %v1934_v30  ;;  %v7156_v30 = vld [vmem:[#allocation5] sm:$0xff]  }
 0x601   :  { %v1992_v33 = vmul.f32 1.442695, %v1961_v63  ;;  %v7375_v15 = vpop.eup %7374  ;;  %7388 = vpow2.f32 %v1990_v41  ;;  %6604 = vmatprep.subr.bf16.mxu0 %v7156_v30  ;;  %v7159_v41 = vld [vmem:[#allocation5 + $0x18] sm:$0xff]   ;;  %v7160_v63 = vld [vmem:[#allocation5 + $0x20] sm:$0xff]  }
 0x602   :  { %v8989_v38 = vpop.eup %7376  ;;  %v2102_v52 = vpack.c.bf16 %v7375_v15, %v7371_v55  ;;  %2007 = vadd.xlane.f32.xlu1 %v2006_v14  ;;  %2052 = vadd.xlane.f32.xlu0 %v7365_v2 }
 0x603   :  { %v7379_v5 = vpop.eup %7378  ;;  %7390 = vpow2.f32 %v1992_v33  ;;  %v2015_v31 = vsel %vm1801_vm12, %v8989_v38, 0.0  ;;  %v2093_v7 = vpack.c.bf16 %v8989_v38, %v8949_v13  ;;  %6605 = vmatpush3.bf16.msra.mxu0 %v7156_v30  ;;  %v7164_v33 = vld [vmem:[%s10196_s11] ss:$12 sps:$4 sm:$0xff]  }
 0x604   :  { %6578 = vmatprep.mubr.bf16.mxu1 %v2102_v52  ;;  %v2103_v54 = vpack.c.bf16 %v8985_v29, %v7379_v5  ;;  %7392 = vpow2.f32 %v1930_v48  ;;  %v7381_v4 = vpop.eup %7380  ;;  %6606 = vmatprep.subr.bf16.mxu0 %v7157_v35  ;;  %v9042_v48 = vld [vmem:[%s10196_s11 + $0x8] ss:$12 sps:$4 sm:$0xff]  }
 0x605   :  { %v7383_v44 = vpop.eup %7382  ;;  %7394 = vpow2.f32 %v1936_v50  ;;  %v2009_v43 = vsel %vm1801_vm12, %v7381_v4, 0.0  ;;  %v2092_v46 = vpack.c.bf16 %v7381_v4, %v8978_v58  ;;  %v7158_v58 = vld [vmem:[#allocation5 + $0x10] sm:$0xff]  }
 0x606   :  { %6579 = vmatmul.mubr.bf16.gmra.mrb[72].mxu1 %v2103_v54  ;;  %2054 = vadd.xlane.f32.xlu1 %v7367_v36  ;;  %7396 = vpow2.f32 %v1932_v56 }
 0x607   :  { %2016 = vadd.xlane.f32.xlu0 %v2015_v31  ;;  %7398 = vpow2.f32 %v1942_v49  ;;  %6607 = vmatpush3.bf16.msra.mxu0 %v7157_v35 }
 0x608   :  { %7400 = vpow2.f32 %v1938_v23  ;;  %6608 = vmatprep.subr.bf16.mxu0 %v7158_v58 }
 0x609   :  { %v7385_v9 = vpop.eup %7384 }
 0x60a   :  { %v7387_v47 = vpop.eup %7386  ;;  %2058 = vadd.xlane.f32.xlu1 %v7371_v55  ;;  %v2104_v37 = vpack.c.bf16 %v7385_v9, %v7383_v44  ;;  %v7162_v55 = vld [vmem:[#allocation5 + $0x30] sm:$0xff]  }
 0x60b   :  { %2010 = vadd.xlane.f32.xlu0 %v2009_v43  ;;  %v7389_v61 = vpop.eup %7388  ;;  %v2024_v57 = vsel %vm1801_vm12, %v7387_v47, 0.0  ;;  %6609 = vmatpush3.bf16.msra.mxu0 %v7158_v58 }
 0x60c   :  { %6582 = vmatprep.mubr.bf16.mxu1 %v2104_v37  ;;  %6610 = vmatprep.subr.bf16.mxu0 %v7159_v41 }
 0x60d   :  { %v7391_v10 = vpop.eup %7390 }
 0x60e   :  { %v2105_v22 = vpack.c.bf16 %v7391_v10, %v7389_v61  ;;  %v7393_v39 = vpop.eup %7392  ;;  %2025 = vadd.xlane.f32.xlu1 %v2024_v57 }
 0x60f   :  { %2056 = vadd.xlane.f32.xlu0 %v8963_v60  ;;  %v2018_v20 = vsel %vm1801_vm12, %v7393_v39, 0.0  ;;  %v7395_v45 = vpop.eup %7394  ;;  %v1944_v60 = vmul.f32 1.442695, %v1913_v53  ;;  %6611 = vmatpush3.bf16.msra.mxu0 %v7159_v41 }
 0x610   :  { %6583 = vmatmul.mubr.bf16.gmra.mrb[76].mxu1 %v2105_v22  ;;  %v2027_v1 = vsel %vm1801_vm12, %v7395_v45, 0.0  ;;  %v7397_v2 = vpop.eup %7396  ;;  %v2095_v0 = vpack.c.bf16 %v7395_v45, %v7387_v47  ;;  %6612 = vmatprep.subr.bf16.mxu0 %v7160_v63 }
 0x611   :  { %6588 = vmatprep.mubr.msk.bf16.mxu1 %vm1801_vm12, %v2090_v32  ;;  %7402 = vpow2.f32 %v1944_v60  ;;  %v2021_v6 = vsel %vm1801_vm12, %v7397_v2, 0.0  ;;  %v7399_v42 = vpop.eup %7398  ;;  %v2094_v28 = vpack.c.bf16 %v7397_v2, %v7393_v39 }
 0x612   :  { %2019 = vadd.xlane.f32.xlu1 %v2018_v20  ;;  %7404 = vpow2.f32 %v1940_v27  ;;  %v2036_v12 = vsel %vm1801_vm12, %v7399_v42, 0.0  ;;  %v7401_v11 = vpop.eup %7400 }
 0x613   :  { %2060 = vadd.xlane.f32.xlu0 %v7375_v15  ;;  %v2030_v18 = vsel %vm1801_vm12, %v7401_v11, 0.0  ;;  %6613 = vmatpush3.bf16.msra.mxu0 %v7160_v63  ;;  %v7166_v15 = vld [vmem:[%s10196_s11 + $0x4] ss:$12 sps:$4 sm:$0xff]  }
 0x614   :  { %6614 = vmatprep.subr.bf16.mxu0 %v7161_v21  ;;  %2893 = vmatprep.subr.bf16.mxu1 %v7166_v15 }
 0x616   :  { %2062 = vadd.xlane.f32.xlu1 %v7379_v5 }
 0x617   :  { %2028 = vadd.xlane.f32.xlu0 %v2027_v1  ;;  %6615 = vmatpush3.bf16.msra.mxu0 %v7161_v21 }
 0x618   :  { %6589 = vmatmul.mubr.msk.bf16.vlgmr.msra.gmra.mrb[64].mxu1 %vm1801_vm12, %v2091_v17  ;;  %6616 = vmatprep.subr.bf16.mxu0 %v7162_v55 }
 0x619   :  { %6592 = vmatprep.mubr.msk.bf16.mxu1 %vm1801_vm12, %v2092_v46  ;;  %2894 = vmatpush1.bf16.msra.mxu1 %v7164_v33  ;;  %v10307_v33 = vld [vmem:[#allocation48_spill] sm:$0xff] }
 0x61a   :  { %2066 = vadd.xlane.f32.xlu1 %v7383_v44 }
 0x61b   :  { %2022 = vadd.xlane.f32.xlu0 %v2021_v6  ;;  %v7403_v36 = vpop.eup %7402  ;;  %6617 = vmatpush3.bf16.msra.mxu0 %v7162_v55  ;;  %v10306_v55 = vld [vmem:[#allocation47_spill] sm:$0xff] }
 0x61c   :  { %v7405_v51 = vpop.eup %7404  ;;  %v2039_v16 = vsel %vm1801_vm12, %v7403_v36, 0.0  ;;  %v2097_v3 = vpack.c.bf16 %v7403_v36, %v7399_v42 }
 0x61d   :  { %v2096_v13 = vpack.c.bf16 %v7405_v51, %v7401_v11  ;;  %v2033_v40 = vsel %vm1801_vm12, %v7405_v51, 0.0 }
 0x61e   :  { %2037 = vadd.xlane.f32.xlu1 %v2036_v12 }
 0x61f   :  { %2064 = vadd.xlane.f32.xlu0 %v8985_v29  ;;  %v7163_v29 = vld [vmem:[#allocation5 + $0x38] sm:$0xff]  }
 0x620   :  { %6593 = vmatmul.mubr.msk.bf16.gmra.mrb[68].mxu1 %vm1801_vm12, %v2093_v7  ;;  %6618 = vmatprep.subr.bf16.mxu0 %v7163_v29 }
 0x621   :  { %6596 = vmatprep.mubr.msk.bf16.mxu1 %vm1801_vm12, %v2094_v28  ;;  %6619 = vmatpush3.bf16.msra.mxu0 %v7163_v29 }
 0x622   :  { %2031 = vadd.xlane.f32.xlu1 %v2030_v18  ;;  %6636 = vmatprep.subr.bf16.mxu0 %v9042_v48 }
 0x623   :  { %2068 = vadd.xlane.f32.xlu0 %v7385_v9 }
 0x626   :  { %2070 = vadd.xlane.f32.xlu1 %v7389_v61 }
 0x627   :  { %2040 = vadd.xlane.f32.xlu0 %v2039_v16 }
 0x628   :  { %6597 = vmatmul.mubr.msk.bf16.gmra.mrb[72].mxu1 %vm1801_vm12, %v2095_v0 }
 0x629   :  { %6600 = vmatprep.mubr.msk.bf16.mxu1 %vm1801_vm12, %v2096_v13 }
 0x62b   :  { %2034 = vadd.xlane.f32.xlu0 %v2033_v40 }
 0x62f   :  { %2072 = vadd.xlane.f32.xlu0 %v7391_v10 }
 0x630   :  { %6601 = vmatmul.mubr.msk.bf16.gmra.mrb[76].mxu1 %vm1801_vm12, %v2097_v3 }
 0x631   :  { %2925 = vmatprep.mubr.bf16.mxu1 %v10305_v26 }
 0x677   :  { %v2043_v25 = vpop.xlane.xlu1 %2042 }
 0x67b   :  { %v2002_v14 = vpop.xlane.xlu1 %2001 }
 0x67f   :  { %v2045_v38 = vpop.xlane.xlu0 %2044  ;;  %v1996_v5 = vpop.xlane.xlu1 %1995 }
 0x680   :  { %v2074_v23 = vadd.f32 %v2043_v25, %v1996_v5 }
 0x683   :  { %v2005_v52 = vpop.xlane.xlu0 %2004  ;;  %v2047_v50 = vpop.xlane.xlu1 %2046 }
 0x684   :  { %v2076_v32 = vadd.f32 %v2047_v50, %v2002_v14 }
 0x686   :  { %7406 = vrcp.f32 %v2076_v32  ;;  %v10311_v32 = vld [vmem:[#allocation52_spill] sm:$0xff] }
 0x687   :  { %v1999_v54 = vpop.xlane.xlu0 %1998  ;;  %v2051_v31 = vpop.xlane.xlu1 %2050  ;;  %7408 = vrcp.f32 %v2074_v23 }
 0x688   :  { %v2075_v19 = vadd.f32 %v2045_v38, %v1999_v54 }
 0x68b   :  { %v2049_v59 = vpop.xlane.xlu0 %2048  ;;  %v2014_v44 = vpop.xlane.xlu1 %2013 }
 0x68c   :  { %v2077_v53 = vadd.f32 %v2049_v59, %v2005_v52 }
 0x68e   :  { %7410 = vrcp.f32 %v2077_v53 }
 0x68f   :  { %v2053_v4 = vpop.xlane.xlu0 %2052  ;;  %v2008_v62 = vpop.xlane.xlu1 %2007  ;;  %7412 = vrcp.f32 %v2075_v19 }
 0x690   :  { %v2078_v17 = vadd.f32 %v2051_v31, %v2008_v62  ;;  %v7407_v6 = vpop.eup %7406 }
 0x691   :  { %v7409_v12 = vpop.eup %7408 }
 0x693   :  { %v2055_v43 = vpop.xlane.xlu1 %2054 }
 0x694   :  { %v2017_v56 = vpop.xlane.xlu0 %2016  ;;  %v2080_v60 = vadd.f32 %v2055_v43, %v2014_v44 }
 0x696   :  { %7414 = vrcp.f32 %v2080_v60 }
 0x697   :  { %v2059_v37 = vpop.xlane.xlu1 %2058  ;;  %7416 = vrcp.f32 %v2078_v17 }
 0x698   :  { %v2011_v9 = vpop.xlane.xlu0 %2010  ;;  %v7411_v18 = vpop.eup %7410 }
 0x699   :  { %v2079_v2 = vadd.f32 %v2053_v4, %v2011_v9  ;;  %v7413_v0 = vpop.eup %7412  ;;  %v10308_v9 = vld [vmem:[#allocation49_spill] sm:$0xff] }
 0x69b   :  { %v2026_v10 = vpop.xlane.xlu1 %2025 }
 0x69c   :  { %v2057_v47 = vpop.xlane.xlu0 %2056 }
 0x69d   :  { %v2081_v1 = vadd.f32 %v2057_v47, %v2017_v56 }
 0x69f   :  { %v2020_v49 = vpop.xlane.xlu1 %2019  ;;  %7418 = vrcp.f32 %v2081_v1 }
 0x6a0   :  { %v2061_v61 = vpop.xlane.xlu0 %2060  ;;  %7420 = vrcp.f32 %v2079_v2  ;;  %v2082_v13 = vadd.f32 %v2059_v37, %v2020_v49  ;;  %v7415_v14 = vpop.eup %7414 }
 0x6a3   :  { %v2063_v22 = vpop.xlane.xlu1 %2062 }
 0x6a4   :  { %v2029_v8 = vpop.xlane.xlu0 %2028  ;;  %v2084_v36 = vadd.f32 %v2063_v22, %v2026_v10  ;;  %v10309_v10 = vld [vmem:[#allocation50_spill] sm:$0xff]  ;;  %v10310_v22 = vld [vmem:[#allocation51_spill] sm:$0xff] }
 0x6a6   :  { %7422 = vrcp.f32 %v2084_v36  ;;  %v10314_v36 = vld [vmem:[#allocation55_spill] sm:$0xff] }
 0x6a7   :  { %v2067_v20 = vpop.xlane.xlu1 %2066  ;;  %7424 = vrcp.f32 %v2082_v13 }
 0x6a8   :  { %v2023_v57 = vpop.xlane.xlu0 %2022 }
 0x6a9   :  { %v2083_v21 = vadd.f32 %v2061_v61, %v2023_v57 }
 0x6ab   :  { %v2038_v27 = vpop.xlane.xlu1 %2037 }
 0x6ac   :  { %v2065_v39 = vpop.xlane.xlu0 %2064 }
 0x6ad   :  { %v2085_v58 = vadd.f32 %v2065_v39, %v2029_v8 }
 0x6af   :  { %v2032_v7 = vpop.xlane.xlu1 %2031  ;;  %7426 = vrcp.f32 %v2085_v58 }
 0x6b0   :  { %v9045_v45 = vpop.xlane.xlu0 %2068  ;;  %7428 = vrcp.f32 %v2083_v21  ;;  %v2086_v62 = vadd.f32 %v2067_v20, %v2032_v7 }
 0x6b3   :  { %v2071_v25 = vpop.xlane.xlu1 %2070 }
 0x6b4   :  { %v2041_v46 = vpop.xlane.xlu0 %2040  ;;  %v2088_v31 = vadd.f32 %v2071_v25, %v2038_v27 }
 0x6b6   :  { %7430 = vrcp.f32 %v2088_v31 }
 0x6b7   :  { %7432 = vrcp.f32 %v2086_v62  ;;  %v7174_v62 = vld [vmem:[%s10196_s11 + $0x34] ss:$12 sps:$4 sm:$0xff]  }
 0x6b8   :  { %v2035_v40 = vpop.xlane.xlu0 %2034 }
 0x6b9   :  { %v2087_v57 = vadd.f32 %v9045_v45, %v2035_v40 }
 0x6bc   :  { %v2073_v54 = vpop.xlane.xlu0 %2072 }
 0x6bd   :  { %v2089_v61 = vadd.f32 %v2073_v54, %v2041_v46 }
 0x6bf   :  { %7434 = vrcp.f32 %v2089_v61  ;;  %v7179_v61 = vld [vmem:[%s10196_s11 + $0x50] ss:$12 sps:$4 sm:$0xff]  }
 0x6c0   :  { %7436 = vrcp.f32 %v2087_v57  ;;  %v7186_v57 = vld [vmem:[%s10196_s11 + $0x7c] ss:$12 sps:$4 sm:$0xff]  }
 0x6eb   :  { %v6590_v42 = vpop.f32.mrb[64].mxu1 }
 0x6ec   :  { %v2348_v11 = vmul.f32 %v7407_v6, %v6590_v42  ;;  %v2267_v28 = vpop.f32.mrb[65].mxu1  ;;  %v10312_v6 = vld [vmem:[#allocation53_spill] sm:$0xff] }
 0x6ed   :  { %v2346_v51 = vmul.f32 %v7409_v12, %v2267_v28  ;;  %v6591_v16 = vpop.f32.mrb[66].mxu1 }
 0x6ee   :  { %v2364_v3 = vadd.f32 %v8746_v24, %v2348_v11  ;;  %v2349_v30 = vmul.f32 %v7411_v18, %v6591_v16  ;;  %v2270_v35 = vpop.f32.mrb[67].mxu1  ;;  %v7417_v24 = vpop.eup %7416  ;;  %v10313_v11 = vld [vmem:[#allocation54_spill] sm:$0xff]  ;;  %v10315_v16 = vld [vmem:[#allocation56_spill] sm:$0xff] }
 0x6ef   :  { %v2362_v41 = vadd.f32 %v2346_v51, %v8748_v34  ;;  %v2347_v63 = vmul.f32 %v7413_v0, %v2270_v35  ;;  %v7419_v34 = vpop.eup %7418 }
 0x6f0   :  { %v2365_v29 = vadd.f32 %v10306_v55, %v2349_v30  ;;  %v7421_v56 = vpop.eup %7420 }
 0x6f1   :  { %v2363_v15 = vadd.f32 %v2347_v63, %v10307_v33  ;;  %v7423_v19 = vpop.eup %7422  ;;  %v10316_v33 = vld [vmem:[#allocation57_spill] sm:$0xff] }
 0x6f2   :  { %v2379_v38 = vpack.c.bf16 %v2365_v29, %v2364_v3  ;;  %v7425_v17 = vpop.eup %7424 }
 0x6f3   :  { %v6594_v52 = vpop.f32.mrb[68].mxu1  ;;  %v2378_v5 = vpack.c.bf16 %v2363_v15, %v2362_v41  ;;  %v7427_v2 = vpop.eup %7426 }
 0x6f4   :  { %v2352_v50 = vmul.f32 %v7415_v14, %v6594_v52  ;;  %v2283_v59 = vpop.f32.mrb[69].mxu1  ;;  %v7429_v45 = vpop.eup %7428  ;;  %v10317_v14 = vld [vmem:[#allocation58_spill] sm:$0xff] }
 0x6f5   :  { %v2350_v4 = vmul.f32 %v7417_v24, %v2283_v59  ;;  %v6595_v44 = vpop.f32.mrb[70].mxu1  ;;  %6620 = vmatprep.mubr.bf16.mxu0 %v2378_v5  ;;  %v7431_v40 = vpop.eup %7430  ;;  %v10318_v24 = vld [vmem:[#allocation59_spill] sm:$0xff] }
 0x6f6   :  { %v2368_v43 = vadd.f32 %v10308_v9, %v2352_v50  ;;  %v2353_v47 = vmul.f32 %v7419_v34, %v6595_v44  ;;  %v2286_v37 = vpop.f32.mrb[71].mxu1  ;;  %6621 = vmatmul.mubr.bf16.vlgmr.msra.gmra.mrb[80].mxu0 %v2379_v38  ;;  %v7433_v35 = vpop.eup %7432  ;;  %v10319_v50 = vld [vmem:[#allocation60_spill] sm:$0xff]  ;;  %v7172_v9 = vld [vmem:[%s10196_s11 + $0x30] ss:$12 sps:$4 sm:$0xff]  }
 0x6f7   :  { %v2366_v8 = vadd.f32 %v2350_v4, %v10309_v10  ;;  %v2351_v49 = vmul.f32 %v7421_v56, %v2286_v37  ;;  %6637 = vmatpush3.bf16.msra.mxu0 %v9042_v48  ;;  %v7435_v63 = vpop.eup %7434  ;;  %v7170_v4 = vld [vmem:[%s10196_s11 + $0x1c] ss:$12 sps:$4 sm:$0xff]   ;;  %v7168_v44 = vld [vmem:[%s10196_s11 + $0x18] ss:$12 sps:$4 sm:$0xff]   ;;  %v7171_v56 = vld [vmem:[%s10196_s11 + $0x20] ss:$12 sps:$4 sm:$0xff]  }
 0x6f8   :  { %v2369_v39 = vadd.f32 %v10310_v22, %v2353_v47  ;;  %v7437_v29 = vpop.eup %7436  ;;  %2895 = vmatprep.subr.bf16.mxu1 %v7170_v4  ;;  %6638 = vmatprep.subr.bf16.mxu0 %v7171_v56  ;;  %v7178_v47 = vld [vmem:[%s10196_s11 + $0x4c] ss:$12 sps:$4 sm:$0xff]   ;;  %v7176_v37 = vld [vmem:[%s10196_s11 + $0x48] ss:$12 sps:$4 sm:$0xff]   ;;  %v7182_v10 = vld [vmem:[%s10196_s11 + $0x64] ss:$12 sps:$4 sm:$0xff]  }
 0x6f9   :  { %v2367_v23 = vadd.f32 %v2351_v49, %v10311_v32  ;;  %2896 = vmatpush1.bf16.msra.mxu1 %v7168_v44  ;;  %v7183_v49 = vld [vmem:[%s10196_s11 + $0x68] ss:$12 sps:$4 sm:$0xff]   ;;  %v7184_v22 = vld [vmem:[%s10196_s11 + $0x78] ss:$12 sps:$4 sm:$0xff]  }
 0x6fa   :  { %v2381_v53 = vpack.c.bf16 %v2369_v39, %v2368_v43  ;;  %v7175_v43 = vld [vmem:[%s10196_s11 + $0x38] ss:$12 sps:$4 sm:$0xff]   ;;  %2897 = vmatprep.subr.bf16.mxu1 %v7174_v62  ;;  %v7187_v39 = vld [vmem:[%s10196_s11 + $0x80] ss:$12 sps:$4 sm:$0xff]  }
 0x6fb   :  { %v6598_v20 = vpop.f32.mrb[72].mxu1  ;;  %v2380_v60 = vpack.c.bf16 %v2367_v23, %v2366_v8  ;;  %6639 = vmatpush3.bf16.msra.mxu0 %v7171_v56  ;;  %v7180_v8 = vld [vmem:[%s10196_s11 + $0x60] ss:$12 sps:$4 sm:$0xff]   ;;  %v7188_v23 = vld [vmem:[%s10196_s11 + $0x90] ss:$12 sps:$4 sm:$0xff]  }
 0x6fc   :  { %v2356_v27 = vmul.f32 %v7423_v19, %v6598_v20  ;;  %v2299_v1 = vpop.f32.mrb[73].mxu1  ;;  %6640 = vmatprep.subr.bf16.mxu0 %v7175_v43  ;;  %v7190_v32 = vld [vmem:[%s10196_s11 + $0x94] ss:$12 sps:$4 sm:$0xff]   ;;  %v7194_v19 = vld [vmem:[%s10196_s11 + $0xac] ss:$12 sps:$4 sm:$0xff]  }
 0x6fd   :  { %v2354_v46 = vmul.f32 %v7425_v17, %v2299_v1  ;;  %v6599_v48 = vpop.f32.mrb[74].mxu1  ;;  %6624 = vmatprep.mubr.bf16.mxu0 %v2380_v60  ;;  %2898 = vmatpush1.bf16.msra.mxu1 %v7172_v9  ;;  %v7192_v20 = vld [vmem:[%s10196_s11 + $0xa8] ss:$12 sps:$4 sm:$0xff]   ;;  %v7195_v60 = vld [vmem:[%s10196_s11 + $0xb0] ss:$12 sps:$4 sm:$0xff]  }
 0x6fe   :  { %v2372_v42 = vadd.f32 %v10312_v6, %v2356_v27  ;;  %v2357_v12 = vmul.f32 %v7427_v2, %v6599_v48  ;;  %v2302_v7 = vpop.f32.mrb[75].mxu1  ;;  %6625 = vmatmul.mubr.bf16.gmra.mrb[84].mxu0 %v2381_v53  ;;  %2899 = vmatprep.subr.bf16.mxu1 %v7178_v47  ;;  %v7191_v53 = vld [vmem:[%s10196_s11 + $0x98] ss:$12 sps:$4 sm:$0xff]   ;;  %v9128_v17 = vld [vmem:[#allocation14] sm:$0xff]   ;;  %v10321_v2 = vld [vmem:[#allocation33_spill] sm:$0xff] }
 0x6ff   :  { %v2370_v28 = vadd.f32 %v2354_v46, %v10313_v11  ;;  %v2355_v18 = vmul.f32 %v7429_v45, %v2302_v7  ;;  %6641 = vmatpush3.bf16.msra.mxu0 %v7175_v43  ;;  %v9130_v27 = vld [vmem:[#allocation13] sm:$0xff]  }
 0x700   :  { %v2373_v51 = vadd.f32 %v10314_v36, %v2357_v12  ;;  %6642 = vmatprep.subr.bf16.mxu0 %v7179_v61  ;;  %v10323_v45 = vld [vmem:[#allocation31_spill] sm:$0xff]  ;;  %v10325_v7 = vld [vmem:[#allocation34_spill] sm:$0xff]  ;;  %v10327_v36 = vld [vmem:[#allocation32_spill] sm:$0xff] }
 0x701   :  { %v2371_v0 = vadd.f32 %v2355_v18, %v10315_v16  ;;  %2900 = vmatpush1.bf16.msra.mxu1 %v7176_v37  ;;  %v10339_v9 = vld [vmem:[#allocation39_spill] sm:$0xff] }
 0x702   :  { %v2383_v13 = vpack.c.bf16 %v2373_v51, %v2372_v42  ;;  %2901 = vmatprep.subr.bf16.mxu1 %v7182_v10 }
 0x703   :  { %v6602_v3 = vpop.f32.mrb[76].mxu1  ;;  %v2382_v30 = vpack.c.bf16 %v2371_v0, %v2370_v28  ;;  %6643 = vmatpush3.bf16.msra.mxu0 %v7179_v61 }
 0x704   :  { %v2360_v58 = vmul.f32 %v7431_v40, %v6602_v3  ;;  %v2315_v41 = vpop.f32.mrb[77].mxu1  ;;  %6644 = vmatprep.subr.bf16.mxu0 %v7183_v49  ;;  %v10329_v40 = vld [vmem:[#allocation37_spill] sm:$0xff] }
 0x705   :  { %v2358_v21 = vmul.f32 %v7433_v35, %v2315_v41  ;;  %v6603_v55 = vpop.f32.mrb[78].mxu1  ;;  %6628 = vmatprep.mubr.bf16.mxu0 %v2382_v30  ;;  %2902 = vmatpush1.bf16.msra.mxu1 %v7180_v8  ;;  %v10331_v35 = vld [vmem:[#allocation35_spill] sm:$0xff] }
 0x706   :  { %v2376_v15 = vadd.f32 %v10316_v33, %v2360_v58  ;;  %v2361_v25 = vmul.f32 %v7435_v63, %v6603_v55  ;;  %v2318_v38 = vpop.f32.mrb[79].mxu1  ;;  %6629 = vmatmul.mubr.bf16.gmra.mrb[88].mxu0 %v2383_v13  ;;  %2903 = vmatprep.subr.bf16.mxu1 %v7186_v57 }
 0x707   :  { %v2374_v52 = vadd.f32 %v2358_v21, %v10317_v14  ;;  %v2359_v5 = vmul.f32 %v7437_v29, %v2318_v38  ;;  %6645 = vmatpush3.bf16.msra.mxu0 %v7183_v49  ;;  %v10333_v21 = vld [vmem:[#allocation38_spill] sm:$0xff] }
 0x708   :  { %v2377_v54 = vadd.f32 %v10318_v24, %v2361_v25  ;;  %6646 = vmatprep.subr.bf16.mxu0 %v7187_v39 }
 0x709   :  { %v2375_v59 = vadd.f32 %v2359_v5, %v10319_v50  ;;  %2904 = vmatpush1.bf16.msra.mxu1 %v7184_v22 }
 0x70a   :  { %v2385_v34 = vpack.c.bf16 %v2377_v54, %v2376_v15  ;;  %2905 = vmatprep.subr.bf16.mxu1 %v7190_v32  ;;  %v10335_v15 = vld [vmem:[#allocation36_spill] sm:$0xff] }
 0x70b   :  { %v2384_v31 = vpack.c.bf16 %v2375_v59, %v2374_v52  ;;  %6647 = vmatpush3.bf16.msra.mxu0 %v7187_v39 }
 0x70c   :  { %6648 = vmatprep.subr.bf16.mxu0 %v7191_v53 }
 0x70d   :  { %6632 = vmatprep.mubr.bf16.mxu0 %v2384_v31  ;;  %2906 = vmatpush1.bf16.msra.mxu1 %v7188_v23 }
 0x70e   :  { %6633 = vmatmul.mubr.bf16.gmra.mrb[92].mxu0 %v2385_v34  ;;  %2907 = vmatprep.subr.bf16.mxu1 %v7194_v19  ;;  %v10337_v34 = vld [vmem:[#allocation41_spill] sm:$0xff]  ;;  %v10342_v19 = vld [vmem:[#allocation42_spill] sm:$0xff] }
 0x70f   :  { %6649 = vmatpush3.bf16.msra.mxu0 %v7191_v53 }
 0x710   :  { %6650 = vmatprep.subr.bf16.mxu0 %v7195_v60 }
 0x711   :  { %2908 = vmatpush1.bf16.msra.mxu1 %v7192_v20 }
 0x712   :  { %6700 = vmatprep.subr.bf16.mxu1 %v9128_v17 }
 0x713   :  { %6651 = vmatpush3.bf16.msra.mxu0 %v7195_v60 }
 0x714   :  { %6668 = vmatprep.subr.bf16.mxu0 %v9130_v27 }
 0x7c9   :  { %v9134_v1 = vpop.f32.mrb[80].mxu0 }
 0x7ca   :  { %10320 = vst [vmem:[#allocation47_spill] sm:$0xff] %v9134_v1  ;;  %v2533_v46 = vadd.f32 %v9134_v1, %v10321_v2  ;;  %v9138_v48 = vpop.f32.mrb[81].mxu0 }
 0x7cb   :  { %10322 = vst [vmem:[#allocation48_spill] sm:$0xff] %v9138_v48  ;;  %v2531_v6 = vadd.f32 %v10323_v45, %v9138_v48  ;;  %v9142_v42 = vpop.f32.mrb[82].mxu0 }
 0x7cc   :  { %10324 = vst [vmem:[#allocation49_spill] sm:$0xff] %v9142_v42  ;;  %v2567_v12 = vmul.f32 1.442695, %v2533_v46  ;;  %v2534_v11 = vadd.f32 %v9142_v42, %v10325_v7  ;;  %v9146_v28 = vpop.f32.mrb[83].mxu0  ;;  %vm2549_vm1 = vcmp.gt.f32.partialorder %v2533_v46, 0.0 }
 0x7cd   :  { %10326 = vst [vmem:[#allocation50_spill] sm:$0xff] %v9146_v28  ;;  %v2563_v18 = vmul.f32 1.442695, %v2531_v6  ;;  %v2532_v51 = vadd.f32 %v10327_v36, %v9146_v28  ;;  %vm2547_vm2 = vcmp.gt.f32.partialorder %v2531_v6, 0.0 }
 0x7ce   :  { %7438 = vpow2.f32 %v2567_v12  ;;  %v2569_v16 = vmul.f32 1.442695, %v2534_v11  ;;  %vm2550_vm3 = vcmp.gt.f32.partialorder %v2534_v11, 0.0  ;;  %v10343_v12 = vld [vmem:[#allocation40_spill] sm:$0xff] }
 0x7cf   :  { %7440 = vpow2.f32 %v2563_v18  ;;  %v2565_v0 = vmul.f32 1.442695, %v2532_v51  ;;  %vm2548_vm4 = vcmp.gt.f32.partialorder %v2532_v51, 0.0 }
 0x7d0   :  { %7442 = vpow2.f32 %v2569_v16 }
 0x7d1   :  { %7444 = vpow2.f32 %v2565_v0  ;;  %v9150_v13 = vpop.f32.mrb[84].mxu0 }
 0x7d2   :  { %10328 = vst [vmem:[#allocation51_spill] sm:$0xff] %v9150_v13  ;;  %v9154_v3 = vadd.f32 %v9150_v13, %v10329_v40  ;;  %v9156_v30 = vpop.f32.mrb[85].mxu0 }
 0x7d3   :  { %10330 = vst [vmem:[#allocation52_spill] sm:$0xff] %v9156_v30  ;;  %v9160_v58 = vadd.f32 %v10331_v35, %v9156_v30  ;;  %v9162_v41 = vpop.f32.mrb[86].mxu0 }
 0x7d4   :  { %10332 = vst [vmem:[#allocation53_spill] sm:$0xff] %v9162_v41  ;;  %v2575_v63 = vmul.f32 1.442695, %v9154_v3  ;;  %v9167_v55 = vadd.f32 %v9162_v41, %v10333_v21  ;;  %v9169_v29 = vpop.f32.mrb[87].mxu0  ;;  %vm2553_vm5 = vcmp.gt.f32.partialorder %v9154_v3, 0.0 }
 0x7d5   :  { %10334 = vst [vmem:[#allocation54_spill] sm:$0xff] %v9169_v29  ;;  %v2571_v33 = vmul.f32 1.442695, %v9160_v58  ;;  %v9174_v25 = vadd.f32 %v10335_v15, %v9169_v29  ;;  %vm2551_vm6 = vcmp.gt.f32.partialorder %v9160_v58, 0.0  ;;  %v7651_v29 = vld [vmem:[%s10304_s9 + $0x68] sm:$0xff] }
 0x7d6   :  { %7446 = vpow2.f32 %v2575_v63  ;;  %v2577_v38 = vmul.f32 1.442695, %v9167_v55  ;;  %vm2554_vm7 = vcmp.gt.f32.partialorder %v9167_v55, 0.0 }
 0x7d7   :  { %7448 = vpow2.f32 %v2571_v33  ;;  %v2573_v14 = vmul.f32 1.442695, %v9174_v25  ;;  %vm2552_vm8 = vcmp.gt.f32.partialorder %v9174_v25, 0.0 }
 0x7d8   :  { %v7439_v52 = vpop.eup %7438  ;;  %7450 = vpow2.f32 %v2577_v38 }
 0x7d9   :  { %v7441_v5 = vpop.eup %7440  ;;  %v5844_v24 = vadd.f32 -1.0, %v7439_v52  ;;  %7452 = vpow2.f32 %v2573_v14  ;;  %v9178_v54 = vpop.f32.mrb[88].mxu0 }
 0x7da   :  { %10336 = vst [vmem:[#allocation55_spill] sm:$0xff] %v9178_v54  ;;  %v7443_v50 = vpop.eup %7442  ;;  %v5842_v59 = vadd.f32 -1.0, %v7441_v5  ;;  %v9182_v31 = vadd.f32 %v9178_v54, %v10337_v34  ;;  %v9184_v4 = vpop.f32.mrb[89].mxu0  ;;  %v10346_v5 = vld [vmem:[#allocation45_spill] sm:$0xff]  ;;  %v7199_v34 = vld [vmem:[#allocation13 + $0x8] sm:$0xff]  }
 0x7db   :  { %10338 = vst [vmem:[#allocation56_spill] sm:$0xff] %v9184_v4  ;;  %v7445_v44 = vpop.eup %7444  ;;  %v2613_v56 = vmul.f32 1.6732632, %v5844_v24  ;;  %v5845_v62 = vadd.f32 -1.0, %v7443_v50  ;;  %v9188_v43 = vadd.f32 %v10339_v9, %v9184_v4  ;;  %v9190_v47 = vpop.f32.mrb[90].mxu0  ;;  %v7650_v54 = vld [vmem:[%s10304_s9 + $0x60] sm:$0xff] }
 0x7dc   :  { %10340 = vst [vmem:[#allocation57_spill] sm:$0xff] %v9190_v47  ;;  %v2611_v37 = vmul.f32 1.6732632, %v5842_v59  ;;  %v5843_v61 = vadd.f32 -1.0, %v7445_v44  ;;  %v2583_v10 = vmul.f32 1.442695, %v9182_v31  ;;  %v9198_v20 = vadd.f32 %v9190_v47, %v10342_v19 }
 0x7dd   :  { %v2629_v8 = vsel %vm2549_vm1, %v2533_v46, %v2613_v56  ;;  %v2614_v49 = vmul.f32 1.6732632, %v5845_v62  ;;  %v2579_v57 = vmul.f32 1.442695, %v9188_v43  ;;  %v9194_v22 = vpop.f32.mrb[91].mxu0  ;;  %v7198_v59 = vld [vmem:[#allocation14 + $0x8] sm:$0xff]  }
 0x7de   :  { %10341 = vst [vmem:[#allocation58_spill] sm:$0xff] %v9194_v22  ;;  %v2627_v39 = vsel %vm2547_vm2, %v2531_v6, %v2611_v37  ;;  %v2612_v32 = vmul.f32 1.6732632, %v5843_v61  ;;  %7454 = vpow2.f32 %v2583_v10  ;;  %v2645_v23 = vmul.f32 1.050701, %v2629_v8  ;;  %v10348_v44 = vld [vmem:[#allocation43_spill] sm:$0xff] }
 0x7df   :  { %v2630_v53 = vsel %vm2550_vm3, %v2534_v11, %v2614_v49  ;;  %7456 = vpow2.f32 %v2579_v57  ;;  %v2643_v2 = vmul.f32 1.050701, %v2627_v39  ;;  %v9202_v7 = vadd.f32 %v10343_v12, %v9194_v22  ;;  %v10349_v62 = vld [vmem:[#allocation46_spill] sm:$0xff]  ;;  %v10351_v49 = vld [vmem:[#allocation44_spill] sm:$0xff] }
 0x7e0   :  { %v7447_v60 = vpop.eup %7446  ;;  %v2646_v46 = vmul.f32 1.050701, %v2630_v53  ;;  %v2628_v45 = vsel %vm2548_vm4, %v2532_v51, %v2612_v32  ;;  %v2585_v16 = vmul.f32 1.442695, %v9198_v20  ;;  %vm2557_vm9 = vcmp.gt.f32.partialorder %v9182_v31, 0.0  ;;  %v7648_v22 = vld [vmem:[%s10304_s9 + $0x40] sm:$0xff] }
 0x7e1   :  { %v7449_v18 = vpop.eup %7448  ;;  %v2644_v6 = vmul.f32 1.050701, %v2628_v45  ;;  %v5848_v36 = vadd.f32 -1.0, %v7447_v60  ;;  %v2581_v35 = vmul.f32 1.442695, %v9202_v7  ;;  %v9208_v63 = vpop.f32.mrb[92].mxu0 }
 0x7e2   :  { %v7451_v0 = vpop.eup %7450  ;;  %v9205_v11 = vpack.c.bf16 %v2646_v46, %v2645_v23  ;;  %v5846_v40 = vadd.f32 -1.0, %v7449_v18  ;;  %10344 = vst [vmem:[#allocation59_spill] sm:$0xff] %v9208_v63  ;;  %7458 = vpow2.f32 %v2585_v16  ;;  %v9210_v38 = vpop.f32.mrb[93].mxu0  ;;  %v9214_v24 = vadd.f32 %v9208_v63, %v10346_v5  ;;  %v7201_v46 = vld [vmem:[#allocation13 + $0x10] sm:$0xff]  }
 0x7e3   :  { %v7453_v21 = vpop.eup %7452  ;;  %v2757_v33 = vpack.c.bf16 %v2644_v6, %v2643_v2  ;;  %v2617_v51 = vmul.f32 1.6732632, %v5848_v36  ;;  %v5849_v15 = vadd.f32 -1.0, %v7451_v0  ;;  %10345 = vst [vmem:[#allocation60_spill] sm:$0xff] %v9210_v38  ;;  %7460 = vpow2.f32 %v2581_v35  ;;  %v9216_v50 = vpop.f32.mrb[94].mxu0  ;;  %v7200_v2 = vld [vmem:[#allocation14 + $0x10] sm:$0xff]  }
 0x7e4   :  { %v2615_v14 = vmul.f32 1.6732632, %v5846_v40  ;;  %v5847_v52 = vadd.f32 -1.0, %v7453_v21  ;;  %10347 = vst [vmem:[#allocation33_spill] sm:$0xff] %v9216_v50  ;;  %v9222_v56 = vadd.f32 %v10348_v44, %v9210_v38  ;;  %v9226_v9 = vadd.f32 %v9216_v50, %v10349_v62  ;;  %v9228_v37 = vpop.f32.mrb[95].mxu0  ;;  %v7202_v40 = vld [vmem:[#allocation14 + $0x18] sm:$0xff]  }
 0x7e5   :  { %10350 = vst [vmem:[#allocation31_spill] sm:$0xff] %v9228_v37  ;;  %2926 = vmatmul.mubr.bf16.vlgmr.msra.gmra.mrb[80].mxu1 %v2757_v33  ;;  %6652 = vmatprep.mubr.bf16.mxu0 %v2757_v33  ;;  %v2618_v61 = vmul.f32 1.6732632, %v5849_v15  ;;  %v2591_v8 = vmul.f32 1.442695, %v9214_v24  ;;  %v9233_v57 = vadd.f32 %v10351_v49, %v9228_v37  ;;  %v2633_v60 = vsel %vm2553_vm5, %v9154_v3, %v2617_v51  ;;  %v7203_v33 = vld [vmem:[#allocation13 + $0x18] sm:$0xff]  }
 0x7e6   :  { %v2616_v10 = vmul.f32 1.6732632, %v5847_v52  ;;  %6653 = vmatmul.mubr.bf16.vlgmr.msra.gmra.mrb[96].mxu0 %v9205_v11  ;;  %2935 = vmatprep.mubr.bf16.mxu1 %v10305_v26  ;;  %v2587_v39 = vmul.f32 1.442695, %v9222_v56  ;;  %v2593_v32 = vmul.f32 1.442695, %v9226_v9  ;;  %v2631_v19 = vsel %vm2551_vm6, %v9160_v58, %v2615_v14 }
 0x7e7   :  { %6701 = vmatpush3.bf16.msra.mxu1 %v9128_v17  ;;  %6669 = vmatpush3.bf16.msra.mxu0 %v9130_v27  ;;  %7462 = vpow2.f32 %v2591_v8  ;;  %v2589_v53 = vmul.f32 1.442695, %v9233_v57  ;;  %v2647_v12 = vmul.f32 1.050701, %v2631_v19  ;;  %v2634_v58 = vsel %vm2554_vm7, %v9167_v55, %v2618_v61  ;;  %v7646_v50 = vld [vmem:[%s10304_s9 + $0x50] sm:$0xff] }
 0x7e8   :  { %v7455_v23 = vpop.eup %7454  ;;  %6702 = vmatprep.subr.bf16.mxu1 %v7198_v59  ;;  %6670 = vmatprep.subr.bf16.mxu0 %v7199_v34  ;;  %7464 = vpow2.f32 %v2587_v39  ;;  %v2632_v27 = vsel %vm2552_vm8, %v9174_v25, %v2616_v10  ;;  %v2649_v3 = vmul.f32 1.050701, %v2633_v60  ;;  %v2650_v36 = vmul.f32 1.050701, %v2634_v58 }
 0x7e9   :  { %v7457_v45 = vpop.eup %7456  ;;  %v5852_v17 = vadd.f32 -1.0, %v7455_v23  ;;  %7466 = vpow2.f32 %v2593_v32  ;;  %v2648_v6 = vmul.f32 1.050701, %v2632_v27  ;;  %vm2555_vm10 = vcmp.gt.f32.partialorder %v9188_v43, 0.0 }
 0x7ea   :  { %v5850_v18 = vadd.f32 -1.0, %v7457_v45  ;;  %7468 = vpow2.f32 %v2589_v53  ;;  %v9257_v21 = vpack.c.bf16 %v2650_v36, %v2649_v3  ;;  %vm2558_vm11 = vcmp.gt.f32.partialorder %v9198_v20, 0.0 }
 0x7eb   :  { %6703 = vmatpush3.bf16.msra.mxu1 %v7198_v59  ;;  %6671 = vmatpush3.bf16.msra.mxu0 %v7199_v34  ;;  %v2621_v16 = vmul.f32 1.6732632, %v5852_v17  ;;  %v2759_v0 = vpack.c.bf16 %v2648_v6, %v2647_v12  ;;  %v7205_v34 = vld [vmem:[#allocation13 + $0x20] sm:$0xff]   ;;  %vm2556_vm13 = vcmp.gt.f32.partialorder %v9202_v7, 0.0  ;;  %vm2561_vm14 = vcmp.gt.f32.partialorder %v9214_v24, 0.0 }
 0x7ec   :  { %6704 = vmatprep.subr.bf16.mxu1 %v7200_v2  ;;  %6672 = vmatprep.subr.bf16.mxu0 %v7201_v46  ;;  %v7459_v35 = vpop.eup %7458  ;;  %v2619_v25 = vmul.f32 1.6732632, %v5850_v18  ;;  %vm2559_vm15 = vcmp.gt.f32.partialorder %v9222_v56, 0.0  ;;  %vm2562_vm0 = vcmp.gt.f32.partialorder %v9226_v9, 0.0  ;;  %vm2560_vm1 = vcmp.gt.f32.partialorder %v9233_v57, 0.0 }
 0x7ed   :  { %2936 = vmatmul.mubr.bf16.gmra.mrb[84].mxu1 %v9205_v11  ;;  %v7461_v51 = vpop.eup %7460  ;;  %v5853_v15 = vadd.f32 -1.0, %v7459_v35  ;;  %6656 = vmatprep.mubr.bf16.mxu0 %v2759_v0  ;;  %v2637_v52 = vsel %vm2557_vm9, %v9182_v31, %v2621_v16  ;;  %v7204_v11 = vld [vmem:[#allocation14 + $0x20] sm:$0xff]   ;;  %v7210_v35 = vld [vmem:[#allocation14 + $0x38] sm:$0xff]  }
 0x7ee   :  { %2945 = vmatprep.mubr.bf16.mxu1 %v10305_v26  ;;  %v5851_v55 = vadd.f32 -1.0, %v7461_v51  ;;  %6657 = vmatmul.mubr.bf16.gmra.mrb[100].mxu0 %v9257_v21  ;;  %v2635_v59 = vsel %vm2555_vm10, %v9188_v43, %v2619_v25  ;;  %v2653_v31 = vmul.f32 1.050701, %v2637_v52  ;;  %v7206_v43 = vld [vmem:[#allocation14 + $0x28] sm:$0xff]   ;;  %v7211_v25 = vld [vmem:[#allocation13 + $0x38] sm:$0xff]  }
 0x7ef   :  { %6705 = vmatpush3.bf16.msra.mxu1 %v7200_v2  ;;  %v2622_v14 = vmul.f32 1.6732632, %v5853_v15  ;;  %6673 = vmatpush3.bf16.msra.mxu0 %v7201_v46  ;;  %v2651_v23 = vmul.f32 1.050701, %v2635_v59 }
 0x7f0   :  { %6706 = vmatprep.subr.bf16.mxu1 %v7202_v40  ;;  %v2620_v5 = vmul.f32 1.6732632, %v5851_v55  ;;  %6674 = vmatprep.subr.bf16.mxu0 %v7203_v33 }
 0x7f1   :  { %v7463_v44 = vpop.eup %7462  ;;  %v2638_v62 = vsel %vm2558_vm11, %v9198_v20, %v2622_v14 }
 0x7f2   :  { %v7465_v61 = vpop.eup %7464  ;;  %v5856_v10 = vadd.f32 -1.0, %v7463_v44  ;;  %v2636_v8 = vsel %vm2556_vm13, %v9202_v7, %v2620_v5  ;;  %v2654_v49 = vmul.f32 1.050701, %v2638_v62 }
 0x7f3   :  { %6707 = vmatpush3.bf16.msra.mxu1 %v7202_v40  ;;  %v7467_v39 = vpop.eup %7466  ;;  %v5854_v32 = vadd.f32 -1.0, %v7465_v61  ;;  %v2652_v53 = vmul.f32 1.050701, %v2636_v8  ;;  %6675 = vmatpush3.bf16.msra.mxu0 %v7203_v33 }
 0x7f4   :  { %6708 = vmatprep.subr.bf16.mxu1 %v7204_v11  ;;  %v7469_v19 = vpop.eup %7468  ;;  %v2625_v60 = vmul.f32 1.6732632, %v5856_v10  ;;  %v5857_v2 = vadd.f32 -1.0, %v7467_v39  ;;  %v2762_v46 = vpack.c.bf16 %v2654_v49, %v2653_v31  ;;  %6676 = vmatprep.subr.bf16.mxu0 %v7205_v34 }
 0x7f5   :  { %2946 = vmatmul.mubr.bf16.gmra.mrb[88].mxu1 %v2759_v0  ;;  %v2623_v20 = vmul.f32 1.6732632, %v5854_v32  ;;  %v5855_v7 = vadd.f32 -1.0, %v7469_v19  ;;  %v2761_v45 = vpack.c.bf16 %v2652_v53, %v2651_v23  ;;  %v7213_v23 = vld [vmem:[%s10200_s15 + $0x8] sm:$0xff]  }
 0x7f6   :  { %2955 = vmatprep.mubr.bf16.mxu1 %v10305_v26  ;;  %v2626_v17 = vmul.f32 1.6732632, %v5857_v2  ;;  %v2641_v27 = vsel %vm2561_vm14, %v9214_v24, %v2625_v60 }
 0x7f7   :  { %6709 = vmatpush3.bf16.msra.mxu1 %v7204_v11  ;;  %v2624_v12 = vmul.f32 1.6732632, %v5855_v7  ;;  %6660 = vmatprep.mubr.bf16.mxu0 %v2761_v45  ;;  %v2639_v18 = vsel %vm2559_vm15, %v9222_v56, %v2623_v20  ;;  %v2657_v3 = vmul.f32 1.050701, %v2641_v27  ;;  %v7207_v56 = vld [vmem:[#allocation13 + $0x28] sm:$0xff]  }
 0x7f8   :  { %6710 = vmatprep.subr.bf16.mxu1 %v7206_v43  ;;  %6661 = vmatmul.mubr.bf16.gmra.mrb[104].mxu0 %v2762_v46  ;;  %v2642_v6 = vsel %vm2562_vm0, %v9226_v9, %v2626_v17  ;;  %v2655_v16 = vmul.f32 1.050701, %v2639_v18  ;;  %v7208_v9 = vld [vmem:[#allocation14 + $0x30] sm:$0xff]  }
 0x7f9   :  { %v2640_v58 = vsel %vm2560_vm1, %v9233_v57, %v2624_v12  ;;  %v2658_v36 = vmul.f32 1.050701, %v2642_v6  ;;  %6677 = vmatpush3.bf16.msra.mxu0 %v7205_v34  ;;  %v7209_v57 = vld [vmem:[#allocation13 + $0x30] sm:$0xff]  }
 0x7fa   :  { %v2656_v24 = vmul.f32 1.050701, %v2640_v58  ;;  %6678 = vmatprep.subr.bf16.mxu0 %v7207_v56  ;;  %v7215_v12 = vld [vmem:[%s10200_s15 + $0x18] sm:$0xff]  }
 0x7fb   :  { %6711 = vmatpush3.bf16.msra.mxu1 %v7206_v43  ;;  %v2764_v0 = vpack.c.bf16 %v2658_v36, %v2657_v3 }
 0x7fc   :  { %v2763_v40 = vpack.c.bf16 %v2656_v24, %v2655_v16  ;;  %6712 = vmatprep.subr.bf16.mxu1 %v7208_v9  ;;  %v7216_v24 = vld [vmem:[%s10200_s15 + $0x20] sm:$0xff]  }
 0x7fd   :  { %2956 = vmatmul.mubr.bf16.gmra.mrb[92].mxu1 %v9257_v21  ;;  %6679 = vmatpush3.bf16.msra.mxu0 %v7207_v56  ;;  %v7212_v21 = vld [vmem:[%s10200_s15] sm:$0xff]  }
 0x7fe   :  { %2965 = vmatprep.mubr.bf16.mxu1 %v10305_v26  ;;  %6664 = vmatprep.mubr.bf16.mxu0 %v2763_v40 }
 0x7ff   :  { %6713 = vmatpush3.bf16.msra.mxu1 %v7208_v9  ;;  %6680 = vmatprep.subr.bf16.mxu0 %v7209_v57 }
 0x800   :  { %6665 = vmatmul.mubr.bf16.gmra.mrb[108].mxu0 %v2764_v0  ;;  %6714 = vmatprep.subr.bf16.mxu1 %v7210_v35 }
 0x801   :  { %6681 = vmatpush3.bf16.msra.mxu0 %v7209_v57 }
 0x802   :  { %6682 = vmatprep.subr.bf16.mxu0 %v7211_v25 }
 0x803   :  { %6715 = vmatpush3.bf16.msra.mxu1 %v7210_v35 }
 0x805   :  { %2966 = vmatmul.mubr.bf16.gmra.mrb[96].mxu1 %v2761_v45  ;;  %6683 = vmatpush3.bf16.msra.mxu0 %v7211_v25  ;;  %v7217_v25 = vld [vmem:[%s10200_s15 + $0x28] sm:$0xff]  }
 0x806   :  { %2975 = vmatprep.mubr.bf16.mxu1 %v10305_v26  ;;  %6732 = vmatprep.subr.bf16.mxu0 %v7212_v21 }
 0x80d   :  { %2976 = vmatmul.mubr.bf16.gmra.mrb[100].mxu1 %v2762_v46  ;;  %v7214_v46 = vld [vmem:[%s10200_s15 + $0x10] sm:$0xff]  }
 0x80e   :  { %2985 = vmatprep.mubr.bf16.mxu1 %v10305_v26 }
 0x815   :  { %2986 = vmatmul.mubr.bf16.gmra.mrb[104].mxu1 %v2763_v40 }
 0x816   :  { %2995 = vmatprep.mubr.bf16.mxu1 %v10305_v26 }
 0x81d   :  { %2996 = vmatmul.mubr.bf16.gmra.mrb[108].mxu1 %v2764_v0 }
 0x8b8   :  { %v2927_v33 = vpop.f32.mrb[80].mxu1 }
 0x8b9   :  { %v2929_v51 = vpop.f32.mrb[81].mxu1  ;;  %v6654_v15 = vpop.f32.mrb[96].mxu0 }
 0x8ba   :  { %v2931_v55 = vpop.f32.mrb[82].mxu1  ;;  %v3040_v14 = vpop.f32.mrb[97].mxu0 }
 0x8bb   :  { %v9286_v52 = vpack.c.bf16 %v2931_v55, %v2927_v33  ;;  %v2933_v11 = vpop.f32.mrb[83].mxu1  ;;  %v6655_v5 = vpop.f32.mrb[98].mxu0 }
 0x8bc   :  { %v9288_v59 = vpack.c.bf16 %v2933_v11, %v2929_v51  ;;  %v9290_v34 = vpack.c.bf16 %v6655_v5, %v6654_v15  ;;  %v3043_v44 = vpop.f32.mrb[99].mxu0  ;;  %v7218_v11 = vld [vmem:[%s10200_s15 + $0x30] sm:$0xff]  }
 0x8bd   :  { %v9292_v62 = vpack.c.bf16 %v3043_v44, %v3040_v14  ;;  %6684 = vmatprep.mubr.bf16.mxu0 %v9286_v52 }
 0x8be   :  { %6764 = vmatprep.subr.bf16.mxu1 %v9288_v59 }
 0x8c0   :  { %v2937_v61 = vpop.f32.mrb[84].mxu1 }
 0x8c1   :  { %v2939_v10 = vpop.f32.mrb[85].mxu1  ;;  %v6658_v8 = vpop.f32.mrb[100].mxu0 }
 0x8c2   :  { %v2941_v31 = vpop.f32.mrb[86].mxu1  ;;  %v3056_v39 = vpop.f32.mrb[101].mxu0 }
 0x8c3   :  { %v9296_v49 = vpack.c.bf16 %v2941_v31, %v2937_v61  ;;  %v2943_v32 = vpop.f32.mrb[87].mxu1  ;;  %v6659_v43 = vpop.f32.mrb[102].mxu0 }
 0x8c4   :  { %v9301_v53 = vpack.c.bf16 %v2943_v32, %v2939_v10  ;;  %v9303_v19 = vpack.c.bf16 %v6659_v43, %v6658_v8  ;;  %v3059_v60 = vpop.f32.mrb[103].mxu0 }
 0x8c5   :  { %6685 = vmatmul.mubr.bf16.vlgmr.msra.gmra.mrb[112].mxu0 %v9296_v49  ;;  %v9306_v2 = vpack.c.bf16 %v3059_v60, %v3056_v39  ;;  %v7219_v39 = vld [vmem:[%s10200_s15 + $0x38] sm:$0xff]  }
 0x8c6   :  { %6733 = vmatpush3.bf16.msra.mxu0 %v7212_v21 }
 0x8c7   :  { %6734 = vmatprep.subr.bf16.mxu0 %v7213_v23 }
 0x8c8   :  { %v2947_v20 = vpop.f32.mrb[88].mxu1 }
 0x8c9   :  { %v2949_v7 = vpop.f32.mrb[89].mxu1 }
 0x8ca   :  { %6735 = vmatpush3.bf16.msra.mxu0 %v7213_v23  ;;  %v2951_v45 = vpop.f32.mrb[90].mxu1 }
 0x8cb   :  { %v9311_v17 = vpack.c.bf16 %v2951_v45, %v2947_v20  ;;  %v2953_v27 = vpop.f32.mrb[91].mxu1  ;;  %6736 = vmatprep.subr.bf16.mxu0 %v7214_v46  ;;  %v6662_v18 = vpop.f32.mrb[104].mxu0 }
 0x8cc   :  { %v9316_v6 = vpack.c.bf16 %v2953_v27, %v2949_v7  ;;  %v3072_v58 = vpop.f32.mrb[105].mxu0 }
 0x8cd   :  { %6688 = vmatprep.mubr.bf16.mxu0 %v9311_v17  ;;  %v6663_v3 = vpop.f32.mrb[106].mxu0 }
 0x8ce   :  { %6737 = vmatpush3.bf16.msra.mxu0 %v7214_v46  ;;  %v9319_v36 = vpack.c.bf16 %v6663_v3, %v6662_v18  ;;  %v3075_v16 = vpop.f32.mrb[107].mxu0 }
 0x8cf   :  { %6738 = vmatprep.subr.bf16.mxu0 %v7215_v12  ;;  %v9324_v0 = vpack.c.bf16 %v3075_v16, %v3072_v58 }
 0x8d0   :  { %v2957_v40 = vpop.f32.mrb[92].mxu1 }
 0x8d1   :  { %v2959_v56 = vpop.f32.mrb[93].mxu1 }
 0x8d2   :  { %6739 = vmatpush3.bf16.msra.mxu0 %v7215_v12  ;;  %v2961_v9 = vpop.f32.mrb[94].mxu1 }
 0x8d3   :  { %v9326_v57 = vpack.c.bf16 %v2961_v9, %v2957_v40  ;;  %v2963_v35 = vpop.f32.mrb[95].mxu1  ;;  %6740 = vmatprep.subr.bf16.mxu0 %v7216_v24  ;;  %v6666_v21 = vpop.f32.mrb[108].mxu0 }
 0x8d4   :  { %v9331_v33 = vpack.c.bf16 %v2963_v35, %v2959_v56  ;;  %v3088_v51 = vpop.f32.mrb[109].mxu0 }
 0x8d5   :  { %6689 = vmatmul.mubr.bf16.gmra.mrb[116].mxu0 %v9326_v57  ;;  %v6667_v15 = vpop.f32.mrb[110].mxu0 }
 0x8d6   :  { %6741 = vmatpush3.bf16.msra.mxu0 %v7216_v24  ;;  %v3826_v55 = vpack.c.bf16 %v6667_v15, %v6666_v21  ;;  %v3091_v14 = vpop.f32.mrb[111].mxu0 }
 0x8d7   :  { %6742 = vmatprep.subr.bf16.mxu0 %v7217_v25  ;;  %v3825_v5 = vpack.c.bf16 %v3091_v14, %v3088_v51 }
 0x8d8   :  { %v2967_v44 = vpop.f32.mrb[96].mxu1 }
 0x8d9   :  { %v2969_v61 = vpop.f32.mrb[97].mxu1 }
 0x8da   :  { %6743 = vmatpush3.bf16.msra.mxu0 %v7217_v25  ;;  %v2971_v10 = vpop.f32.mrb[98].mxu1 }
 0x8db   :  { %v9337_v8 = vpack.c.bf16 %v2971_v10, %v2967_v44  ;;  %v2973_v31 = vpop.f32.mrb[99].mxu1  ;;  %6744 = vmatprep.subr.bf16.mxu0 %v7218_v11 }
 0x8dc   :  { %v9342_v32 = vpack.c.bf16 %v2973_v31, %v2969_v61 }
 0x8dd   :  { %6692 = vmatprep.mubr.bf16.mxu0 %v9337_v8 }
 0x8de   :  { %6745 = vmatpush3.bf16.msra.mxu0 %v7218_v11 }
 0x8df   :  { %6746 = vmatprep.subr.bf16.mxu0 %v7219_v39 }
 0x8e0   :  { %v2977_v23 = vpop.f32.mrb[100].mxu1 }
 0x8e1   :  { %v2979_v43 = vpop.f32.mrb[101].mxu1 }
 0x8e2   :  { %6747 = vmatpush3.bf16.msra.mxu0 %v7219_v39  ;;  %v2981_v60 = vpop.f32.mrb[102].mxu1 }
 0x8e3   :  { %v9345_v46 = vpack.c.bf16 %v2981_v60, %v2977_v23  ;;  %6796 = vmatprep.subr.bf16.mxu0 %v9292_v62  ;;  %v2983_v20 = vpop.f32.mrb[103].mxu1 }
 0x8e4   :  { %v9348_v7 = vpack.c.bf16 %v2983_v20, %v2979_v43 }
 0x8e5   :  { %6693 = vmatmul.mubr.bf16.gmra.mrb[120].mxu0 %v9345_v46 }
 0x8e8   :  { %v2987_v45 = vpop.f32.mrb[104].mxu1 }
 0x8e9   :  { %v2989_v27 = vpop.f32.mrb[105].mxu1 }
 0x8ea   :  { %v2991_v12 = vpop.f32.mrb[106].mxu1 }
 0x8eb   :  { %v9351_v18 = vpack.c.bf16 %v2991_v12, %v2987_v45  ;;  %v2993_v58 = vpop.f32.mrb[107].mxu1 }
 0x8ec   :  { %v9353_v3 = vpack.c.bf16 %v2993_v58, %v2989_v27 }
 0x8ed   :  { %6696 = vmatprep.mubr.bf16.mxu0 %v9351_v18 }
 0x8f0   :  { %v2997_v16 = vpop.f32.mrb[108].mxu1 }
 0x8f1   :  { %v2999_v24 = vpop.f32.mrb[109].mxu1 }
 0x8f2   :  { %v3001_v40 = vpop.f32.mrb[110].mxu1 }
 0x8f3   :  { %v9356_v56 = vpack.c.bf16 %v3001_v40, %v2997_v16  ;;  %v3003_v9 = vpop.f32.mrb[111].mxu1 }
 0x8f4   :  { %v9358_v35 = vpack.c.bf16 %v3003_v9, %v2999_v24 }
 0x8f5   :  { %6697 = vmatmul.mubr.bf16.gmra.mrb[124].mxu0 %v9356_v56 }
 0x8f6   :  { %6748 = vmatprep.mubr.bf16.mxu0 %v9286_v52 }
 0x8fd   :  { %6749 = vmatmul.mubr.bf16.vlgmr.msra.gmra.mrb[128].mxu0 %v9296_v49 }
 0x8fe   :  { %6797 = vmatpush3.bf16.msra.mxu0 %v9292_v62  ;;  %6752 = vmatprep.mubr.bf16.mxu0 %v9311_v17 }
 0x8ff   :  { %6798 = vmatprep.subr.bf16.mxu0 %v9290_v34 }
 0x902   :  { %6799 = vmatpush3.bf16.msra.mxu0 %v9290_v34 }
 0x903   :  { %6800 = vmatprep.subr.bf16.mxu0 %v9306_v2 }
 0x905   :  { %6753 = vmatmul.mubr.bf16.gmra.mrb[132].mxu0 %v9326_v57 }
 0x906   :  { %6801 = vmatpush3.bf16.msra.mxu0 %v9306_v2  ;;  %6756 = vmatprep.mubr.bf16.mxu0 %v9337_v8 }
 0x907   :  { %6802 = vmatprep.subr.bf16.mxu0 %v9303_v19 }
 0x90a   :  { %6803 = vmatpush3.bf16.msra.mxu0 %v9303_v19 }
 0x90b   :  { %6804 = vmatprep.subr.bf16.mxu0 %v9324_v0 }
 0x90d   :  { %6757 = vmatmul.mubr.bf16.gmra.mrb[136].mxu0 %v9345_v46 }
 0x90e   :  { %6805 = vmatpush3.bf16.msra.mxu0 %v9324_v0  ;;  %6760 = vmatprep.mubr.bf16.mxu0 %v9351_v18 }
 0x90f   :  { %6806 = vmatprep.subr.bf16.mxu0 %v9319_v36 }
 0x912   :  { %6807 = vmatpush3.bf16.msra.mxu0 %v9319_v36 }
 0x913   :  { %6808 = vmatprep.subr.bf16.mxu0 %v3825_v5 }
 0x915   :  { %6761 = vmatmul.mubr.bf16.gmra.mrb[140].mxu0 %v9356_v56 }
 0x916   :  { %6809 = vmatpush3.bf16.msra.mxu0 %v3825_v5 }
 0x917   :  { %6810 = vmatprep.subr.bf16.mxu0 %v3826_v55 }
 0x91a   :  { %6811 = vmatpush3.bf16.msra.mxu0 %v3826_v55 }
 0x998   :  { %v6686_v34 = vpop.f32.mrb[112].mxu0 }
 0x999   :  { %v3276_v62 = vmul.f32 1.442695, %v6686_v34  ;;  %v3193_v19 = vpop.f32.mrb[113].mxu0  ;;  %vm3258_vm2 = vcmp.gt.f32.partialorder %v6686_v34, 0.0 }
 0x99a   :  { %v3272_v2 = vmul.f32 1.442695, %v3193_v19  ;;  %v6687_v25 = vpop.f32.mrb[114].mxu0  ;;  %vm3256_vm3 = vcmp.gt.f32.partialorder %v3193_v19, 0.0 }
 0x99b   :  { %7470 = vpow2.f32 %v3276_v62  ;;  %v3278_v21 = vmul.f32 1.442695, %v6687_v25  ;;  %v3196_v0 = vpop.f32.mrb[115].mxu0  ;;  %vm3259_vm4 = vcmp.gt.f32.partialorder %v6687_v25, 0.0 }
 0x99c   :  { %7472 = vpow2.f32 %v3272_v2  ;;  %v3274_v51 = vmul.f32 1.442695, %v3196_v0  ;;  %vm3257_vm5 = vcmp.gt.f32.partialorder %v3196_v0, 0.0 }
 0x99d   :  { %7474 = vpow2.f32 %v3278_v21 }
 0x99e   :  { %7476 = vpow2.f32 %v3274_v51 }
 0x9a5   :  { %v7471_v15 = vpop.eup %7470 }
 0x9a6   :  { %v7473_v36 = vpop.eup %7472  ;;  %v5892_v14 = vadd.f32 -1.0, %v7471_v15 }
 0x9a7   :  { %v7475_v11 = vpop.eup %7474  ;;  %v5890_v44 = vadd.f32 -1.0, %v7473_v36 }
 0x9a8   :  { %v7477_v5 = vpop.eup %7476  ;;  %v3322_v61 = vmul.f32 1.6732632, %v5892_v14  ;;  %v5893_v55 = vadd.f32 -1.0, %v7475_v11  ;;  %v6690_v10 = vpop.f32.mrb[116].mxu0 }
 0x9a9   :  { %v3320_v31 = vmul.f32 1.6732632, %v5890_v44  ;;  %v5891_v39 = vadd.f32 -1.0, %v7477_v5  ;;  %v3284_v23 = vmul.f32 1.442695, %v6690_v10  ;;  %v3209_v20 = vpop.f32.mrb[117].mxu0 }
 0x9aa   :  { %v3338_v43 = vsel %vm3258_vm2, %v6686_v34, %v3322_v61  ;;  %v3323_v60 = vmul.f32 1.6732632, %v5893_v55  ;;  %v6691_v12 = vpop.f32.mrb[118].mxu0  ;;  %v3280_v16 = vmul.f32 1.442695, %v3209_v20  ;;  %vm3262_vm6 = vcmp.gt.f32.partialorder %v6690_v10, 0.0 }
 0x9ab   :  { %v3336_v45 = vsel %vm3256_vm3, %v3193_v19, %v3320_v31  ;;  %v3321_v27 = vmul.f32 1.6732632, %v5891_v39  ;;  %7478 = vpow2.f32 %v3284_v23  ;;  %v3212_v24 = vpop.f32.mrb[119].mxu0  ;;  %v3354_v40 = vmul.f32 1.050701, %v3338_v43 }
 0x9ac   :  { %v3339_v58 = vsel %vm3259_vm4, %v6687_v25, %v3323_v60  ;;  %v3286_v2 = vmul.f32 1.442695, %v6691_v12  ;;  %v3352_v21 = vmul.f32 1.050701, %v3336_v45  ;;  %7480 = vpow2.f32 %v3280_v16 }
 0x9ad   :  { %v3355_v9 = vmul.f32 1.050701, %v3339_v58  ;;  %v3337_v62 = vsel %vm3257_vm5, %v3196_v0, %v3321_v27  ;;  %v3282_v34 = vmul.f32 1.442695, %v3212_v24  ;;  %vm3260_vm7 = vcmp.gt.f32.partialorder %v3209_v20, 0.0 }
 0x9ae   :  { %v3353_v51 = vmul.f32 1.050701, %v3337_v62  ;;  %7482 = vpow2.f32 %v3286_v2  ;;  %vm3263_vm8 = vcmp.gt.f32.partialorder %v6691_v12, 0.0  ;;  %vm3261_vm9 = vcmp.gt.f32.partialorder %v3212_v24, 0.0 }
 0x9af   :  { %v3369_v15 = vpack.c.bf16 %v3355_v9, %v3354_v40  ;;  %7484 = vpow2.f32 %v3282_v34  ;;  %vm7975_vm3 = vmmov 0  }
 0x9b0   :  { %v3368_v19 = vpack.c.bf16 %v3353_v51, %v3352_v21 }
 0x9b2   :  { %6716 = vmatprep.mubr.bf16.mxu1 %v3368_v19 }
 0x9b3   :  { %6717 = vmatmul.mubr.bf16.vlgmr.msra.gmra.mrb[112].mxu1 %v3369_v15 }
 0x9b4   :  { %6765 = vmatpush3.bf16.xpose.msra.mxu1 %v9288_v59 }
 0x9b5   :  { %v7479_v25 = vpop.eup %7478  ;;  %6766 = vmatprep.subr.bf16.mxu1 %v9301_v53 }
 0x9b6   :  { %v5896_v36 = vadd.f32 -1.0, %v7479_v25  ;;  %v7481_v14 = vpop.eup %7480 }
 0x9b7   :  { %v5894_v5 = vadd.f32 -1.0, %v7481_v14 }
 0x9b8   :  { %v3326_v11 = vmul.f32 1.6732632, %v5896_v36  ;;  %v6694_v0 = vpop.f32.mrb[120].mxu0  ;;  %v7483_v44 = vpop.eup %7482 }
 0x9b9   :  { %v3292_v61 = vmul.f32 1.442695, %v6694_v0  ;;  %v3225_v55 = vpop.f32.mrb[121].mxu0  ;;  %v7485_v31 = vpop.eup %7484  ;;  %v5897_v39 = vadd.f32 -1.0, %v7483_v44  ;;  %v3324_v60 = vmul.f32 1.6732632, %v5894_v5 }
 0x9ba   :  { %v3288_v23 = vmul.f32 1.442695, %v3225_v55  ;;  %v6695_v43 = vpop.f32.mrb[122].mxu0  ;;  %v5895_v45 = vadd.f32 -1.0, %v7485_v31  ;;  %v3342_v27 = vsel %vm3262_vm6, %v6690_v10, %v3326_v11  ;;  %vm3266_vm10 = vcmp.gt.f32.partialorder %v6694_v0, 0.0 }
 0x9bb   :  { %7486 = vpow2.f32 %v3292_v61  ;;  %v3228_v59 = vpop.f32.mrb[123].mxu0  ;;  %v3327_v58 = vmul.f32 1.6732632, %v5897_v39  ;;  %v3294_v16 = vmul.f32 1.442695, %v6695_v43  ;;  %v3340_v40 = vsel %vm3260_vm7, %v3209_v20, %v3324_v60 }
 0x9bc   :  { %7488 = vpow2.f32 %v3288_v23  ;;  %6767 = vmatpush3.bf16.xpose.msra.mxu1 %v9301_v53  ;;  %v3325_v9 = vmul.f32 1.6732632, %v5895_v45  ;;  %v3290_v62 = vmul.f32 1.442695, %v3228_v59  ;;  %v3358_v21 = vmul.f32 1.050701, %v3342_v27 }
 0x9bd   :  { %6768 = vmatprep.subr.bf16.mxu1 %v9316_v6  ;;  %v3343_v2 = vsel %vm3263_vm8, %v6691_v12, %v3327_v58  ;;  %7490 = vpow2.f32 %v3294_v16  ;;  %v3356_v15 = vmul.f32 1.050701, %v3340_v40  ;;  %vm3264_vm11 = vcmp.gt.f32.partialorder %v3225_v55, 0.0 }
 0x9be   :  { %v3359_v51 = vmul.f32 1.050701, %v3343_v2  ;;  %v3341_v34 = vsel %vm3261_vm9, %v3212_v24, %v3325_v9  ;;  %7492 = vpow2.f32 %v3290_v62  ;;  %vm3267_vm13 = vcmp.gt.f32.partialorder %v6695_v43, 0.0 }
 0x9bf   :  { %v3357_v10 = vmul.f32 1.050701, %v3341_v34  ;;  %vm3265_vm14 = vcmp.gt.f32.partialorder %v3228_v59, 0.0 }
 0x9c0   :  { %v3371_v19 = vpack.c.bf16 %v3359_v51, %v3358_v21 }
 0x9c1   :  { %v3370_v25 = vpack.c.bf16 %v3357_v10, %v3356_v15 }
 0x9c3   :  { %6720 = vmatprep.mubr.bf16.mxu1 %v3370_v25 }
 0x9c4   :  { %6769 = vmatpush3.bf16.xpose.msra.mxu1 %v9316_v6 }
 0x9c5   :  { %v7487_v53 = vpop.eup %7486  ;;  %6721 = vmatmul.mubr.bf16.gmra.mrb[116].mxu1 %v3371_v19  ;;  %6770 = vmatprep.subr.bf16.mxu1 %v9331_v33 }
 0x9c6   :  { %v7489_v20 = vpop.eup %7488  ;;  %v5900_v36 = vadd.f32 -1.0, %v7487_v53 }
 0x9c7   :  { %v5898_v12 = vadd.f32 -1.0, %v7489_v20  ;;  %v7491_v14 = vpop.eup %7490 }
 0x9c8   :  { %v3330_v11 = vmul.f32 1.6732632, %v5900_v36  ;;  %v9386_v44 = vpop.f32.mrb[124].mxu0  ;;  %v7493_v24 = vpop.eup %7492  ;;  %v5901_v61 = vadd.f32 -1.0, %v7491_v14 }
 0x9c9   :  { %v3328_v5 = vmul.f32 1.6732632, %v5898_v12  ;;  %v3300_v31 = vmul.f32 1.442695, %v9386_v44  ;;  %v5899_v39 = vadd.f32 -1.0, %v7493_v24  ;;  %v9389_v23 = vpop.f32.mrb[125].mxu0 }
 0x9ca   :  { %v3346_v6 = vsel %vm3266_vm10, %v6694_v0, %v3330_v11  ;;  %v3331_v60 = vmul.f32 1.6732632, %v5901_v61  ;;  %v9391_v45 = vpop.f32.mrb[126].mxu0  ;;  %v3296_v40 = vmul.f32 1.442695, %v9389_v23  ;;  %vm3270_vm15 = vcmp.gt.f32.partialorder %v9386_v44, 0.0 }
 0x9cb   :  { %7494 = vpow2.f32 %v3300_v31  ;;  %v3344_v27 = vsel %vm3264_vm11, %v3225_v55, %v3328_v5  ;;  %v3329_v58 = vmul.f32 1.6732632, %v5899_v39  ;;  %v3302_v9 = vmul.f32 1.442695, %v9391_v45  ;;  %v9396_v62 = vpop.f32.mrb[127].mxu0 }
 0x9cc   :  { %6771 = vmatpush3.bf16.xpose.msra.mxu1 %v9331_v33  ;;  %v3347_v16 = vsel %vm3267_vm13, %v6695_v43, %v3331_v60  ;;  %v3362_v0 = vmul.f32 1.050701, %v3346_v6  ;;  %v3298_v51 = vmul.f32 1.442695, %v9396_v62  ;;  %v3360_v55 = vmul.f32 1.050701, %v3344_v27 }
 0x9cd   :  { %6772 = vmatprep.subr.bf16.mxu1 %v9342_v32  ;;  %v3363_v2 = vmul.f32 1.050701, %v3347_v16  ;;  %v3345_v21 = vsel %vm3265_vm14, %v3228_v59, %v3329_v58  ;;  %7496 = vpow2.f32 %v3296_v40  ;;  %vm3268_vm0 = vcmp.gt.f32.partialorder %v9389_v23, 0.0 }
 0x9ce   :  { %v3361_v34 = vmul.f32 1.050701, %v3345_v21  ;;  %7498 = vpow2.f32 %v3302_v9  ;;  %vm3271_vm1 = vcmp.gt.f32.partialorder %v9391_v45, 0.0  ;;  %vm3269_vm2 = vcmp.gt.f32.partialorder %v9396_v62, 0.0 }
 0x9cf   :  { %v3373_v43 = vpack.c.bf16 %v3363_v2, %v3362_v0  ;;  %7500 = vpow2.f32 %v3298_v51 }
 0x9d0   :  { %v6750_v33 = vpop.f32.mrb[128].mxu0  ;;  %v3372_v19 = vpack.c.bf16 %v3361_v34, %v3360_v55 }
 0x9d1   :  { %v9400_v15 = vmul.f32 0.088388346, %v6750_v33  ;;  %v3603_v10 = vpop.f32.mrb[129].mxu0 }
 0x9d2   :  { %v6751_v25 = vpop.f32.mrb[130].mxu0  ;;  %v9402_v53 = vmul.f32 0.088388346, %v3603_v10  ;;  %6724 = vmatprep.mubr.bf16.mxu1 %v3372_v19 }
 0x9d3   :  { %v9404_v20 = vmul.f32 0.088388346, %v6751_v25  ;;  %v3606_v59 = vpop.f32.mrb[131].mxu0  ;;  %v3833_v36 = vsel %vm1801_vm12, %v9400_v15, -inf  ;;  %6725 = vmatmul.mubr.bf16.gmra.mrb[120].mxu1 %v3373_v43 }
 0x9d4   :  { %3834 = vmax.xlane.f32.xlu1 %v3833_v36  ;;  %v9408_v14 = vmul.f32 0.088388346, %v3606_v59  ;;  %6773 = vmatpush3.bf16.xpose.msra.mxu1 %v9342_v32  ;;  %v3827_v5 = vsel %vm1801_vm12, %v9402_v53, -inf }
 0x9d5   :  { %v7495_v12 = vpop.eup %7494  ;;  %v3836_v11 = vsel %vm1801_vm12, %v9404_v20, -inf  ;;  %6774 = vmatprep.subr.bf16.mxu1 %v9348_v7 }
 0x9d6   :  { %v5904_v24 = vadd.f32 -1.0, %v7495_v12  ;;  %3837 = vmax.xlane.f32.xlu0 %v3836_v11  ;;  %v3830_v32 = vsel %vm1801_vm12, %v9408_v14, -inf }
 0x9d7   :  { %v7497_v39 = vpop.eup %7496 }
 0x9d8   :  { %v3334_v61 = vmul.f32 1.6732632, %v5904_v24  ;;  %3828 = vmax.xlane.f32.xlu1 %v3827_v5  ;;  %v6754_v31 = vpop.f32.mrb[132].mxu0  ;;  %v7499_v27 = vpop.eup %7498  ;;  %v5902_v58 = vadd.f32 -1.0, %v7497_v39 }
 0x9d9   :  { %v9416_v6 = vmul.f32 0.088388346, %v6754_v31  ;;  %v3619_v60 = vpop.f32.mrb[133].mxu0  ;;  %v7501_v40 = vpop.eup %7500  ;;  %v5905_v0 = vadd.f32 -1.0, %v7499_v27 }
 0x9da   :  { %3831 = vmax.xlane.f32.xlu0 %v3830_v32  ;;  %v6755_v16 = vpop.f32.mrb[134].mxu0  ;;  %v3350_v9 = vsel %vm3270_vm15, %v9386_v44, %v3334_v61  ;;  %v3332_v51 = vmul.f32 1.6732632, %v5902_v58  ;;  %v5903_v55 = vadd.f32 -1.0, %v7501_v40  ;;  %v9424_v34 = vmul.f32 0.088388346, %v3619_v60 }
 0x9db   :  { %v9422_v2 = vmul.f32 0.088388346, %v6755_v16  ;;  %v3622_v21 = vpop.f32.mrb[135].mxu0  ;;  %v3845_v33 = vsel %vm1801_vm12, %v9416_v6, -inf  ;;  %v3335_v43 = vmul.f32 1.6732632, %v5905_v0 }
 0x9dc   :  { %v9429_v10 = vmul.f32 0.088388346, %v3622_v21  ;;  %6775 = vmatpush3.bf16.xpose.msra.mxu1 %v9348_v7  ;;  %3846 = vmax.xlane.f32.xlu1 %v3845_v33  ;;  %v3348_v19 = vsel %vm3268_vm0, %v9389_v23, %v3332_v51  ;;  %v3333_v25 = vmul.f32 1.6732632, %v5903_v55  ;;  %v3366_v59 = vmul.f32 1.050701, %v3350_v9 }
 0x9dd   :  { %v3848_v44 = vsel %vm1801_vm12, %v9422_v2, -inf  ;;  %6776 = vmatprep.subr.bf16.mxu1 %v9353_v3  ;;  %v3351_v36 = vsel %vm3271_vm1, %v9391_v45, %v3335_v43  ;;  %v3364_v12 = vmul.f32 1.050701, %v3348_v19  ;;  %v3839_v24 = vsel %vm1801_vm12, %v9424_v34, -inf }
 0x9de   :  { %3849 = vmax.xlane.f32.xlu0 %v3848_v44  ;;  %v3367_v11 = vmul.f32 1.050701, %v3351_v36  ;;  %v3349_v7 = vsel %vm3269_vm2, %v9396_v62, %v3333_v25  ;;  %v3842_v39 = vsel %vm1801_vm12, %v9429_v10, -inf }
 0x9df   :  { %v3365_v23 = vmul.f32 1.050701, %v3349_v7 }
 0x9e0   :  { %v6758_v5 = vpop.f32.mrb[136].mxu0  ;;  %3840 = vmax.xlane.f32.xlu1 %v3839_v24  ;;  %v3375_v60 = vpack.c.bf16 %v3367_v11, %v3366_v59 }
 0x9e1   :  { %v9442_v61 = vmul.f32 0.088388346, %v6758_v5  ;;  %v3635_v31 = vpop.f32.mrb[137].mxu0  ;;  %v3374_v32 = vpack.c.bf16 %v3365_v23, %v3364_v12 }
 0x9e2   :  { %3843 = vmax.xlane.f32.xlu0 %v3842_v39  ;;  %v6759_v45 = vpop.f32.mrb[138].mxu0  ;;  %v9450_v16 = vmul.f32 0.088388346, %v3635_v31 }
 0x9e3   :  { %v9446_v27 = vmul.f32 0.088388346, %v6759_v45  ;;  %v3638_v58 = vpop.f32.mrb[139].mxu0  ;;  %v3857_v62 = vsel %vm1801_vm12, %v9442_v61, -inf  ;;  %6728 = vmatprep.mubr.bf16.mxu1 %v3374_v32 }
 0x9e4   :  { %6777 = vmatpush3.bf16.xpose.msra.mxu1 %v9353_v3  ;;  %3858 = vmax.xlane.f32.xlu1 %v3857_v62  ;;  %v9455_v9 = vmul.f32 0.088388346, %v3638_v58  ;;  %v3851_v21 = vsel %vm1801_vm12, %v9450_v16, -inf  ;;  %v7638_v62 = vld [vmem:[%s10304_s9 + $0x10] sm:$0xff] }
 0x9e5   :  { %v3860_v40 = vsel %vm1801_vm12, %v9446_v27, -inf  ;;  %6729 = vmatmul.mubr.bf16.gmra.mrb[124].mxu1 %v3375_v60  ;;  %6778 = vmatprep.subr.bf16.mxu1 %v9358_v35 }
 0x9e6   :  { %6780 = vmatprep.mubr.bf16.mxu1 %v9286_v52  ;;  %3861 = vmax.xlane.f32.xlu0 %v3860_v40  ;;  %v3854_v33 = vsel %vm1801_vm12, %v9455_v9, -inf }
 0x9e8   :  { %v9459_v0 = vpop.f32.mrb[140].mxu0  ;;  %3852 = vmax.xlane.f32.xlu1 %v3851_v21 }
 0x9e9   :  { %v3651_v51 = vpop.f32.mrb[141].mxu0 }
 0x9ea   :  { %v9463_v3 = vmul.f32 0.088388346, %v3651_v51  ;;  %v9465_v55 = vpop.f32.mrb[142].mxu0  ;;  %3855 = vmax.xlane.f32.xlu0 %v3854_v33  ;;  %v7639_v51 = vld [vmem:[%s10304_s9 + $0x18] sm:$0xff] }
 0x9eb   :  { %v3654_v43 = vpop.f32.mrb[143].mxu0 }
 0x9ec   :  { %v9469_v44 = vmul.f32 0.088388346, %v3654_v43  ;;  %v3863_v52 = vsel %vm1801_vm12, %v9463_v3, -inf  ;;  %6779 = vmatpush3.bf16.xpose.msra.mxu1 %v9358_v35  ;;  %v7640_v43 = vld [vmem:[%s10304_s9] sm:$0xff] }
 0x9ed   :  { %3864 = vmax.xlane.f32.xlu1 %v3863_v52 }
 0x9ee   :  { %v3866_v19 = vsel %vm1801_vm12, %v9469_v44, -inf }
 0x9ef   :  { %3867 = vmax.xlane.f32.xlu0 %v3866_v19 }
 0x9f3   :  { %6781 = vmatmul.mubr.bf16.vlgmr.msra.gmra.mrb[128].mxu1 %v9296_v49 }
 0x9f4   :  { %6784 = vmatprep.mubr.bf16.mxu1 %v9311_v17 }
 0x9fb   :  { %6785 = vmatmul.mubr.bf16.gmra.mrb[132].mxu1 %v9326_v57 }
 0x9fc   :  { %6788 = vmatprep.mubr.bf16.mxu1 %v9337_v8 }
 0xa03   :  { %6789 = vmatmul.mubr.bf16.gmra.mrb[136].mxu1 %v9345_v46 }
 0xa04   :  { %6792 = vmatprep.mubr.bf16.mxu1 %v9351_v18 }
 0xa0b   :  { %6793 = vmatmul.mubr.bf16.gmra.mrb[140].mxu1 %v9356_v56 }
 0xa86   :  { %v9483_v35 = vpop.f32.mrb[112].mxu1 }
 0xa87   :  { %v9485_v25 = vpop.f32.mrb[113].mxu1 }
 0xa88   :  { %10352 = vst [vmem:[#allocation34_spill] sm:$0xff] %v9485_v25  ;;  %v9487_v59 = vpop.f32.mrb[114].mxu1 }
 0xa89   :  { %10353 = vst [vmem:[#allocation32_spill] sm:$0xff] %v9487_v59  ;;  %v9489_v36 = vpop.f32.mrb[115].mxu1 }
 0xa8a   :  { %10354 = vst [vmem:[#allocation37_spill] sm:$0xff] %v9489_v36 }
 0xa98   :  { %v9491_v49 = vpop.f32.mrb[116].mxu1 }
 0xa99   :  { %10355 = vst [vmem:[#allocation35_spill] sm:$0xff] %v9491_v49  ;;  %v9493_v17 = vpop.f32.mrb[117].mxu1 }
 0xa9a   :  { %10356 = vst [vmem:[#allocation38_spill] sm:$0xff] %v9493_v17  ;;  %v9495_v57 = vpop.f32.mrb[118].mxu1 }
 0xa9b   :  { %10357 = vst [vmem:[#allocation36_spill] sm:$0xff] %v9495_v57  ;;  %v9497_v8 = vpop.f32.mrb[119].mxu1 }
 0xa9c   :  { %10358 = vst [vmem:[#allocation41_spill] sm:$0xff] %v9497_v8 }
 0xaa6   :  { %v9499_v46 = vpop.f32.mrb[120].mxu1 }
 0xaa7   :  { %10359 = vst [vmem:[#allocation39_spill] sm:$0xff] %v9499_v46  ;;  %v9501_v18 = vpop.f32.mrb[121].mxu1 }
 0xaa8   :  { %10360 = vst [vmem:[#allocation42_spill] sm:$0xff] %v9501_v18  ;;  %v9503_v56 = vpop.f32.mrb[122].mxu1 }
 0xaa9   :  { %10361 = vst [vmem:[#allocation40_spill] sm:$0xff] %v9503_v56  ;;  %v9505_v12 = vpop.f32.mrb[123].mxu1 }
 0xaaa   :  { %10362 = vst [vmem:[#allocation45_spill] sm:$0xff] %v9505_v12 }
 0xab8   :  { %v9507_v11 = vpop.f32.mrb[124].mxu1 }
 0xab9   :  { %10363 = vst [vmem:[#allocation43_spill] sm:$0xff] %v9507_v11  ;;  %v9509_v7 = vpop.f32.mrb[125].mxu1 }
 0xaba   :  { %10364 = vst [vmem:[#allocation46_spill] sm:$0xff] %v9509_v7  ;;  %v9511_v24 = vpop.f32.mrb[126].mxu1 }
 0xabb   :  { %10365 = vst [vmem:[#allocation44_spill] sm:$0xff] %v9511_v24  ;;  %v9513_v5 = vpop.f32.mrb[127].mxu1 }
 0xabc   :  { %10366 = vst [vmem:[#allocation61_spill] sm:$0xff] %v9513_v5 }
 0xac6   :  { %v6782_v23 = vpop.f32.mrb[128].mxu1 }
 0xac7   :  { %v3789_v31 = vmul.f32 0.088388346, %v6782_v23  ;;  %v3724_v39 = vpop.f32.mrb[129].mxu1  ;;  %v7641_v23 = vld [vmem:[%s10304_s9 + $0x8] sm:$0xff] }
 0xac8   :  { %v6783_v45 = vpop.f32.mrb[130].mxu1  ;;  %v3787_v60 = vmul.f32 0.088388346, %v3724_v39 }
 0xac9   :  { %v3790_v32 = vmul.f32 0.088388346, %v6783_v45  ;;  %v3727_v58 = vpop.f32.mrb[131].mxu1  ;;  %v9518_v40 = vadd.f32 %v7638_v62, %v3789_v31 }
 0xaca   :  { %v3788_v21 = vmul.f32 0.088388346, %v3727_v58  ;;  %v9530_v52 = vadd.f32 %v7640_v43, %v3787_v60  ;;  %v7642_v60 = vld [vmem:[%s10304_s9 + $0x30] sm:$0xff] }
 0xacb   :  { %3879 = vmax.xlane.f32.xlu1 %v9518_v40  ;;  %v9524_v33 = vadd.f32 %v7639_v51, %v3790_v32 }
 0xacc   :  { %v9535_v31 = vadd.f32 %v7641_v23, %v3788_v21  ;;  %v7643_v21 = vld [vmem:[%s10304_s9 + $0x38] sm:$0xff] }
 0xacd   :  { %3881 = vmax.xlane.f32.xlu0 %v9524_v33 }
 0xace   :  { %v6786_v19 = vpop.f32.mrb[132].mxu1 }
 0xacf   :  { %v3793_v39 = vmul.f32 0.088388346, %v6786_v19  ;;  %3875 = vmax.xlane.f32.xlu1 %v9530_v52  ;;  %v3740_v45 = vpop.f32.mrb[133].mxu1 }
 0xad0   :  { %v6787_v32 = vpop.f32.mrb[134].mxu1  ;;  %v3791_v58 = vmul.f32 0.088388346, %v3740_v45  ;;  %v7644_v45 = vld [vmem:[%s10304_s9 + $0x20] sm:$0xff] }
 0xad1   :  { %v3794_v62 = vmul.f32 0.088388346, %v6787_v32  ;;  %3877 = vmax.xlane.f32.xlu0 %v9535_v31  ;;  %v3743_v51 = vpop.f32.mrb[135].mxu1  ;;  %v9542_v43 = vadd.f32 %v7642_v60, %v3793_v39  ;;  %v7645_v39 = vld [vmem:[%s10304_s9 + $0x28] sm:$0xff] }
 0xad2   :  { %v3792_v23 = vmul.f32 0.088388346, %v3743_v51  ;;  %v9553_v32 = vadd.f32 %v7644_v45, %v3791_v58 }
 0xad3   :  { %v9547_v19 = vadd.f32 %v7643_v21, %v3794_v62  ;;  %3887 = vmax.xlane.f32.xlu1 %v9542_v43 }
 0xad4   :  { %v9559_v60 = vadd.f32 %v7645_v39, %v3792_v23  ;;  %v7647_v23 = vld [vmem:[%s10304_s9 + $0x58] sm:$0xff] }
 0xad5   :  { %3889 = vmax.xlane.f32.xlu0 %v9547_v19 }
 0xad6   :  { %v6790_v37 = vpop.f32.mrb[136].mxu1 }
 0xad7   :  { %v3797_v62 = vmul.f32 0.088388346, %v6790_v37  ;;  %3883 = vmax.xlane.f32.xlu1 %v9553_v32  ;;  %v3756_v51 = vpop.f32.mrb[137].mxu1 }
 0xad8   :  { %v6791_v21 = vpop.f32.mrb[138].mxu1  ;;  %v3795_v45 = vmul.f32 0.088388346, %v3756_v51 }
 0xad9   :  { %v9565_v58 = vadd.f32 %v7646_v50, %v3797_v62  ;;  %v3798_v38 = vmul.f32 0.088388346, %v6791_v21  ;;  %3885 = vmax.xlane.f32.xlu0 %v9559_v60  ;;  %v3759_v63 = vpop.f32.mrb[139].mxu1  ;;  %v9581_v62 = vmul.f32 0.088388346, %v9459_v0 }
 0xada   :  { %v3796_v39 = vmul.f32 0.088388346, %v3759_v63  ;;  %v9577_v50 = vadd.f32 %v7648_v22, %v3795_v45 }
 0xadb   :  { %v9571_v37 = vadd.f32 %v7647_v23, %v3798_v38  ;;  %3895 = vmax.xlane.f32.xlu1 %v9565_v58  ;;  %v7649_v38 = vld [vmem:[%s10304_s9 + $0x48] sm:$0xff]  ;;  %v9590_v23 = vmul.f32 0.088388346, %v9465_v55  ;;  %v3869_v0 = vsel %vm1801_vm12, %v9581_v62, -inf }
 0xadc   :  { %v9586_v21 = vadd.f32 %v7649_v38, %v3796_v39 }
 0xadd   :  { %3897 = vmax.xlane.f32.xlu0 %v9571_v37  ;;  %v3872_v39 = vsel %vm1801_vm12, %v9590_v23, -inf }
 0xade   :  { %v6794_v51 = vpop.f32.mrb[140].mxu1 }
 0xadf   :  { %3891 = vmax.xlane.f32.xlu1 %v9577_v50  ;;  %v3772_v63 = vpop.f32.mrb[141].mxu1  ;;  %v3801_v38 = vmul.f32 0.088388346, %v6794_v51 }
 0xae0   :  { %v6795_v22 = vpop.f32.mrb[142].mxu1  ;;  %v3799_v45 = vmul.f32 0.088388346, %v3772_v63 }
 0xae1   :  { %3893 = vmax.xlane.f32.xlu0 %v9586_v21  ;;  %v3775_v47 = vpop.f32.mrb[143].mxu1  ;;  %v3802_v63 = vmul.f32 0.088388346, %v6795_v22 }
 0xae2   :  { %v3800_v4 = vmul.f32 0.088388346, %v3775_v47  ;;  %v9600_v55 = vadd.f32 %v7650_v54, %v3799_v45  ;;  %v7652_v47 = vld [vmem:[%s10304_s9 + $0x70] sm:$0xff]  ;;  %v7653_v54 = vld [vmem:[%s10304_s9 + $0x78] sm:$0xff]  ;;  %v3838_v45 = vpop.xlane.xlu0 %3837 }
 0xae3   :  { %3870 = vmax.xlane.f32.xlu1 %v3869_v0  ;;  %v9611_v51 = vadd.f32 %v7652_v47, %v3801_v38  ;;  %v9617_v22 = vadd.f32 %v7653_v54, %v3802_v63 }
 0xae4   :  { %v9605_v41 = vadd.f32 %v7651_v29, %v3800_v4  ;;  %v9624_v29 = vld [vmem:[%s10201_s16] sm:$0xff]   ;;  %v3835_v4 = vpop.xlane.xlu1 %3834  ;;  %s7976_s16 = smov [#allocation22]  }
 0xae5   :  { %3873 = vmax.xlane.f32.xlu0 %v3872_v39  ;;  %6828 = vmatprep.subr.bf16.mxu0 %v9624_v29  ;;  %s5698_s9 = sshll.u32 %s7976_s16, 4  ;;  %s5699_s9 = int_to_ptr.vmem [resolvable:$true] %s5698_s9 }
 0xae6   :  { %v3832_v39 = vpop.xlane.xlu0 %3831  ;;  %s7918_s3 = scalar_lea.vmem %s5699_s9, 64  ;;  %p7923_p13 = scmp.lt.s32.totalorder %s5699_s9, %s5699_s9 }
 0xae7   :  { %3899 = vmax.xlane.f32.xlu1 %v9600_v55  ;;  %p7919_p12 = scmp.ne.s32.totalorder %s5699_s9, %s7918_s3  ;;  %p7924_p0 = scmp.lt.s32.totalorder %s7918_s3, %s7918_s3 }
 0xae8   :  { %v3829_v0 = vpop.xlane.xlu1 %3828 }
 0xae9   :  { %3901 = vmax.xlane.f32.xlu0 %v9605_v41  ;;  %p7925_p1 = por %p7924_p0, %p7923_p13 }
 0xaea   :  { %v3850_v47 = vpop.xlane.xlu0 %3849 }
 0xaeb   :  { %3903 = vmax.xlane.f32.xlu1 %v9611_v51  ;;  %p7926_p2 = pnand %p7925_p1, %p7919_p12 }
 0xaec   :  { %v3847_v38 = vpop.xlane.xlu1 %3846 }
 0xaed   :  { %3905 = vmax.xlane.f32.xlu0 %v9617_v22 }
 0xaee   :  { %v3844_v63 = vpop.xlane.xlu0 %3843 }
 0xaf0   :  { %v3841_v30 = vpop.xlane.xlu1 %3840 }
 0xaf2   :  { %v3862_v13 = vpop.xlane.xlu0 %3861 }
 0xaf4   :  { %v3859_v54 = vpop.xlane.xlu1 %3858 }
 0xaf6   :  { %v9629_v42 = vpop.xlane.xlu0 %3855 }
 0xaf8   :  { %v9627_v28 = vpop.xlane.xlu1 %3852 }
 0xafa   :  { %v9633_v1 = vpop.xlane.xlu0 %3867 }
 0xafc   :  { %v9631_v48 = vpop.xlane.xlu1 %3864 }
 0xb58   :  { %v3880_v5 = vpop.xlane.xlu1 %3879 }
 0xb59   :  { %v3909_v24 = vmax.f32 %v3835_v4, %v3880_v5 }
 0xb5a   :  { %v3882_v7 = vpop.xlane.xlu0 %3881 }
 0xb5b   :  { %v3973_v11 = vsub.f32 %v9518_v40, %v3909_v24  ;;  %v3910_v12 = vmax.f32 %v3838_v45, %v3882_v7  ;;  %v3925_v8 = vsub.f32 %v9400_v15, %v3909_v24 }
 0xb5c   :  { %v3876_v56 = vpop.xlane.xlu1 %3875 }
 0xb5d   :  { %v3991_v18 = vmul.f32 1.442695, %v3973_v11  ;;  %v3974_v46 = vsub.f32 %v9524_v33, %v3910_v12  ;;  %v3907_v57 = vmax.f32 %v3829_v0, %v3876_v56  ;;  %v3926_v59 = vsub.f32 %v9404_v20, %v3910_v12 }
 0xb5e   :  { %v3878_v17 = vpop.xlane.xlu0 %3877  ;;  %v3943_v40 = vmul.f32 1.442695, %v3925_v8 }
 0xb5f   :  { %v3993_v49 = vmul.f32 1.442695, %v3974_v46  ;;  %v3908_v36 = vmax.f32 %v3832_v39, %v3878_v17  ;;  %7502 = vpow2.f32 %v3991_v18  ;;  %v3971_v25 = vsub.f32 %v9530_v52, %v3907_v57 }
 0xb60   :  { %v3888_v5 = vpop.xlane.xlu1 %3887  ;;  %v3923_v11 = vsub.f32 %v9402_v53, %v3907_v57  ;;  %v3945_v15 = vmul.f32 1.442695, %v3926_v59 }
 0xb61   :  { %v3972_v4 = vsub.f32 %v9535_v31, %v3908_v36  ;;  %7504 = vpow2.f32 %v3993_v49  ;;  %v3987_v7 = vmul.f32 1.442695, %v3971_v25  ;;  %v3924_v56 = vsub.f32 %v9408_v14, %v3908_v36 }
 0xb62   :  { %v3890_v33 = vpop.xlane.xlu0 %3889  ;;  %v3913_v18 = vmax.f32 %v3847_v38, %v3888_v5  ;;  %v3939_v12 = vmul.f32 1.442695, %v3923_v11 }
 0xb63   :  { %v3989_v45 = vmul.f32 1.442695, %v3972_v4  ;;  %v3914_v46 = vmax.f32 %v3850_v47, %v3890_v33  ;;  %7506 = vpow2.f32 %v3987_v7  ;;  %v3941_v59 = vmul.f32 1.442695, %v3924_v56 }
 0xb64   :  { %v3884_v17 = vpop.xlane.xlu1 %3883  ;;  %7508 = vpow2.f32 %v3943_v40  ;;  %v3977_v36 = vsub.f32 %v9542_v43, %v3913_v18 }
 0xb65   :  { %v9643_v20 = vmax.f32 %v3841_v30, %v3884_v17  ;;  %v3978_v24 = vsub.f32 %v9547_v19, %v3914_v46  ;;  %7510 = vpow2.f32 %v3989_v45  ;;  %v3929_v19 = vsub.f32 %v9416_v6, %v3913_v18 }
 0xb66   :  { %v3886_v8 = vpop.xlane.xlu0 %3885  ;;  %7512 = vpow2.f32 %v3945_v15  ;;  %v3999_v43 = vmul.f32 1.442695, %v3977_v36 }
 0xb67   :  { %v3975_v53 = vsub.f32 %v9553_v32, %v9643_v20  ;;  %v9648_v25 = vmax.f32 %v3844_v63, %v3886_v8  ;;  %v4001_v49 = vmul.f32 1.442695, %v3978_v24  ;;  %7514 = vpow2.f32 %v3939_v12 }
 0xb68   :  { %v3896_v14 = vpop.xlane.xlu1 %3895  ;;  %7516 = vpow2.f32 %v3941_v59  ;;  %v3951_v5 = vmul.f32 1.442695, %v3929_v19  ;;  %v3927_v15 = vsub.f32 %v9424_v34, %v9643_v20 }
 0xb69   :  { %v7503_v57 = vpop.eup %7502  ;;  %v3995_v30 = vmul.f32 1.442695, %v3975_v53  ;;  %v3976_v52 = vsub.f32 %v9559_v60, %v9648_v25  ;;  %v9656_v38 = vmax.f32 %v3859_v54, %v3896_v14  ;;  %7518 = vpow2.f32 %v4001_v49 }
 0xb6a   :  { %v3898_v31 = vpop.xlane.xlu0 %3897  ;;  %4071 = vadd.xlane.f32.xlu1 %v7503_v57  ;;  %v3930_v54 = vsub.f32 %v9422_v2, %v3914_v46  ;;  %v3928_v18 = vsub.f32 %v9429_v10, %v9648_v25  ;;  %v3947_v59 = vmul.f32 1.442695, %v3927_v15 }
 0xb6b   :  { %v9654_v0 = vmax.f32 %v3862_v13, %v3898_v31  ;;  %v7505_v32 = vpop.eup %7504  ;;  %v3997_v39 = vmul.f32 1.442695, %v3976_v52  ;;  %7520 = vpow2.f32 %v3995_v30  ;;  %v3981_v40 = vsub.f32 %v9565_v58, %v9656_v38 }
 0xb6c   :  { %v3892_v47 = vpop.xlane.xlu1 %3891  ;;  %4073 = vadd.xlane.f32.xlu0 %v7505_v32  ;;  %v3953_v17 = vmul.f32 1.442695, %v3930_v54  ;;  %v4124_v34 = vpack.c.bf16 %v7505_v32, %v7503_v57  ;;  %v3949_v57 = vmul.f32 1.442695, %v3928_v18 }
 0xb6d   :  { %v3982_v63 = vsub.f32 %v9571_v37, %v9654_v0  ;;  %v9661_v60 = vmax.f32 %v9627_v28, %v3892_v47  ;;  %v7507_v13 = vpop.eup %7506  ;;  %7522 = vpow2.f32 %v3997_v39  ;;  %v4007_v12 = vmul.f32 1.442695, %v3981_v40 }
 0xb6e   :  { %v3894_v6 = vpop.xlane.xlu0 %3893  ;;  %v9663_v4 = vpop.eup %7508  ;;  %4067 = vadd.xlane.f32.xlu1 %v7507_v13  ;;  %7524 = vpow2.f32 %v3999_v43 }
 0xb6f   :  { %v3979_v11 = vsub.f32 %v9577_v50, %v9661_v60  ;;  %v9671_v37 = vmax.f32 %v9629_v42, %v3894_v6  ;;  %v7511_v7 = vpop.eup %7510  ;;  %v4009_v33 = vmul.f32 1.442695, %v3982_v63  ;;  %7526 = vpow2.f32 %v3951_v5 }
 0xb70   :  { %v3871_v28 = vpop.xlane.xlu1 %3870  ;;  %v9673_v45 = vpop.eup %7512  ;;  %4069 = vadd.xlane.f32.xlu0 %v7511_v7  ;;  %v4123_v50 = vpack.c.bf16 %v7511_v7, %v7507_v13  ;;  %v4025_v42 = vsel %vm1801_vm12, %v9663_v4, 0.0  ;;  %v3933_v5 = vsub.f32 %v9442_v61, %v9656_v38 }
 0xb71   :  { %v4003_v2 = vmul.f32 1.442695, %v3979_v11  ;;  %v3980_v58 = vsub.f32 %v9586_v21, %v9671_v37  ;;  %v9681_v46 = vpop.eup %7514  ;;  %7528 = vpow2.f32 %v4009_v33  ;;  %v4028_v21 = vsel %vm1801_vm12, %v9673_v45, 0.0 }
 0xb72   :  { %v3874_v56 = vpop.xlane.xlu0 %3873  ;;  %4026 = vadd.xlane.f32.xlu1 %v4025_v42  ;;  %6812 = vmatprep.mubr.bf16.mxu0 %v4123_v50  ;;  %v9690_v53 = vpop.eup %7516  ;;  %v4019_v36 = vsel %vm1801_vm12, %v9681_v46, 0.0  ;;  %v3959_v15 = vmul.f32 1.442695, %v3933_v5  ;;  %v7222_v5 = vld [vmem:[#allocation11 + $0x8] sm:$0xff]  }
 0xb73   :  { %v4005_v24 = vmul.f32 1.442695, %v3980_v58  ;;  %7530 = vpow2.f32 %v4003_v2  ;;  %6813 = vmatmul.mubr.bf16.vlgmr.msra.gmra.mrb[144].mxu0 %v4124_v34  ;;  %v7519_v25 = vpop.eup %7518 }
 0xb74   :  { %v3900_v20 = vpop.xlane.xlu1 %3899  ;;  %4029 = vadd.xlane.f32.xlu0 %v4028_v21  ;;  %6829 = vmatpush3.bf16.msra.mxu0 %v9624_v29 }
 0xb75   :  { %v9686_v8 = vmax.f32 %v9631_v48, %v3900_v20  ;;  %7532 = vpow2.f32 %v4005_v24  ;;  %v7521_v49 = vpop.eup %7520 }
 0xb76   :  { %v3902_v10 = vpop.xlane.xlu0 %3901  ;;  %7534 = vpow2.f32 %v3953_v17  ;;  %4020 = vadd.xlane.f32.xlu1 %v4019_v36 }
 0xb77   :  { %v3983_v14 = vsub.f32 %v9600_v55, %v9686_v8  ;;  %v9697_v48 = vmax.f32 %v9633_v1, %v3902_v10  ;;  %v7523_v52 = vpop.eup %7522  ;;  %7536 = vpow2.f32 %v4007_v12  ;;  %v4022_v55 = vsel %vm1801_vm12, %v9690_v53, 0.0 }
 0xb78   :  { %v3904_v30 = vpop.xlane.xlu1 %3903  ;;  %7538 = vpow2.f32 %v3947_v59  ;;  %4023 = vadd.xlane.f32.xlu0 %v4022_v55  ;;  %v4125_v1 = vpack.c.bf16 %v7523_v52, %v7521_v49  ;;  %v7525_v39 = vpop.eup %7524  ;;  %v3935_v59 = vsub.f32 %v9463_v3, %v9686_v8 }
 0xb79   :  { %v4011_v31 = vmul.f32 1.442695, %v3983_v14  ;;  %v3984_v19 = vsub.f32 %v9605_v41, %v9697_v48  ;;  %v9704_v32 = vmax.f32 %v3871_v28, %v3904_v30  ;;  %7540 = vpow2.f32 %v3949_v57  ;;  %v9710_v6 = vpop.eup %7526 }
 0xb7a   :  { %v3906_v29 = vpop.xlane.xlu0 %3905  ;;  %6816 = vmatprep.mubr.bf16.mxu0 %v4125_v1  ;;  %4079 = vadd.xlane.f32.xlu1 %v7525_v39  ;;  %v4126_v41 = vpack.c.bf16 %v7519_v25, %v7525_v39  ;;  %v4037_v2 = vsel %vm1801_vm12, %v9710_v6, 0.0  ;;  %v4115_v14 = vpack.c.bf16 %v9690_v53, %v9681_v46  ;;  %v3963_v57 = vmul.f32 1.442695, %v3935_v59 }
 0xb7b   :  { %v4013_v47 = vmul.f32 1.442695, %v3984_v19  ;;  %v9706_v43 = vmax.f32 %v3874_v56, %v3906_v29  ;;  %v3985_v63 = vsub.f32 %v9611_v51, %v9704_v32  ;;  %7542 = vpow2.f32 %v4011_v31  ;;  %v7529_v40 = vpop.eup %7528 }
 0xb7c   :  { %6817 = vmatmul.mubr.bf16.gmra.mrb[148].mxu0 %v4126_v41  ;;  %4081 = vadd.xlane.f32.xlu0 %v7519_v25  ;;  %v3934_v51 = vsub.f32 %v9446_v27, %v9654_v0  ;;  %v3932_v27 = vsub.f32 %v9455_v9, %v9671_v37  ;;  %v3937_v34 = vsub.f32 %v9581_v62, %v9704_v32 }
 0xb7d   :  { %v3986_v13 = vsub.f32 %v9617_v22, %v9706_v43  ;;  %7544 = vpow2.f32 %v4013_v47  ;;  %v4015_v54 = vmul.f32 1.442695, %v3985_v63  ;;  %v7531_v28 = vpop.eup %7530  ;;  %v3931_v22 = vsub.f32 %v9450_v16, %v9661_v60 }
 0xb7e   :  { %4075 = vadd.xlane.f32.xlu1 %v7521_v49  ;;  %v3961_v58 = vmul.f32 1.442695, %v3934_v51  ;;  %v3957_v12 = vmul.f32 1.442695, %v3932_v27  ;;  %v3938_v24 = vsub.f32 %v9590_v23, %v9706_v43  ;;  %v3967_v10 = vmul.f32 1.442695, %v3937_v34 }
 0xb7f   :  { %v4017_v11 = vmul.f32 1.442695, %v3986_v13  ;;  %v7533_v7 = vpop.eup %7532  ;;  %7546 = vpow2.f32 %v4015_v54  ;;  %v3955_v60 = vmul.f32 1.442695, %v3931_v22  ;;  %v3936_v62 = vsub.f32 %v9469_v44, %v9697_v48  ;;  %v7221_v13 = vld [vmem:[#allocation11] sm:$0xff]   ;;  %v7223_v54 = vld [vmem:[#allocation11 + $0x10] sm:$0xff]  }
 0xb80   :  { %v9718_v33 = vpop.eup %7534  ;;  %4077 = vadd.xlane.f32.xlu0 %v7523_v52  ;;  %v4127_v61 = vpack.c.bf16 %v7533_v7, %v7531_v28  ;;  %v3969_v49 = vmul.f32 1.442695, %v3938_v24  ;;  %v4116_v44 = vpack.c.bf16 %v9673_v45, %v9663_v4  ;;  %6846 = vmatprep.subr.bf16.mxu1 %v7221_v13  ;;  %v7227_v51 = vld [vmem:[#allocation11 + $0x30] sm:$0xff]  }
 0xb81   :  { %v7537_v38 = vpop.eup %7536  ;;  %7548 = vpow2.f32 %v4017_v11  ;;  %v4040_v50 = vsel %vm1801_vm12, %v9718_v33, 0.0  ;;  %v3965_v30 = vmul.f32 1.442695, %v3936_v62  ;;  %v4118_v4 = vpack.c.bf16 %v9718_v33, %v9710_v6  ;;  %6847 = vmatpush3.bf16.msra.mxu1 %v7221_v13  ;;  %v7225_v11 = vld [vmem:[#allocation11 + $0x20] sm:$0xff]  }
 0xb82   :  { %v7539_v56 = vpop.eup %7538  ;;  %6820 = vmatprep.mubr.bf16.mxu0 %v4127_v61  ;;  %4038 = vadd.xlane.f32.xlu1 %v4037_v2  ;;  %v4128_v0 = vpack.c.bf16 %v7529_v40, %v7537_v38  ;;  %7550 = vpow2.f32 %v3959_v15  ;;  %v7229_v33 = vld [vmem:[%s10203_s18] ss:$8 sps:$4 sm:$0xff]   ;;  %v7231_v15 = vld [vmem:[%s10203_s18 + $0x4] ss:$8 sps:$4 sm:$0xff]  }
 0xb83   :  { %v7541_v16 = vpop.eup %7540  ;;  %v4031_v17 = vsel %vm1801_vm12, %v7539_v56, 0.0  ;;  %7552 = vpow2.f32 %v3961_v58  ;;  %6848 = vmatprep.subr.bf16.mxu1 %v7222_v5  ;;  %4772 = vmatprep.subr.bf16.mxu0 %v7231_v15 }
 0xb84   :  { %6821 = vmatmul.mubr.bf16.gmra.mrb[152].mxu0 %v4128_v0  ;;  %4041 = vadd.xlane.f32.xlu0 %v4040_v50  ;;  %v4034_v9 = vsel %vm1801_vm12, %v7541_v16, 0.0  ;;  %7554 = vpow2.f32 %v3955_v60  ;;  %v4117_v52 = vpack.c.bf16 %v7541_v16, %v7539_v56 }
 0xb85   :  { %v7543_v42 = vpop.eup %7542  ;;  %7556 = vpow2.f32 %v3957_v12  ;;  %6849 = vmatpush3.bf16.msra.mxu1 %v7222_v5  ;;  %v10367_v5 = vld [vmem:[#allocation34_spill] sm:$0xff] }
 0xb86   :  { %4032 = vadd.xlane.f32.xlu1 %v4031_v17  ;;  %7558 = vpow2.f32 %v3967_v10  ;;  %6850 = vmatprep.subr.bf16.mxu1 %v7223_v54 }
 0xb87   :  { %v7545_v18 = vpop.eup %7544  ;;  %7560 = vpow2.f32 %v3969_v49 }
 0xb88   :  { %v4129_v37 = vpack.c.bf16 %v7545_v18, %v7543_v42  ;;  %4035 = vadd.xlane.f32.xlu0 %v4034_v9  ;;  %7562 = vpow2.f32 %v3963_v57 }
 0xb89   :  { %v7547_v20 = vpop.eup %7546  ;;  %7564 = vpow2.f32 %v3965_v30  ;;  %6851 = vmatpush3.bf16.msra.mxu1 %v7223_v54 }
 0xb8a   :  { %6824 = vmatprep.mubr.bf16.mxu0 %v4129_v37  ;;  %4087 = vadd.xlane.f32.xlu1 %v7537_v38 }
 0xb8b   :  { %v7549_v21 = vpop.eup %7548 }
 0xb8c   :  { %4089 = vadd.xlane.f32.xlu0 %v7529_v40  ;;  %v4130_v25 = vpack.c.bf16 %v7549_v21, %v7547_v20  ;;  %v7551_v36 = vpop.eup %7550  ;;  %v7224_v40 = vld [vmem:[#allocation11 + $0x18] sm:$0xff]  }
 0xb8d   :  { %v7553_v23 = vpop.eup %7552  ;;  %v4049_v3 = vsel %vm1801_vm12, %v7551_v36, 0.0  ;;  %6852 = vmatprep.subr.bf16.mxu1 %v7224_v40 }
 0xb8e   :  { %4083 = vadd.xlane.f32.xlu1 %v7531_v28  ;;  %6825 = vmatmul.mubr.bf16.gmra.mrb[156].mxu0 %v4130_v25  ;;  %v7555_v8 = vpop.eup %7554  ;;  %v4052_v46 = vsel %vm1801_vm12, %v7553_v23, 0.0  ;;  %v4120_v63 = vpack.c.bf16 %v7553_v23, %v7551_v36  ;;  %v7226_v28 = vld [vmem:[#allocation11 + $0x28] sm:$0xff]  }
 0xb8f   :  { %6830 = vmatprep.mubr.msk.bf16.mxu0 %vm1801_vm12, %v4115_v14  ;;  %v7557_v53 = vpop.eup %7556  ;;  %v4043_v48 = vsel %vm1801_vm12, %v7555_v8, 0.0  ;;  %6853 = vmatpush3.bf16.msra.mxu1 %v7224_v40 }
 0xb90   :  { %4085 = vadd.xlane.f32.xlu0 %v7533_v7  ;;  %v4046_v31 = vsel %vm1801_vm12, %v7557_v53, 0.0  ;;  %v7559_v19 = vpop.eup %7558  ;;  %v4119_v32 = vpack.c.bf16 %v7557_v53, %v7555_v8  ;;  %6854 = vmatprep.subr.bf16.mxu1 %v7225_v11  ;;  %v7228_v7 = vld [vmem:[#allocation11 + $0x38] sm:$0xff]  }
 0xb91   :  { %v7561_v55 = vpop.eup %7560  ;;  %v4061_v45 = vsel %vm1801_vm12, %v7559_v19, 0.0 }
 0xb92   :  { %4050 = vadd.xlane.f32.xlu1 %v4049_v3  ;;  %v7563_v1 = vpop.eup %7562  ;;  %v4064_v29 = vsel %vm1801_vm12, %v7561_v55, 0.0  ;;  %v4122_v6 = vpack.c.bf16 %v7561_v55, %v7559_v19 }
 0xb93   :  { %v7565_v39 = vpop.eup %7564  ;;  %v4055_v47 = vsel %vm1801_vm12, %v7563_v1, 0.0  ;;  %6855 = vmatpush3.bf16.msra.mxu1 %v7225_v11 }
 0xb94   :  { %4053 = vadd.xlane.f32.xlu0 %v4052_v46  ;;  %v4058_v43 = vsel %vm1801_vm12, %v7565_v39, 0.0  ;;  %v4121_v41 = vpack.c.bf16 %v7565_v39, %v7563_v1  ;;  %6856 = vmatprep.subr.bf16.mxu1 %v7226_v28 }
 0xb96   :  { %4044 = vadd.xlane.f32.xlu1 %v4043_v48  ;;  %6831 = vmatmul.mubr.msk.bf16.vlgmr.msra.gmra.mrb[144].mxu0 %vm1801_vm12, %v4116_v44 }
 0xb97   :  { %6834 = vmatprep.mubr.msk.bf16.mxu0 %vm1801_vm12, %v4117_v52  ;;  %6857 = vmatpush3.bf16.msra.mxu1 %v7226_v28  ;;  %v10368_v28 = vld [vmem:[#allocation32_spill] sm:$0xff] }
 0xb98   :  { %4047 = vadd.xlane.f32.xlu0 %v4046_v31  ;;  %6858 = vmatprep.subr.bf16.mxu1 %v7227_v51 }
 0xb99   :  { %4773 = vmatpush1.bf16.msra.mxu0 %v7229_v33 }
 0xb9a   :  { %4091 = vadd.xlane.f32.xlu1 %v7543_v42 }
 0xb9b   :  { %6859 = vmatpush3.bf16.msra.mxu1 %v7227_v51 }
 0xb9c   :  { %4093 = vadd.xlane.f32.xlu0 %v7545_v18  ;;  %6860 = vmatprep.subr.bf16.mxu1 %v7228_v7 }
 0xb9e   :  { %4062 = vadd.xlane.f32.xlu1 %v4061_v45  ;;  %6835 = vmatmul.mubr.msk.bf16.gmra.mrb[148].mxu0 %vm1801_vm12, %v4118_v4 }
 0xb9f   :  { %6838 = vmatprep.mubr.msk.bf16.mxu0 %vm1801_vm12, %v4119_v32  ;;  %6861 = vmatpush3.bf16.msra.mxu1 %v7228_v7  ;;  %v10369_v7 = vld [vmem:[#allocation37_spill] sm:$0xff] }
 0xba0   :  { %4065 = vadd.xlane.f32.xlu0 %v4064_v29 }
 0xba2   :  { %4056 = vadd.xlane.f32.xlu1 %v4055_v47 }
 0xba4   :  { %4059 = vadd.xlane.f32.xlu0 %v4058_v43 }
 0xba6   :  { %4095 = vadd.xlane.f32.xlu1 %v7547_v20  ;;  %6839 = vmatmul.mubr.msk.bf16.gmra.mrb[152].mxu0 %vm1801_vm12, %v4120_v63 }
 0xba7   :  { %6842 = vmatprep.mubr.msk.bf16.mxu0 %vm1801_vm12, %v4121_v41 }
 0xba8   :  { %4097 = vadd.xlane.f32.xlu0 %v7549_v21 }
 0xbae   :  { %6843 = vmatmul.mubr.msk.bf16.gmra.mrb[156].mxu0 %vm1801_vm12, %v4122_v6 }
 0xbaf   :  { %4804 = vmatprep.mubr.bf16.mxu0 %v10305_v26 }
 0xbf7   :  { %v4072_v22 = vpop.xlane.xlu1 %4071 }
 0xbf9   :  { %v4074_v61 = vpop.xlane.xlu0 %4073 }
 0xbfb   :  { %v4068_v38 = vpop.xlane.xlu1 %4067 }
 0xbfd   :  { %v4070_v2 = vpop.xlane.xlu0 %4069 }
 0xbff   :  { %v4027_v56 = vpop.xlane.xlu1 %4026 }
 0xc00   :  { %v4101_v14 = vadd.f32 %v4072_v22, %v4027_v56 }
 0xc01   :  { %v4030_v58 = vpop.xlane.xlu0 %4029 }
 0xc02   :  { %v4102_v62 = vadd.f32 %v4074_v61, %v4030_v58  ;;  %7566 = vrcp.f32 %v4101_v14  ;;  %v10373_v14 = vld [vmem:[#allocation41_spill] sm:$0xff] }
 0xc03   :  { %v4021_v27 = vpop.xlane.xlu1 %4020 }
 0xc04   :  { %v4099_v36 = vadd.f32 %v4068_v38, %v4021_v27 }
 0xc05   :  { %v4024_v0 = vpop.xlane.xlu0 %4023 }
 0xc06   :  { %v4100_v49 = vadd.f32 %v4070_v2, %v4024_v0  ;;  %7568 = vrcp.f32 %v4099_v36 }
 0xc07   :  { %v4080_v50 = vpop.xlane.xlu1 %4079  ;;  %7570 = vrcp.f32 %v4102_v62 }
 0xc08   :  { %7572 = vrcp.f32 %v4100_v49 }
 0xc09   :  { %v4082_v16 = vpop.xlane.xlu0 %4081 }
 0xc0b   :  { %v4076_v60 = vpop.xlane.xlu1 %4075 }
 0xc0c   :  { %v7567_v48 = vpop.eup %7566 }
 0xc0d   :  { %v4078_v42 = vpop.xlane.xlu0 %4077 }
 0xc0f   :  { %v4039_v17 = vpop.xlane.xlu1 %4038 }
 0xc10   :  { %v4105_v3 = vadd.f32 %v4080_v50, %v4039_v17  ;;  %v7569_v31 = vpop.eup %7568 }
 0xc11   :  { %v4042_v18 = vpop.xlane.xlu0 %4041  ;;  %v7571_v45 = vpop.eup %7570 }
 0xc12   :  { %v4106_v46 = vadd.f32 %v4082_v16, %v4042_v18  ;;  %7574 = vrcp.f32 %v4105_v3  ;;  %v7573_v39 = vpop.eup %7572  ;;  %v10370_v18 = vld [vmem:[#allocation35_spill] sm:$0xff] }
 0xc13   :  { %v4033_v12 = vpop.xlane.xlu1 %4032 }
 0xc14   :  { %v4103_v8 = vadd.f32 %v4076_v60, %v4033_v12 }
 0xc15   :  { %v4036_v9 = vpop.xlane.xlu0 %4035 }
 0xc16   :  { %v4104_v53 = vadd.f32 %v4078_v42, %v4036_v9  ;;  %7576 = vrcp.f32 %v4103_v8 }
 0xc17   :  { %v4088_v37 = vpop.xlane.xlu1 %4087  ;;  %7578 = vrcp.f32 %v4106_v46 }
 0xc18   :  { %7580 = vrcp.f32 %v4104_v53 }
 0xc19   :  { %v4090_v34 = vpop.xlane.xlu0 %4089 }
 0xc1b   :  { %v4084_v20 = vpop.xlane.xlu1 %4083 }
 0xc1c   :  { %v7575_v61 = vpop.eup %7574 }
 0xc1d   :  { %v4086_v24 = vpop.xlane.xlu0 %4085 }
 0xc1f   :  { %v4051_v21 = vpop.xlane.xlu1 %4050 }
 0xc20   :  { %v4109_v32 = vadd.f32 %v4088_v37, %v4051_v21 }
 0xc21   :  { %v4054_v59 = vpop.xlane.xlu0 %4053 }
 0xc22   :  { %v4110_v13 = vadd.f32 %v4090_v34, %v4054_v59  ;;  %7582 = vrcp.f32 %v4109_v32 }
 0xc23   :  { %v4045_v10 = vpop.xlane.xlu1 %4044 }
 0xc24   :  { %v4107_v47 = vadd.f32 %v4084_v20, %v4045_v10  ;;  %v10371_v20 = vld [vmem:[#allocation38_spill] sm:$0xff]  ;;  %v10372_v10 = vld [vmem:[#allocation36_spill] sm:$0xff] }
 0xc25   :  { %v4048_v25 = vpop.xlane.xlu0 %4047 }
 0xc26   :  { %v4108_v11 = vadd.f32 %v4086_v24, %v4048_v25  ;;  %7584 = vrcp.f32 %v4107_v47 }
 0xc27   :  { %v4092_v23 = vpop.xlane.xlu1 %4091  ;;  %7586 = vrcp.f32 %v4110_v13 }
 0xc28   :  { %7588 = vrcp.f32 %v4108_v11 }
 0xc29   :  { %v4094_v57 = vpop.xlane.xlu0 %4093 }
 0xc2b   :  { %v4063_v30 = vpop.xlane.xlu1 %4062 }
 0xc2d   :  { %v4066_v44 = vpop.xlane.xlu0 %4065 }
 0xc2f   :  { %v4057_v19 = vpop.xlane.xlu1 %4056 }
 0xc30   :  { %v4111_v17 = vadd.f32 %v4092_v23, %v4057_v19 }
 0xc31   :  { %v4060_v43 = vpop.xlane.xlu0 %4059 }
 0xc32   :  { %v4112_v59 = vadd.f32 %v4094_v57, %v4060_v43 }
 0xc33   :  { %v4096_v15 = vpop.xlane.xlu1 %4095 }
 0xc34   :  { %v4113_v50 = vadd.f32 %v4096_v15, %v4063_v30 }
 0xc35   :  { %v4098_v56 = vpop.xlane.xlu0 %4097 }
 0xc36   :  { %v4114_v34 = vadd.f32 %v4098_v56, %v4066_v44  ;;  %7590 = vrcp.f32 %v4113_v50 }
 0xc37   :  { %7592 = vrcp.f32 %v4111_v17  ;;  %v7235_v17 = vld [vmem:[%s10203_s18 + $0x20] ss:$8 sps:$4 sm:$0xff]  }
 0xc38   :  { %7594 = vrcp.f32 %v4114_v34  ;;  %v7246_v34 = vld [vmem:[%s10203_s18 + $0x54] ss:$8 sps:$4 sm:$0xff]  }
 0xc39   :  { %7596 = vrcp.f32 %v4112_v59  ;;  %v7252_v59 = vld [vmem:[%s10203_s18 + $0x74] ss:$8 sps:$4 sm:$0xff]  }
 0xc69   :  { %v6832_v52 = vpop.f32.mrb[144].mxu0 }
 0xc6a   :  { %v4373_v55 = vmul.f32 %v7567_v48, %v6832_v52  ;;  %v4292_v4 = vpop.f32.mrb[145].mxu0  ;;  %v10374_v52 = vld [vmem:[#allocation39_spill] sm:$0xff] }
 0xc6b   :  { %v4371_v1 = vmul.f32 %v7569_v31, %v4292_v4  ;;  %v6833_v29 = vpop.f32.mrb[146].mxu0  ;;  %v10375_v4 = vld [vmem:[#allocation42_spill] sm:$0xff] }
 0xc6c   :  { %v4389_v63 = vadd.f32 %v9483_v35, %v4373_v55  ;;  %v4374_v41 = vmul.f32 %v7571_v45, %v6833_v29  ;;  %v4295_v6 = vpop.f32.mrb[147].mxu0  ;;  %v7577_v35 = vpop.eup %7576 }
 0xc6d   :  { %v4387_v54 = vadd.f32 %v4371_v1, %v10367_v5  ;;  %v4372_v40 = vmul.f32 %v7573_v39, %v4295_v6  ;;  %v7579_v0 = vpop.eup %7578  ;;  %v10376_v1 = vld [vmem:[#allocation40_spill] sm:$0xff]  ;;  %v10377_v39 = vld [vmem:[#allocation45_spill] sm:$0xff] }
 0xc6e   :  { %v4390_v51 = vadd.f32 %v10368_v28, %v4374_v41  ;;  %v7581_v42 = vpop.eup %7580 }
 0xc6f   :  { %v4388_v33 = vadd.f32 %v4372_v40, %v10369_v7  ;;  %v7583_v49 = vpop.eup %7582  ;;  %v10378_v7 = vld [vmem:[#allocation43_spill] sm:$0xff] }
 0xc70   :  { %v4404_v22 = vpack.c.bf16 %v4390_v51, %v4389_v63  ;;  %v7585_v8 = vpop.eup %7584 }
 0xc71   :  { %v6836_v38 = vpop.f32.mrb[148].mxu0  ;;  %v4403_v2 = vpack.c.bf16 %v4388_v33, %v4387_v54  ;;  %v7587_v53 = vpop.eup %7586 }
 0xc72   :  { %v4377_v58 = vmul.f32 %v7575_v61, %v6836_v38  ;;  %v4308_v27 = vpop.f32.mrb[149].mxu0  ;;  %v7589_v57 = vpop.eup %7588  ;;  %v10379_v61 = vld [vmem:[#allocation46_spill] sm:$0xff] }
 0xc73   :  { %v4375_v16 = vmul.f32 %v7577_v35, %v4308_v27  ;;  %v6837_v60 = vpop.f32.mrb[150].mxu0  ;;  %6862 = vmatprep.mubr.bf16.mxu1 %v4403_v2  ;;  %v7591_v63 = vpop.eup %7590  ;;  %v10380_v35 = vld [vmem:[#allocation44_spill] sm:$0xff] }
 0xc74   :  { %v4393_v12 = vadd.f32 %v10370_v18, %v4377_v58  ;;  %v4378_v9 = vmul.f32 %v7579_v0, %v6837_v60  ;;  %v4311_v37 = vpop.f32.mrb[151].mxu0  ;;  %6863 = vmatmul.mubr.bf16.vlgmr.msra.gmra.mrb[144].mxu1 %v4404_v22  ;;  %v7593_v13 = vpop.eup %7592  ;;  %v10381_v58 = vld [vmem:[#allocation61_spill] sm:$0xff]  ;;  %v7232_v60 = vld [vmem:[%s10203_s18 + $0x10] ss:$8 sps:$4 sm:$0xff]  }
 0xc75   :  { %v4391_v24 = vadd.f32 %v4375_v16, %v10371_v20  ;;  %v4376_v21 = vmul.f32 %v7581_v42, %v4311_v37  ;;  %v7595_v40 = vpop.eup %7594  ;;  %v7234_v16 = vld [vmem:[%s10203_s18 + $0x14] ss:$8 sps:$4 sm:$0xff]   ;;  %v7237_v42 = vld [vmem:[%s10203_s18 + $0x24] ss:$8 sps:$4 sm:$0xff]   ;;  %v7241_v37 = vld [vmem:[%s10203_s18 + $0x40] ss:$8 sps:$4 sm:$0xff]  }
 0xc76   :  { %v4394_v25 = vadd.f32 %v10372_v10, %v4378_v9  ;;  %v7597_v51 = vpop.eup %7596  ;;  %4774 = vmatprep.subr.bf16.mxu0 %v7234_v16  ;;  %v7240_v18 = vld [vmem:[%s10203_s18 + $0x34] ss:$8 sps:$4 sm:$0xff]   ;;  %v7243_v9 = vld [vmem:[%s10203_s18 + $0x44] ss:$8 sps:$4 sm:$0xff]   ;;  %v7244_v20 = vld [vmem:[%s10203_s18 + $0x50] ss:$8 sps:$4 sm:$0xff]  }
 0xc77   :  { %v4392_v36 = vadd.f32 %v4376_v21, %v10373_v14  ;;  %4775 = vmatpush1.bf16.msra.mxu0 %v7232_v60  ;;  %v7247_v21 = vld [vmem:[%s10203_s18 + $0x60] ss:$8 sps:$4 sm:$0xff]   ;;  %v7250_v10 = vld [vmem:[%s10203_s18 + $0x70] ss:$8 sps:$4 sm:$0xff]  }
 0xc78   :  { %v4406_v62 = vpack.c.bf16 %v4394_v25, %v4393_v12  ;;  %4776 = vmatprep.subr.bf16.mxu0 %v7237_v42  ;;  %v7238_v12 = vld [vmem:[%s10203_s18 + $0x30] ss:$8 sps:$4 sm:$0xff]   ;;  %v7974_v25 = vmov 0.0  }
 0xc79   :  { %v6840_v23 = vpop.f32.mrb[152].mxu0  ;;  %v4405_v3 = vpack.c.bf16 %v4392_v36, %v4391_v24  ;;  %v7249_v24 = vld [vmem:[%s10203_s18 + $0x64] ss:$8 sps:$4 sm:$0xff]   ;;  %6878 = vmatprep.subr.bf16.mxu1 %v7974_v25 }
 0xc7a   :  { %v4381_v30 = vmul.f32 %v7583_v49, %v6840_v23  ;;  %v4324_v46 = vpop.f32.mrb[153].mxu0  ;;  %v10382_v36 = vld [vmem:[#allocation47_spill] sm:$0xff]  ;;  %v10383_v23 = vld [vmem:[#allocation48_spill] sm:$0xff] }
 0xc7b   :  { %v4379_v44 = vmul.f32 %v7585_v8, %v4324_v46  ;;  %v6841_v48 = vpop.f32.mrb[154].mxu0  ;;  %6866 = vmatprep.mubr.bf16.mxu1 %v4405_v3  ;;  %4777 = vmatpush1.bf16.msra.mxu0 %v7235_v17  ;;  %v10384_v46 = vld [vmem:[#allocation49_spill] sm:$0xff] }
 0xc7c   :  { %v4397_v31 = vadd.f32 %v10374_v52, %v4381_v30  ;;  %v4382_v19 = vmul.f32 %v7587_v53, %v6841_v48  ;;  %v4327_v55 = vpop.f32.mrb[155].mxu0  ;;  %6867 = vmatmul.mubr.bf16.gmra.mrb[148].mxu1 %v4406_v62  ;;  %4778 = vmatprep.subr.bf16.mxu0 %v7240_v18 }
 0xc7d   :  { %v4395_v45 = vadd.f32 %v4379_v44, %v10375_v4  ;;  %v4380_v32 = vmul.f32 %v7589_v57, %v4327_v55  ;;  %v10385_v57 = vld [vmem:[#allocation50_spill] sm:$0xff]  ;;  %v10386_v4 = vld [vmem:[#allocation51_spill] sm:$0xff] }
 0xc7e   :  { %v4398_v29 = vadd.f32 %v10376_v1, %v4382_v19  ;;  %v10387_v1 = vld [vmem:[#allocation52_spill] sm:$0xff] }
 0xc7f   :  { %v4396_v47 = vadd.f32 %v4380_v32, %v10377_v39  ;;  %4779 = vmatpush1.bf16.msra.mxu0 %v7238_v12 }
 0xc80   :  { %v4408_v43 = vpack.c.bf16 %v4398_v29, %v4397_v31  ;;  %4780 = vmatprep.subr.bf16.mxu0 %v7243_v9 }
 0xc81   :  { %v6844_v41 = vpop.f32.mrb[156].mxu0  ;;  %v4407_v6 = vpack.c.bf16 %v4396_v47, %v4395_v45 }
 0xc82   :  { %v4385_v5 = vmul.f32 %v7591_v63, %v6844_v41  ;;  %v4340_v54 = vpop.f32.mrb[157].mxu0 }
 0xc83   :  { %v4383_v11 = vmul.f32 %v7593_v13, %v4340_v54  ;;  %v6845_v28 = vpop.f32.mrb[158].mxu0  ;;  %6870 = vmatprep.mubr.bf16.mxu1 %v4407_v6  ;;  %4781 = vmatpush1.bf16.msra.mxu0 %v7241_v37  ;;  %v10389_v13 = vld [vmem:[#allocation54_spill] sm:$0xff] }
 0xc84   :  { %v4401_v33 = vadd.f32 %v10378_v7, %v4385_v5  ;;  %v4386_v15 = vmul.f32 %v7595_v40, %v6845_v28  ;;  %v4343_v22 = vpop.f32.mrb[159].mxu0  ;;  %6871 = vmatmul.mubr.bf16.gmra.mrb[152].mxu1 %v4408_v43  ;;  %4782 = vmatprep.subr.bf16.mxu0 %v7246_v34  ;;  %v10388_v43 = vld [vmem:[#allocation53_spill] sm:$0xff] }
 0xc85   :  { %v4399_v38 = vadd.f32 %v4383_v11, %v10379_v61  ;;  %v4384_v2 = vmul.f32 %v7597_v51, %v4343_v22  ;;  %v10390_v22 = vld [vmem:[#allocation55_spill] sm:$0xff] }
 0xc86   :  { %v4402_v56 = vadd.f32 %v10380_v35, %v4386_v15 }
 0xc87   :  { %v4400_v27 = vadd.f32 %v4384_v2, %v10381_v58  ;;  %4783 = vmatpush1.bf16.msra.mxu0 %v7244_v20  ;;  %v10391_v58 = vld [vmem:[#allocation56_spill] sm:$0xff] }
 0xc88   :  { %v4410_v0 = vpack.c.bf16 %v4402_v56, %v4401_v33  ;;  %4784 = vmatprep.subr.bf16.mxu0 %v7249_v24  ;;  %v10392_v24 = vld [vmem:[#allocation57_spill] sm:$0xff] }
 0xc89   :  { %v4409_v50 = vpack.c.bf16 %v4400_v27, %v4399_v38 }
 0xc8b   :  { %6874 = vmatprep.mubr.bf16.mxu1 %v4409_v50  ;;  %4785 = vmatpush1.bf16.msra.mxu0 %v7247_v21 }
 0xc8c   :  { %6875 = vmatmul.mubr.bf16.gmra.mrb[156].mxu1 %v4410_v0  ;;  %4786 = vmatprep.subr.bf16.mxu0 %v7252_v59 }
 0xc8d   :  { %6894 = vmatprep.mubr.msk.bf16.mxu1 %vm7975_vm3, %v7974_v25 }
 0xc8f   :  { %4787 = vmatpush1.bf16.msra.mxu0 %v7250_v10 }
 0xc90   :  { %6918 = vmatprep.subr.bf16.mxu0 %v7974_v25 }
 0xd47   :  { %v6864_v14 = vpop.f32.mrb[144].mxu1 }
 0xd48   :  { %v4502_v62 = vadd.f32 %v6864_v14, %v10382_v36  ;;  %v4493_v49 = vpop.f32.mrb[145].mxu1 }
 0xd49   :  { %v4494_v3 = vadd.f32 %v4493_v49, %v10383_v23  ;;  %v6865_v8 = vpop.f32.mrb[146].mxu1 }
 0xd4a   :  { %v4576_v30 = vmul.f32 1.442695, %v4502_v62  ;;  %v4505_v53 = vadd.f32 %v6865_v8, %v10384_v46  ;;  %v4496_v44 = vpop.f32.mrb[147].mxu1  ;;  %vm4558_vm4 = vcmp.gt.f32.partialorder %v4502_v62, 0.0 }
 0xd4b   :  { %v4572_v48 = vmul.f32 1.442695, %v4494_v3  ;;  %v4497_v52 = vadd.f32 %v4496_v44, %v10385_v57  ;;  %vm4556_vm5 = vcmp.gt.f32.partialorder %v4494_v3, 0.0 }
 0xd4c   :  { %7598 = vpow2.f32 %v4576_v30  ;;  %v4578_v31 = vmul.f32 1.442695, %v4505_v53  ;;  %vm4559_vm6 = vcmp.gt.f32.partialorder %v4505_v53, 0.0 }
 0xd4d   :  { %7600 = vpow2.f32 %v4572_v48  ;;  %v4574_v19 = vmul.f32 1.442695, %v4497_v52  ;;  %vm4557_vm7 = vcmp.gt.f32.partialorder %v4497_v52, 0.0 }
 0xd4e   :  { %7602 = vpow2.f32 %v4578_v31 }
 0xd4f   :  { %7604 = vpow2.f32 %v4574_v19  ;;  %v6868_v55 = vpop.f32.mrb[148].mxu1 }
 0xd50   :  { %v9834_v45 = vadd.f32 %v6868_v55, %v10386_v4  ;;  %v4509_v32 = vpop.f32.mrb[149].mxu1 }
 0xd51   :  { %v9837_v29 = vadd.f32 %v4509_v32, %v10387_v1  ;;  %v6869_v39 = vpop.f32.mrb[150].mxu1 }
 0xd52   :  { %v4584_v47 = vmul.f32 1.442695, %v9834_v45  ;;  %v9841_v63 = vadd.f32 %v6869_v39, %v10388_v43  ;;  %v4512_v41 = vpop.f32.mrb[151].mxu1  ;;  %vm4562_vm8 = vcmp.gt.f32.partialorder %v9834_v45, 0.0  ;;  %v10394_v39 = vld [vmem:[#allocation59_spill] sm:$0xff] }
 0xd53   :  { %v4580_v6 = vmul.f32 1.442695, %v9837_v29  ;;  %v9845_v5 = vadd.f32 %v4512_v41, %v10389_v13  ;;  %vm4560_vm9 = vcmp.gt.f32.partialorder %v9837_v29, 0.0  ;;  %v10395_v13 = vld [vmem:[#allocation60_spill] sm:$0xff] }
 0xd54   :  { %7606 = vpow2.f32 %v4584_v47  ;;  %v4586_v54 = vmul.f32 1.442695, %v9841_v63  ;;  %vm4563_vm10 = vcmp.gt.f32.partialorder %v9841_v63, 0.0 }
 0xd55   :  { %7608 = vpow2.f32 %v4580_v6  ;;  %v4582_v40 = vmul.f32 1.442695, %v9845_v5  ;;  %vm4561_vm11 = vcmp.gt.f32.partialorder %v9845_v5, 0.0 }
 0xd56   :  { %v7599_v11 = vpop.eup %7598  ;;  %7610 = vpow2.f32 %v4586_v54 }
 0xd57   :  { %v7601_v28 = vpop.eup %7600  ;;  %v5941_v51 = vadd.f32 -1.0, %v7599_v11  ;;  %7612 = vpow2.f32 %v4582_v40  ;;  %v6872_v7 = vpop.f32.mrb[152].mxu1  ;;  %v10396_v40 = vld [vmem:[#allocation33_spill] sm:$0xff] }
 0xd58   :  { %v7603_v33 = vpop.eup %7602  ;;  %v5939_v15 = vadd.f32 -1.0, %v7601_v28  ;;  %v9850_v61 = vadd.f32 %v6872_v7, %v10390_v22  ;;  %v4525_v38 = vpop.f32.mrb[153].mxu1 }
 0xd59   :  { %v7605_v2 = vpop.eup %7604  ;;  %v4622_v35 = vmul.f32 1.6732632, %v5941_v51  ;;  %v5942_v56 = vadd.f32 -1.0, %v7603_v33  ;;  %v9853_v27 = vadd.f32 %v4525_v38, %v10391_v58  ;;  %v6873_v0 = vpop.f32.mrb[154].mxu1 }
 0xd5a   :  { %v4620_v50 = vmul.f32 1.6732632, %v5939_v15  ;;  %v5940_v16 = vadd.f32 -1.0, %v7605_v2  ;;  %v4592_v60 = vmul.f32 1.442695, %v9850_v61  ;;  %v4528_v12 = vpop.f32.mrb[155].mxu1  ;;  %v9858_v21 = vadd.f32 %v6873_v0, %v10392_v24 }
 0xd5b   :  { %v4638_v42 = vsel %vm4558_vm4, %v4502_v62, %v4622_v35  ;;  %v4623_v17 = vmul.f32 1.6732632, %v5942_v56  ;;  %v4588_v18 = vmul.f32 1.442695, %v9853_v27  ;;  %v10393_v62 = vld [vmem:[#allocation58_spill] sm:$0xff]  ;;  %vm4566_vm13 = vcmp.gt.f32.partialorder %v9850_v61, 0.0 }
 0xd5c   :  { %v4636_v9 = vsel %vm4556_vm5, %v4494_v3, %v4620_v50  ;;  %v4621_v37 = vmul.f32 1.6732632, %v5940_v16  ;;  %7614 = vpow2.f32 %v4592_v60  ;;  %v4654_v34 = vmul.f32 1.050701, %v4638_v42  ;;  %v10397_v60 = vld [vmem:[#allocation31_spill] sm:$0xff] }
 0xd5d   :  { %v4639_v20 = vsel %vm4559_vm6, %v4505_v53, %v4623_v17  ;;  %7616 = vpow2.f32 %v4588_v18  ;;  %v4652_v10 = vmul.f32 1.050701, %v4636_v9  ;;  %v9861_v49 = vadd.f32 %v4528_v12, %v10393_v62 }
 0xd5e   :  { %v7607_v59 = vpop.eup %7606  ;;  %v4655_v14 = vmul.f32 1.050701, %v4639_v20  ;;  %v4637_v36 = vsel %vm4557_vm7, %v4497_v52, %v4621_v37  ;;  %v4594_v30 = vmul.f32 1.442695, %v9858_v21  ;;  %vm4564_vm14 = vcmp.gt.f32.partialorder %v9853_v27, 0.0 }
 0xd5f   :  { %v7609_v23 = vpop.eup %7608  ;;  %v4653_v8 = vmul.f32 1.050701, %v4637_v36  ;;  %v5945_v3 = vadd.f32 -1.0, %v7607_v59  ;;  %v4590_v48 = vmul.f32 1.442695, %v9861_v49  ;;  %v6876_v57 = vpop.f32.mrb[156].mxu1 }
 0xd60   :  { %v7611_v46 = vpop.eup %7610  ;;  %v4669_v53 = vpack.c.bf16 %v4655_v14, %v4654_v34  ;;  %v5943_v44 = vadd.f32 -1.0, %v7609_v23  ;;  %7618 = vpow2.f32 %v4594_v30  ;;  %v4541_v4 = vpop.f32.mrb[157].mxu1  ;;  %v9868_v47 = vadd.f32 %v6876_v57, %v10394_v39 }
 0xd61   :  { %v7613_v31 = vpop.eup %7612  ;;  %v4668_v52 = vpack.c.bf16 %v4653_v8, %v4652_v10  ;;  %v4626_v19 = vmul.f32 1.6732632, %v5945_v3  ;;  %v5946_v55 = vadd.f32 -1.0, %v7611_v46  ;;  %7620 = vpow2.f32 %v4590_v48  ;;  %v6877_v43 = vpop.f32.mrb[158].mxu1 }
 0xd62   :  { %v4624_v32 = vmul.f32 1.6732632, %v5943_v44  ;;  %v5944_v1 = vadd.f32 -1.0, %v7613_v31  ;;  %v9874_v54 = vadd.f32 %v4541_v4, %v10395_v13  ;;  %v9877_v11 = vadd.f32 %v6877_v43, %v10396_v40  ;;  %v4544_v28 = vpop.f32.mrb[159].mxu1 }
 0xd63   :  { %v4642_v41 = vsel %vm4562_vm8, %v9834_v45, %v4626_v19  ;;  %v4627_v6 = vmul.f32 1.6732632, %v5946_v55  ;;  %4805 = vmatmul.mubr.bf16.vlgmr.msra.gmra.mrb[160].mxu0 %v4668_v52  ;;  %6879 = vmatpush3.bf16.msra.mxu1 %v4668_v52  ;;  %v4600_v15 = vmul.f32 1.442695, %v9868_v47  ;;  %v4545_v42 = vadd.f32 %v4544_v28, %v10397_v60 }
 0xd64   :  { %v4640_v51 = vsel %vm4560_vm9, %v9837_v29, %v4624_v32  ;;  %v4625_v7 = vmul.f32 1.6732632, %v5944_v1  ;;  %6880 = vmatprep.subr.bf16.mxu1 %v7974_v25  ;;  %4814 = vmatprep.mubr.bf16.mxu0 %v10305_v26  ;;  %v4658_v45 = vmul.f32 1.050701, %v4642_v41  ;;  %v4596_v29 = vmul.f32 1.442695, %v9874_v54 }
 0xd65   :  { %v4643_v33 = vsel %vm4563_vm10, %v9841_v63, %v4627_v6  ;;  %v4656_v38 = vmul.f32 1.050701, %v4640_v51  ;;  %7622 = vpow2.f32 %v4600_v15  ;;  %v4602_v50 = vmul.f32 1.442695, %v9877_v11  ;;  %v7254_v51 = vld [vmem:[#allocation16 + $0x8] sm:$0xff]  }
 0xd66   :  { %v7615_v22 = vpop.eup %7614  ;;  %v4659_v2 = vmul.f32 1.050701, %v4643_v33  ;;  %v4641_v35 = vsel %vm4561_vm11, %v9845_v5, %v4625_v7  ;;  %7624 = vpow2.f32 %v4596_v29  ;;  %v4598_v18 = vmul.f32 1.442695, %v4545_v42  ;;  %v7255_v7 = vld [vmem:[#allocation16 + $0x10] sm:$0xff]   ;;  %v7257_v33 = vld [vmem:[#allocation16 + $0x20] sm:$0xff]  }
 0xd67   :  { %v7617_v56 = vpop.eup %7616  ;;  %v4657_v58 = vmul.f32 1.050701, %v4641_v35  ;;  %v5949_v0 = vadd.f32 -1.0, %v7615_v22  ;;  %6881 = vmatpush3.bf16.msra.mxu1 %v4669_v53  ;;  %7626 = vpow2.f32 %v4602_v50  ;;  %vm4567_vm15 = vcmp.gt.f32.partialorder %v9858_v21, 0.0  ;;  %v7258_v15 = vld [vmem:[#allocation16 + $0x28] sm:$0xff]   ;;  %v7259_v22 = vld [vmem:[#allocation16 + $0x30] sm:$0xff]  }
 0xd68   :  { %v9891_v16 = vpack.c.bf16 %v4659_v2, %v4658_v45  ;;  %v5947_v63 = vadd.f32 -1.0, %v7617_v56  ;;  %6882 = vmatprep.subr.bf16.mxu1 %v7974_v25  ;;  %7628 = vpow2.f32 %v4598_v18  ;;  %vm4565_vm0 = vcmp.gt.f32.partialorder %v9861_v49, 0.0  ;;  %v7256_v45 = vld [vmem:[#allocation16 + $0x18] sm:$0xff]   ;;  %v7261_v2 = vld [vmem:[#allocation17] sm:$0xff]   ;;  %v7262_v35 = vld [vmem:[#allocation17 + $0x8] sm:$0xff]  }
 0xd69   :  { %v4670_v17 = vpack.c.bf16 %v4657_v58, %v4656_v38  ;;  %v4630_v5 = vmul.f32 1.6732632, %v5949_v0  ;;  %vm4570_vm1 = vcmp.gt.f32.partialorder %v9868_v47, 0.0  ;;  %vm4571_vm2 = vcmp.gt.f32.partialorder %v9877_v11, 0.0  ;;  %v7260_v38 = vld [vmem:[#allocation16 + $0x38] sm:$0xff]   ;;  %6919 = vmatpush3.bf16.msra.mxu0 %v7261_v2  ;;  %v7263_v29 = vld [vmem:[#allocation17 + $0x10] sm:$0xff]  }
 0xd6a   :  { %v7619_v12 = vpop.eup %7618  ;;  %v4628_v9 = vmul.f32 1.6732632, %v5947_v63  ;;  %vm4568_vm4 = vcmp.gt.f32.partialorder %v9874_v54, 0.0  ;;  %vm4569_vm5 = vcmp.gt.f32.partialorder %v4545_v42, 0.0  ;;  %6920 = vmatprep.subr.bf16.mxu0 %v7974_v25  ;;  %v7264_v56 = vld [vmem:[#allocation17 + $0x18] sm:$0xff]   ;;  %v7265_v58 = vld [vmem:[#allocation17 + $0x20] sm:$0xff]  }
 0xd6b   :  { %4815 = vmatmul.mubr.bf16.gmra.mrb[164].mxu0 %v4669_v53  ;;  %6883 = vmatpush3.bf16.msra.mxu1 %v4670_v17  ;;  %v7621_v37 = vpop.eup %7620  ;;  %v5950_v34 = vadd.f32 -1.0, %v7619_v12  ;;  %v4646_v24 = vsel %vm4566_vm13, %v9850_v61, %v4630_v5  ;;  %v7266_v0 = vld [vmem:[#allocation17 + $0x28] sm:$0xff]   ;;  %v7267_v50 = vld [vmem:[#allocation17 + $0x30] sm:$0xff]   ;;  %vm5414_vm7 = vcmask 123904   ;;  %vm5418_vm8 = vcmask 1041408  }
 0xd6c   :  { %6884 = vmatprep.subr.bf16.mxu1 %v7974_v25  ;;  %4824 = vmatprep.mubr.bf16.mxu0 %v10305_v26  ;;  %v5948_v20 = vadd.f32 -1.0, %v7621_v37  ;;  %v4644_v10 = vsel %vm4564_vm14, %v9853_v27, %v4628_v9  ;;  %v4662_v23 = vmul.f32 1.050701, %v4646_v24  ;;  %v7278_v2 = vld [vmem:[#allocation19 + $0x8] sm:$0xff]  }
 0xd6d   :  { %v4631_v59 = vmul.f32 1.6732632, %v5950_v34  ;;  %v4660_v30 = vmul.f32 1.050701, %v4644_v10  ;;  %6921 = vmatpush3.bf16.msra.mxu0 %v7262_v35  ;;  %v7279_v35 = vld [vmem:[#allocation19 + $0x10] sm:$0xff]  }
 0xd6e   :  { %v4629_v14 = vmul.f32 1.6732632, %v5948_v20  ;;  %6922 = vmatprep.subr.bf16.mxu0 %v7974_v25 }
 0xd6f   :  { %6885 = vmatpush3.bf16.msra.mxu1 %v9891_v16  ;;  %v4647_v36 = vsel %vm4567_vm15, %v9858_v21, %v4631_v59  ;;  %v7623_v62 = vpop.eup %7622 }
 0xd70   :  { %6886 = vmatprep.subr.bf16.mxu1 %v7974_v25  ;;  %v4663_v8 = vmul.f32 1.050701, %v4647_v36  ;;  %v4645_v61 = vsel %vm4565_vm0, %v9861_v49, %v4629_v14  ;;  %v7625_v3 = vpop.eup %7624  ;;  %v5953_v27 = vadd.f32 -1.0, %v7623_v62 }
 0xd71   :  { %v4661_v46 = vmul.f32 1.050701, %v4645_v61  ;;  %v7627_v53 = vpop.eup %7626  ;;  %v5951_v48 = vadd.f32 -1.0, %v7625_v3  ;;  %6923 = vmatpush3.bf16.msra.mxu0 %v7263_v29  ;;  %v7280_v29 = vld [vmem:[#allocation19 + $0x18] sm:$0xff]  }
 0xd72   :  { %v4673_v44 = vpack.c.bf16 %v4663_v8, %v4662_v23  ;;  %v4634_v31 = vmul.f32 1.6732632, %v5953_v27  ;;  %v5954_v21 = vadd.f32 -1.0, %v7627_v53  ;;  %v7629_v19 = vpop.eup %7628  ;;  %6924 = vmatprep.subr.bf16.mxu0 %v7974_v25 }
 0xd73   :  { %4825 = vmatmul.mubr.bf16.gmra.mrb[168].mxu0 %v4670_v17  ;;  %v4672_v57 = vpack.c.bf16 %v4661_v46, %v4660_v30  ;;  %v4632_v52 = vmul.f32 1.6732632, %v5951_v48  ;;  %v5952_v4 = vadd.f32 -1.0, %v7629_v19 }
 0xd74   :  { %4834 = vmatprep.mubr.bf16.mxu0 %v10305_v26  ;;  %v4650_v55 = vsel %vm4570_vm1, %v9868_v47, %v4634_v31  ;;  %v4635_v49 = vmul.f32 1.6732632, %v5954_v21 }
 0xd75   :  { %6887 = vmatpush3.bf16.msra.mxu1 %v4672_v57  ;;  %v4666_v1 = vmul.f32 1.050701, %v4650_v55  ;;  %v4648_v39 = vsel %vm4568_vm4, %v9874_v54, %v4632_v52  ;;  %v4633_v41 = vmul.f32 1.6732632, %v5952_v4  ;;  %v4885_v54 = vld [vmem:[%s10398_s27] sm:$0x1]  ;;  %6925 = vmatpush3.bf16.msra.mxu0 %v7264_v56 }
 0xd76   :  { %6888 = vmatprep.subr.bf16.mxu1 %v7974_v25  ;;  %v4651_v32 = vsel %vm4571_vm2, %v9877_v11, %v4635_v49  ;;  %v4664_v13 = vmul.f32 1.050701, %v4648_v39  ;;  %v7253_v11 = vld [vmem:[#allocation16] sm:$0xff]   ;;  %6926 = vmatprep.subr.bf16.mxu0 %v7974_v25 }
 0xd77   :  { %v4667_v43 = vmul.f32 1.050701, %v4651_v32  ;;  %v4649_v47 = vsel %vm4569_vm5, %v4545_v42, %v4633_v41 }
 0xd78   :  { %v4665_v40 = vmul.f32 1.050701, %v4649_v47 }
 0xd79   :  { %6889 = vmatpush3.bf16.msra.mxu1 %v4673_v44  ;;  %v4675_v6 = vpack.c.bf16 %v4667_v43, %v4666_v1  ;;  %6927 = vmatpush3.bf16.msra.mxu0 %v7265_v58  ;;  %v7269_v58 = vld [vmem:[%s10206_s21] sm:$0xff]  }
 0xd7a   :  { %6890 = vmatprep.subr.bf16.mxu1 %v7974_v25  ;;  %v4674_v28 = vpack.c.bf16 %v4665_v40, %v4664_v13  ;;  %6928 = vmatprep.subr.bf16.mxu0 %v7974_v25 }
 0xd7b   :  { %4835 = vmatmul.mubr.bf16.gmra.mrb[172].mxu0 %v9891_v16  ;;  %v7268_v16 = vld [vmem:[#allocation17 + $0x38] sm:$0xff]  }
 0xd7c   :  { %4844 = vmatprep.mubr.bf16.mxu0 %v10305_v26 }
 0xd7d   :  { %6891 = vmatpush3.bf16.msra.mxu1 %v4674_v28  ;;  %6929 = vmatpush3.bf16.msra.mxu0 %v7266_v0 }
 0xd7e   :  { %6892 = vmatprep.subr.bf16.mxu1 %v7974_v25  ;;  %6930 = vmatprep.subr.bf16.mxu0 %v7974_v25 }
 0xd81   :  { %6893 = vmatpush3.bf16.msra.mxu1 %v4675_v6  ;;  %6931 = vmatpush3.bf16.msra.mxu0 %v7267_v50 }
 0xd82   :  { %6898 = vmatprep.subr.bf16.mxu1 %v7974_v25  ;;  %6932 = vmatprep.subr.bf16.mxu0 %v7974_v25 }
 0xd83   :  { %4845 = vmatmul.mubr.bf16.gmra.mrb[176].mxu0 %v4672_v57 }
 0xd84   :  { %4854 = vmatprep.mubr.bf16.mxu0 %v10305_v26  ;;  %6895 = vmatmul.mubr.bf16.vlgmr.msra.gmra.mrb[160].mxu1 %v4885_v54 }
 0xd85   :  { %6914 = vmatprep.mubr.msk.bf16.mxu1 %vm7975_vm3, %v7974_v25  ;;  %6899 = vmatpush3.bf16.msra.mxu1 %v7253_v11 }
 0xd86   :  { %6900 = vmatprep.subr.bf16.mxu1 %v7974_v25  ;;  %6933 = vmatpush3.bf16.msra.mxu0 %v7268_v16 }
 0xd87   :  { %6958 = vmatprep.subr.bf16.mxu0 %v7974_v25 }
 0xd89   :  { %6901 = vmatpush3.bf16.msra.mxu1 %v7254_v51 }
 0xd8a   :  { %6902 = vmatprep.subr.bf16.mxu1 %v7974_v25 }
 0xd8b   :  { %4855 = vmatmul.mubr.bf16.gmra.mrb[180].mxu0 %v4673_v44 }
 0xd8c   :  { %4864 = vmatprep.mubr.bf16.mxu0 %v10305_v26 }
 0xd8d   :  { %6903 = vmatpush3.bf16.msra.mxu1 %v7255_v7 }
 0xd8e   :  { %6904 = vmatprep.subr.bf16.mxu1 %v7974_v25 }
 0xd91   :  { %6905 = vmatpush3.bf16.msra.mxu1 %v7256_v45 }
 0xd92   :  { %6906 = vmatprep.subr.bf16.mxu1 %v7974_v25 }
 0xd93   :  { %4865 = vmatmul.mubr.bf16.gmra.mrb[184].mxu0 %v4674_v28 }
 0xd94   :  { %4874 = vmatprep.mubr.bf16.mxu0 %v10305_v26 }
 0xd95   :  { %6907 = vmatpush3.bf16.msra.mxu1 %v7257_v33 }
 0xd96   :  { %6908 = vmatprep.subr.bf16.mxu1 %v7974_v25 }
 0xd99   :  { %6909 = vmatpush3.bf16.msra.mxu1 %v7258_v15 }
 0xd9a   :  { %6910 = vmatprep.subr.bf16.mxu1 %v7974_v25 }
 0xd9b   :  { %4875 = vmatmul.mubr.bf16.gmra.mrb[188].mxu0 %v4675_v6 }
 0xd9c   :  { %6934 = vmatprep.mubr.msk.bf16.mxu0 %vm7975_vm3, %v7974_v25 }
 0xd9d   :  { %6911 = vmatpush3.bf16.msra.mxu1 %v7259_v22 }
 0xd9e   :  { %6912 = vmatprep.subr.bf16.mxu1 %v7974_v25 }
 0xda1   :  { %6913 = vmatpush3.bf16.msra.mxu1 %v7260_v38  ;;  %v7277_v38 = vld [vmem:[#allocation19] sm:$0xff]  }
 0xda2   :  { %6938 = vmatprep.subr.bf16.mxu1 %v7974_v25 }
 0xe36   :  { %v9946_v63 = vpop.f32.mrb[160].mxu0 }
 0xe37   :  { %v9948_v60 = vpop.f32.mrb[161].mxu0 }
 0xe38   :  { %v9950_v42 = vpop.f32.mrb[162].mxu0 }
 0xe39   :  { %v5353_v17 = vpack.c.bf16 %v9950_v42, %v9946_v63  ;;  %v9954_v5 = vpop.f32.mrb[163].mxu0 }
 0xe3a   :  { %v5406_v18 = vpack.c.bf16 %v9954_v5, %v9948_v60  ;;  %v7281_v60 = vld [vmem:[#allocation19 + $0x20] sm:$0xff]   ;;  %v7282_v5 = vld [vmem:[#allocation19 + $0x28] sm:$0xff]  }
 0xe3e   :  { %v9958_v12 = vpop.f32.mrb[164].mxu0 }
 0xe3f   :  { %v9960_v9 = vpop.f32.mrb[165].mxu0 }
 0xe40   :  { %v9962_v37 = vpop.f32.mrb[166].mxu0 }
 0xe41   :  { %v5354_v34 = vpack.c.bf16 %v9962_v37, %v9958_v12  ;;  %v9966_v20 = vpop.f32.mrb[167].mxu0 }
 0xe42   :  { %v5407_v24 = vpack.c.bf16 %v9966_v20, %v9960_v9  ;;  %v7284_v9 = vld [vmem:[#allocation19 + $0x38] sm:$0xff]  }
 0xe46   :  { %v9970_v59 = vpop.f32.mrb[168].mxu0 }
 0xe47   :  { %v9972_v10 = vpop.f32.mrb[169].mxu0 }
 0xe48   :  { %v9974_v14 = vpop.f32.mrb[170].mxu0 }
 0xe49   :  { %v5355_v36 = vpack.c.bf16 %v9974_v14, %v9970_v59  ;;  %v9978_v62 = vpop.f32.mrb[171].mxu0  ;;  %v5402_v59 = vld [vmem:[%s10399_s24] sm:$0x3] }
 0xe4a   :  { %v5408_v23 = vpack.c.bf16 %v9978_v62, %v9972_v10 }
 0xe4e   :  { %v9982_v8 = vpop.f32.mrb[172].mxu0 }
 0xe4f   :  { %v9984_v61 = vpop.f32.mrb[173].mxu0 }
 0xe50   :  { %v9986_v3 = vpop.f32.mrb[174].mxu0 }
 0xe51   :  { %v5356_v30 = vpack.c.bf16 %v9986_v3, %v9982_v8  ;;  %v9990_v46 = vpop.f32.mrb[175].mxu0 }
 0xe52   :  { %v5409_v27 = vpack.c.bf16 %v9990_v46, %v9984_v61 }
 0xe56   :  { %v9994_v53 = vpop.f32.mrb[176].mxu0 }
 0xe57   :  { %v9996_v44 = vpop.f32.mrb[177].mxu0  ;;  %v4920_v21 = vpop.f32.mrb[160].mxu1 }
 0xe58   :  { %v9998_v48 = vpop.f32.mrb[178].mxu0  ;;  %v4926_v19 = vpack.c.bf16 %v4920_v21, %v4920_v21  ;;  %v6896_v55 = vpop.f32.mrb[161].mxu1 }
 0xe59   :  { %v5357_v57 = vpack.c.bf16 %v9998_v48, %v9994_v53  ;;  %v10002_v31 = vpop.f32.mrb[179].mxu0  ;;  %v4923_v49 = vpop.f32.mrb[162].mxu1  ;;  %v7271_v55 = vld [vmem:[%s10206_s21 + $0x10] sm:$0xff]  }
 0xe5a   :  { %v5410_v52 = vpack.c.bf16 %v10002_v31, %v9996_v44  ;;  %v6897_v4 = vpop.f32.mrb[163].mxu1  ;;  %6915 = vmatmul.mubr.bf16.vlgmr.msra.gmra.mrb[164].mxu1 %v4926_v19  ;;  %v7270_v19 = vld [vmem:[%s10206_s21 + $0x8] sm:$0xff]   ;;  %v7272_v49 = vld [vmem:[%s10206_s21 + $0x18] sm:$0xff]  }
 0xe5b   :  { %6954 = vmatprep.mubr.msk.bf16.mxu1 %vm7975_vm3, %v7974_v25  ;;  %6939 = vmatpush3.bf16.msra.mxu1 %v7277_v38  ;;  %v7273_v4 = vld [vmem:[%s10206_s21 + $0x20] sm:$0xff]   ;;  %v7276_v38 = vld [vmem:[%s10206_s21 + $0x38] sm:$0xff]  }
 0xe5c   :  { %6940 = vmatprep.subr.bf16.mxu1 %v7974_v25 }
 0xe5e   :  { %v10006_v32 = vpop.f32.mrb[180].mxu0 }
 0xe5f   :  { %v10010_v1 = vpop.f32.mrb[181].mxu0  ;;  %6941 = vmatpush3.bf16.msra.mxu1 %v7278_v2  ;;  %v7286_v2 = vld [vmem:[#allocation20] ss:$8 sps:$4 sm:$0xff]  }
 0xe60   :  { %v10012_v39 = vpop.f32.mrb[182].mxu0  ;;  %6942 = vmatprep.subr.bf16.mxu1 %v7974_v25 }
 0xe61   :  { %v5358_v43 = vpack.c.bf16 %v10012_v39, %v10006_v32  ;;  %v10016_v41 = vpop.f32.mrb[183].mxu0 }
 0xe62   :  { %v5411_v6 = vpack.c.bf16 %v10016_v41, %v10010_v1 }
 0xe63   :  { %6943 = vmatpush3.bf16.msra.mxu1 %v7279_v35  ;;  %v7288_v35 = vld [vmem:[#allocation20 + $0x4] ss:$8 sps:$4 sm:$0xff]  }
 0xe64   :  { %6944 = vmatprep.subr.bf16.mxu1 %v7974_v25 }
 0xe66   :  { %v10020_v47 = vpop.f32.mrb[184].mxu0 }
 0xe67   :  { %v10022_v13 = vpop.f32.mrb[185].mxu0  ;;  %6945 = vmatpush3.bf16.msra.mxu1 %v7280_v29  ;;  %v7291_v29 = vld [vmem:[#allocation20 + $0x14] ss:$8 sps:$4 sm:$0xff]  }
 0xe68   :  { %v10024_v40 = vpop.f32.mrb[186].mxu0  ;;  %6946 = vmatprep.subr.bf16.mxu1 %v7974_v25 }
 0xe69   :  { %v5359_v28 = vpack.c.bf16 %v10024_v40, %v10020_v47  ;;  %v10028_v54 = vpop.f32.mrb[187].mxu0 }
 0xe6a   :  { %v5412_v11 = vpack.c.bf16 %v10028_v54, %v10022_v13 }
 0xe6b   :  { %6947 = vmatpush3.bf16.msra.mxu1 %v7281_v60 }
 0xe6c   :  { %6948 = vmatprep.subr.bf16.mxu1 %v7974_v25 }
 0xe6e   :  { %v10032_v51 = vpop.f32.mrb[188].mxu0 }
 0xe6f   :  { %v10034_v7 = vpop.f32.mrb[189].mxu0  ;;  %6949 = vmatpush3.bf16.msra.mxu1 %v7282_v5 }
 0xe70   :  { %v10036_v45 = vpop.f32.mrb[190].mxu0  ;;  %6950 = vmatprep.subr.bf16.mxu1 %v7974_v25 }
 0xe71   :  { %v5360_v33 = vpack.c.bf16 %v10036_v45, %v10032_v51  ;;  %v4882_v15 = vpop.f32.mrb[191].mxu0  ;;  %v7285_v51 = vld [vmem:[%s10207_s22] sm:$0xff]  }
 0xe72   :  { %v5413_v22 = vpack.c.bf16 %v4882_v15, %v10034_v7  ;;  %v7274_v7 = vld [vmem:[%s10206_s21 + $0x28] sm:$0xff]   ;;  %v7275_v15 = vld [vmem:[%s10206_s21 + $0x30] sm:$0xff]  }
 0xf2d   :  { %v5025_v56 = vpop.f32.mrb[164].mxu1 }
 0xf2e   :  { %v10048_v0 = vpack.c.bf16 %v5025_v56, %v5025_v56  ;;  %v6916_v50 = vpop.f32.mrb[165].mxu1  ;;  %v7289_v56 = vld [vmem:[#allocation20 + $0x10] ss:$8 sps:$4 sm:$0xff]  }
 0xf2f   :  { %v5028_v16 = vpop.f32.mrb[166].mxu1  ;;  %v7297_v50 = vld [vmem:[#allocation20 + $0x34] ss:$8 sps:$4 sm:$0xff]  }
 0xf30   :  { %v6917_v21 = vpop.f32.mrb[167].mxu1  ;;  %6935 = vmatmul.mubr.bf16.vlgmr.msra.gmra.mrb[192].mxu0 %v10048_v0  ;;  %v7295_v16 = vld [vmem:[#allocation20 + $0x30] ss:$8 sps:$4 sm:$0xff]  }
 0xf31   :  { %6959 = vmatpush3.bf16.msra.mxu0 %v7269_v58  ;;  %6974 = vmatprep.mubr.msk.bf16.mxu0 %vm7975_vm3, %v7974_v25  ;;  %v7294_v58 = vld [vmem:[#allocation20 + $0x24] ss:$8 sps:$4 sm:$0xff]  }
 0xf32   :  { %6960 = vmatprep.subr.bf16.mxu0 %v7974_v25  ;;  %v7300_v21 = vld [vmem:[#allocation20 + $0x44] ss:$8 sps:$4 sm:$0xff]  }
 0xf35   :  { %6961 = vmatpush3.bf16.msra.mxu0 %v7270_v19  ;;  %v7303_v19 = vld [vmem:[#allocation20 + $0x54] ss:$8 sps:$4 sm:$0xff]  }
 0xf36   :  { %6962 = vmatprep.subr.bf16.mxu0 %v7974_v25 }
 0xf39   :  { %6963 = vmatpush3.bf16.msra.mxu0 %v7271_v55  ;;  %v7301_v55 = vld [vmem:[#allocation20 + $0x50] ss:$8 sps:$4 sm:$0xff]  }
 0xf3a   :  { %6964 = vmatprep.subr.bf16.mxu0 %v7974_v25 }
 0xf3d   :  { %6965 = vmatpush3.bf16.msra.mxu0 %v7272_v49  ;;  %v7306_v49 = vld [vmem:[#allocation20 + $0x64] ss:$8 sps:$4 sm:$0xff]  }
 0xf3e   :  { %6966 = vmatprep.subr.bf16.mxu0 %v7974_v25 }
 0xf41   :  { %6967 = vmatpush3.bf16.msra.mxu0 %v7273_v4  ;;  %v7304_v4 = vld [vmem:[#allocation20 + $0x60] ss:$8 sps:$4 sm:$0xff]  }
 0xf42   :  { %6968 = vmatprep.subr.bf16.mxu0 %v7974_v25 }
 0xf45   :  { %6969 = vmatpush3.bf16.msra.mxu0 %v7274_v7  ;;  %v7309_v7 = vld [vmem:[#allocation20 + $0x74] ss:$8 sps:$4 sm:$0xff]  }
 0xf46   :  { %6970 = vmatprep.subr.bf16.mxu0 %v7974_v25 }
 0xf49   :  { %6971 = vmatpush3.bf16.msra.mxu0 %v7275_v15  ;;  %v7307_v15 = vld [vmem:[#allocation20 + $0x70] ss:$8 sps:$4 sm:$0xff]  }
 0xf4a   :  { %6972 = vmatprep.subr.bf16.mxu0 %v7974_v25 }
 0xf4d   :  { %6973 = vmatpush3.bf16.msra.mxu0 %v7276_v38 }
 0xf4e   :  { %6998 = vmatprep.subr.bf16.mxu0 %v7974_v25 }
 0xf50   :  { %6975 = vmatmul.mubr.bf16.vlgmr.msra.gmra.mrb[196].mxu0 %v10048_v0 }
 0xf51   :  { %6999 = vmatpush3.bf16.msra.mxu0 %v5406_v18  ;;  %7014 = vmatprep.mubr.msk.bf16.mxu0 %vm7975_vm3, %v7974_v25  ;;  %v7283_v18 = vld [vmem:[#allocation19 + $0x30] sm:$0xff]  }
 0xf52   :  { %7000 = vmatprep.subr.bf16.mxu0 %v7974_v25  ;;  %6951 = vmatpush3.bf16.msra.mxu1 %v7283_v18 }
 0xf53   :  { %6952 = vmatprep.subr.bf16.mxu1 %v7974_v25 }
 0xf55   :  { %7001 = vmatpush3.bf16.msra.mxu0 %v5407_v24 }
 0xf56   :  { %7002 = vmatprep.subr.bf16.mxu0 %v7974_v25  ;;  %6953 = vmatpush3.bf16.msra.mxu1 %v7284_v9 }
 0xf57   :  { %6978 = vmatprep.subr.bf16.mxu1 %v7974_v25 }
 0xf59   :  { %7003 = vmatpush3.bf16.msra.mxu0 %v5408_v23 }
 0xf5a   :  { %7004 = vmatprep.subr.bf16.mxu0 %v7974_v25 }
 0xf5d   :  { %7005 = vmatpush3.bf16.msra.mxu0 %v5409_v27 }
 0xf5e   :  { %7006 = vmatprep.subr.bf16.mxu0 %v7974_v25 }
 0xf61   :  { %7007 = vmatpush3.bf16.msra.mxu0 %v5410_v52 }
 0xf62   :  { %7008 = vmatprep.subr.bf16.mxu0 %v7974_v25 }
 0xf65   :  { %7009 = vmatpush3.bf16.msra.mxu0 %v5411_v6 }
 0xf66   :  { %7010 = vmatprep.subr.bf16.mxu0 %v7974_v25 }
 0xf69   :  { %7011 = vmatpush3.bf16.msra.mxu0 %v5412_v11 }
 0xf6a   :  { %7012 = vmatprep.subr.bf16.mxu0 %v7974_v25 }
 0xf6d   :  { %7013 = vmatpush3.bf16.msra.mxu0 %v5413_v22 }
 0xf6e   :  { %7018 = vmatprep.subr.bf16.mxu0 %v7974_v25 }
0x1003   :  { %v5130_v20 = vpop.f32.mrb[192].mxu0 }
0x1004   :  { %v5137_v24 = vmul.f32 1.442695, %v5130_v20  ;;  %v6936_v10 = vpop.f32.mrb[193].mxu0  ;;  %vm5136_vm6 = vcmp.gt.f32.partialorder %v5130_v20, 0.0 }
0x1005   :  { %v5133_v62 = vpop.f32.mrb[194].mxu0 }
0x1006   :  { %7630 = vpow2.f32 %v5137_v24  ;;  %v6937_v23 = vpop.f32.mrb[195].mxu0 }
0x1010   :  { %v7631_v61 = vpop.eup %7630 }
0x1011   :  { %v5987_v46 = vadd.f32 -1.0, %v7631_v61 }
0x1013   :  { %v5140_v27 = vmul.f32 1.6732632, %v5987_v46  ;;  %v10400_v46 = vlaneseq }
0x1015   :  { %v5141_v44 = vsel %vm5136_vm6, %v5130_v20, %v5140_v27  ;;  %v5550_v27 = vshrl.u32 %v10400_v46, 7 }
0x1016   :  { %v5142_v31 = vmul.f32 1.050701, %v5141_v44 }
0x1017   :  { %v5551_v44 = vsub.s32 0, %v5550_v27 }
0x1018   :  { %v5143_v52 = vpack.c.bf16 %v5142_v31, %v5142_v31  ;;  %v5547_v31 = vld [vmem:[%s10401_s25] sm:$0x3] }
0x101a   :  { %6955 = vmatmul.mubr.bf16.vlgmr.msra.gmra.mrb[168].mxu1 %v5143_v52  ;;  %v5555_v52 = vsub.s32 1, %v5550_v27 }
0x101b   :  { %6979 = vmatpush3.bf16.xpose.msra.mxu1 %v5353_v17  ;;  %6994 = vmatprep.mubr.msk.bf16.mxu1 %vm7975_vm3, %v7974_v25 }
0x101c   :  { %6980 = vmatprep.subr.bf16.mxu1 %v7974_v25 }
0x1023   :  { %v5346_v1 = vpop.f32.mrb[196].mxu0  ;;  %6981 = vmatpush3.bf16.xpose.msra.mxu1 %v5354_v34 }
0x1024   :  { %v5352_v41 = vmul.f32 0.088388346, %v5346_v1  ;;  %v6976_v6 = vpop.f32.mrb[197].mxu0  ;;  %6982 = vmatprep.subr.bf16.mxu1 %v7974_v25  ;;  %v5552_v1 = vrot.slane %v5547_v31, %v5551_v44 }
0x1025   :  { %v5349_v13 = vpop.f32.mrb[198].mxu0 }
0x1026   :  { %v6977_v54 = vpop.f32.mrb[199].mxu0  ;;  %v5415_v63 = vsel %vm5414_vm7, %v5352_v41, -inf }
0x1027   :  { %5416 = vmax.xlane.f32.xlu1 %v5415_v63 }
0x102b   :  { %6983 = vmatpush3.bf16.xpose.msra.mxu1 %v5355_v36 }
0x102c   :  { %6984 = vmatprep.subr.bf16.mxu1 %v7974_v25 }
0x1033   :  { %6985 = vmatpush3.bf16.xpose.msra.mxu1 %v5356_v30 }
0x1034   :  { %6986 = vmatprep.subr.bf16.mxu1 %v7974_v25 }
0x103b   :  { %6987 = vmatpush3.bf16.xpose.msra.mxu1 %v5357_v57 }
0x103c   :  { %6988 = vmatprep.subr.bf16.mxu1 %v7974_v25 }
0x1043   :  { %6989 = vmatpush3.bf16.xpose.msra.mxu1 %v5358_v43 }
0x1044   :  { %6990 = vmatprep.subr.bf16.mxu1 %v7974_v25 }
0x104b   :  { %6991 = vmatpush3.bf16.xpose.msra.mxu1 %v5359_v28 }
0x104c   :  { %6992 = vmatprep.subr.bf16.mxu1 %v7974_v25 }
0x1053   :  { %6993 = vmatpush3.bf16.xpose.msra.mxu1 %v5360_v33 }
0x1054   :  { %5639 = vmatprep.subr.bf16.mxu1 %v7288_v35 }
0x105a   :  { %6995 = vmatmul.mubr.bf16.vlgmr.msra.gmra.mrb[172].mxu1 %v10048_v0  ;;  %v7292_v0 = vld [vmem:[#allocation20 + $0x20] ss:$8 sps:$4 sm:$0xff]  }
0x105b   :  { %5671 = vmatprep.mubr.bf16.mxu1 %v10305_v26  ;;  %5640 = vmatpush1.bf16.msra.mxu1 %v7286_v2 }
0x105c   :  { %5641 = vmatprep.subr.bf16.mxu1 %v7291_v29 }
0x105f   :  { %5642 = vmatpush1.bf16.msra.mxu1 %v7289_v56 }
0x1060   :  { %5643 = vmatprep.subr.bf16.mxu1 %v7294_v58 }
0x1063   :  { %5644 = vmatpush1.bf16.msra.mxu1 %v7292_v0 }
0x1064   :  { %5645 = vmatprep.subr.bf16.mxu1 %v7297_v50 }
0x1067   :  { %5646 = vmatpush1.bf16.msra.mxu1 %v7295_v16 }
0x1068   :  { %5647 = vmatprep.subr.bf16.mxu1 %v7300_v21 }
0x10b4   :  { %v5417_v26 = vpop.xlane.xlu1 %5416 }
0x10ed   :  { %v10154_v42 = vpop.f32.mrb[168].mxu1 }
0x10ee   :  { %v6956_v17 = vpop.f32.mrb[169].mxu1 }
0x10ef   :  { %v5245_v12 = vpop.f32.mrb[170].mxu1 }
0x10f0   :  { %v6957_v37 = vpop.f32.mrb[171].mxu1 }
0x112d   :  { %v5395_v34 = vpop.f32.mrb[172].mxu1 }
0x112e   :  { %v5401_v14 = vmul.f32 0.088388346, %v5395_v34  ;;  %v6996_v36 = vpop.f32.mrb[173].mxu1 }
0x112f   :  { %v5398_v8 = vpop.f32.mrb[174].mxu1 }
0x1130   :  { %v5403_v3 = vadd.f32 %v5402_v59, %v5401_v14  ;;  %v6997_v30 = vpop.f32.mrb[175].mxu1 }
0x1132   :  { %v5419_v53 = vsel %vm5418_vm8, %v5403_v3, -inf }
0x1133   :  { %5420 = vmax.xlane.f32.xlu0 %v5419_v53 }
0x11c0   :  { %v5421_v48 = vpop.xlane.xlu0 %5420 }
0x11c1   :  { %v5422_v57 = vmax.f32 %v5417_v26, %v5421_v48 }
0x11c3   :  { %v5423_v32 = vsub.f32 %v5352_v41, %v5422_v57  ;;  %v5426_v39 = vsub.f32 %v5403_v3, %v5422_v57  ;;  %v5556_v41 = vrot.slane %v5547_v31, %v5555_v52 }
0x11c5   :  { %v5424_v43 = vmul.f32 1.442695, %v5423_v32  ;;  %v5427_v47 = vmul.f32 1.442695, %v5426_v39 }
0x11c7   :  { %7632 = vpow2.f32 %v5424_v43 }
0x11c8   :  { %7634 = vpow2.f32 %v5427_v47 }
0x11d1   :  { %v7633_v40 = vpop.eup %7632 }
0x11d2   :  { %v7635_v28 = vpop.eup %7634  ;;  %v5429_v11 = vsel %vm5414_vm7, %v7633_v40, 0.0  ;;  %v5436_v22 = vpack.c.bf16 %v7633_v40, %v7633_v40 }
0x11d3   :  { %v5432_v45 = vsel %vm5418_vm8, %v7635_v28, 0.0  ;;  %5430 = vadd.xlane.f32.xlu1 %v5429_v11  ;;  %v5437_v33 = vpack.c.bf16 %v7635_v28, %v7635_v28 }
0x11d4   :  { %5433 = vadd.xlane.f32.xlu0 %v5432_v45 }
0x11d5   :  { %7015 = vmatmul.mubr.bf16.vlgmr.msra.gmra.mrb[200].mxu0 %v5437_v33 }
0x11d6   :  { %7019 = vmatpush3.bf16.msra.mxu0 %v7285_v51  ;;  %7020 = vmatprep.mubr.msk.bf16.mxu0 %vm7975_vm3, %v7974_v25  ;;  %v7298_v25 = vld [vmem:[#allocation20 + $0x40] ss:$8 sps:$4 sm:$0xff]  }
0x11d7   :  { %5648 = vmatpush1.bf16.msra.mxu1 %v7298_v25 }
0x11d8   :  { %5649 = vmatprep.subr.bf16.mxu1 %v7303_v19 }
0x11db   :  { %5650 = vmatpush1.bf16.msra.mxu1 %v7301_v55 }
0x11dc   :  { %5651 = vmatprep.subr.bf16.mxu1 %v7306_v49 }
0x11df   :  { %5652 = vmatpush1.bf16.msra.mxu1 %v7304_v4 }
0x11e0   :  { %5653 = vmatprep.subr.bf16.mxu1 %v7309_v7 }
0x11e1   :  { %7021 = vmatmul.mubr.msk.bf16.vlgmr.msra.gmra.mrb[200].mxu0 %vm1801_vm12, %v5436_v22 }
0x11e3   :  { %5654 = vmatpush1.bf16.msra.mxu1 %v7307_v15 }
0x1260   :  { %v5431_v60 = vpop.xlane.xlu1 %5430 }
0x1261   :  { %v5434_v38 = vpop.xlane.xlu0 %5433 }
0x1262   :  { %v5435_v5 = vadd.f32 %v5434_v38, %v5431_v60 }
0x1264   :  { %7636 = vrcp.f32 %v5435_v5 }
0x126e   :  { %v7637_v18 = vpop.eup %7636 }
0x12b4   :  { %v5521_v9 = vpop.f32.mrb[200].mxu0 }
0x12b5   :  { %v5528_v20 = vmul.f32 %v7637_v18, %v5521_v9  ;;  %v7022_v24 = vpop.f32.mrb[201].mxu0 }
0x12b6   :  { %v5524_v10 = vpop.f32.mrb[202].mxu0 }
0x12b7   :  { %v5529_v62 = vadd.f32 %v5528_v20, %v10154_v42  ;;  %v7023_v23 = vpop.f32.mrb[203].mxu0 }
0x12b9   :  { %v5530_v61 = vpack.c.bf16 %v5529_v62, %v5529_v62 }
0x12bb   :  { %5672 = vmatmul.mubr.bf16.vlgmr.msra.gmra.mrb[176].mxu1 %v5530_v61 }
0x138e   :  { %v5673_v6 = vpop.f32.mrb[176].mxu1 }
0x138f   :  { %v5674_v13 = vadd.f32 %v5673_v6, %v5552_v1  ;;  %v5675_v54 = vpop.f32.mrb[177].mxu1 }
0x1390   :  { %v5676_v63 = vadd.f32 %v5675_v54, %v5556_v41  ;;  %v5677_v42 = vpop.f32.mrb[178].mxu1 }
0x1391   :  { %v5678_v17 = vpop.f32.mrb[179].mxu1 }
0x1392   :  { %v5682_v12 = vcombine.low %v5674_v13, %v5676_v63 }
0x1394   :  { %6022 = vst.sshfl [vmem:[#allocation22] sm:$0x33 pattern:$0x76325410] %v5682_v12 }
0x1395   :  { %7929 = shalt.err (!%p7926_p2)
}
0x1396   :  { %s10402_s11 = sld [smem:[#allocation73_spill]] }
0x139c   :  { %s7930_s27 = scalar_lea.hbm %s10402_s11, 64 }
0x139d   :  { %p7931_p3 = scmp.ne.s32.totalorder %s10402_s11, %s7930_s27  ;;  %p7934_p4 = scmp.lt.u32.totalorder %s7930_s27, %s10402_s11 }
0x139f   :  { %p7936_p5 = pnand %p7934_p4, %p7931_p3 }
0x13a1   :  { %7939 = shalt.err (!%p7936_p5)
}
0x13a2   :  { %5701 = dma.vmem_to_hbm [thread:$0]  %s5699_s9, 64, %s10402_s11, [#allocation4]  }
0x13a3   :  { %7954 = dma.done.wait [#allocation4], 64  }
0x13a4   :  { %7955 = vsyncadd [#allocation4], 4294967232 }
0x13a5   :  { %5705 = vsyncpa [#allocation3], 1 }
0x13a6   :  { %5706 = vsyncpa [#allocation6], 1 }
0x13a7   :  { %5707 = vsyncpa [#allocation9], 1 }
0x13a8   :  { %5708 = vsyncpa [#allocation12], 1 }
0x13a9   :  { %5709 = vsyncpa [#allocation15], 1 }
0x13aa   :  { %5710 = vsyncpa [#allocation18], 1 }
0x13ab   :  { %5711 = vsyncpa [#allocation21], 1 }
0x13ac   :  { %5712 = vsyncpa [#allocation4], 1 }

</bundles_post_ra>
